<compile_context>
chip_gen: v6e
topology: v6e:2x2x1
jax: 0.10.0
libtpu: 0.0.40
codegen_flags: <defaults>
</compile_context>

<pallas_src>
import math

import jax
import jax.numpy as jnp
from jax.experimental import pallas as pl
from jax.experimental.pallas import tpu as pltpu

# ------------------------------- config -------------------------------
BATCH = 2
IMG_C, IMG_HW = 3, 64           # obs_shape = (3, 64, 64) -> OUT_DIM_64[2] = 29
NUM_FILTERS = 8
FEATURE_DIM = 32                # encoder_feature_dim == k of the Koopman operator
ACTION_DIM = 4                  # action_shape = (4,)
T_HORIZON = 5
LOG_STD_MIN, LOG_STD_MAX = -10.0, 2.0
LN_EPS = 1e-5


def _round_up(x, m):
    return ((x + m - 1) // m) * m


# --------------------------- Pallas kernels ---------------------------
def _conv_gemm_kernel(p_ref, w_ref, b_ref, o_ref):
    # relu(W @ P + b), output (C_out, N_patches): lane-dense along patches.
    y = jnp.dot(w_ref[...], p_ref[...], preferred_element_type=jnp.float32)
    o_ref[...] = jnp.maximum(y + b_ref[...], 0.0).astype(o_ref.dtype)


def conv_gemm_t(p_t, w, b, out_dtype):
    """One-grid-step transposed conv GEMM: relu(w @ p_t + b)."""
    K, Np = p_t.shape
    co, kw = w.shape
    if kw < K:                                   # pad contraction dim to match p_t
        w = jnp.pad(w, ((0, 0), (0, K - kw)))
    return pl.pallas_call(
        _conv_gemm_kernel,
        out_shape=jax.ShapeDtypeStruct((co, Np), out_dtype),
        grid=(1,),
        in_specs=[
            pl.BlockSpec((K, Np), lambda i: (0, 0)),
            pl.BlockSpec((co, K), lambda i: (0, 0)),
            pl.BlockSpec((co, 1), lambda i: (0, 0)),
        ],
        out_specs=pl.BlockSpec((co, Np), lambda i: (0, 0)),
        compiler_params=pltpu.CompilerParams(dimension_semantics=("arbitrary",)),
    )(p_t, w, b.reshape(co, 1))


def _fc_ln_head_kernel(h2_ref, fcw_ref, fcb_ref, gam_ref, bet_ref,
                       k0t_ref, kmapt_ref, gmask_ref, noise_ref, ls_ref,
                       mu_ref, pi_ref, logpi_ref, logstd_ref):
    # fc: bf16 MXU operands, f32 accumulation; LayerNorm stats in f32.
    h = jnp.dot(h2_ref[...], fcw_ref[...], preferred_element_type=jnp.float32)
    h = h + fcb_ref[...]
    mean = jnp.mean(h, axis=-1, keepdims=True)
    var = jnp.mean((h - mean) ** 2, axis=-1, keepdims=True)
    feat = gam_ref[...] * (h - mean) * jax.lax.rsqrt(var + LN_EPS) + bet_ref[...]

    # LQR gain apply:  u = -K0 @ g  +  Kmap @ g_goal.
    # The goal row (last row of the batched encoder output) is selected with a
    # mask-sum (no in-kernel value slicing needed).
    obs_term = -jnp.dot(feat, k0t_ref[...], preferred_element_type=jnp.float32)    # (BT, u)
    goal_term = jnp.dot(feat, kmapt_ref[...], preferred_element_type=jnp.float32)  # (BT, u)
    k0_vec = jnp.sum(goal_term * gmask_ref[...], axis=0, keepdims=True)            # (1, u)
    mu_pre = obs_term + k0_vec

    noise = noise_ref[...]
    log_std = jnp.tanh(ls_ref[...] + jnp.zeros_like(noise))
    log_std = LOG_STD_MIN + 0.5 * (LOG_STD_MAX - LOG_STD_MIN) * (log_std + 1.0)
    std = jnp.exp(log_std)
    pi_pre = mu_pre + noise * std

    # gaussian_logprob
    u_dim = noise.shape[-1]
    log_pi = jnp.sum(-0.5 * noise * noise - log_std, axis=-1, keepdims=True)
    log_pi = log_pi - 0.5 * math.log(2.0 * math.pi) * u_dim

    # squash
    mu = jnp.tanh(mu_pre)
    pi = jnp.tanh(pi_pre)
    log_pi = log_pi - jnp.sum(
        jnp.log(jnp.maximum(1.0 - pi * pi, 0.0) + 1e-6), axis=-1, keepdims=True)

    mu_ref[...] = mu
    pi_ref[...] = pi
    logpi_ref[...] = log_pi
    logstd_ref[...] = log_std


def fc_ln_head(h2, fc_wt, fc_b, gamma, beta, k0t, kmapt, gmask, noise, log_std_init):
    BT, Kf = h2.shape
    F = fc_wt.shape[1]
    U = k0t.shape[1]
    full = lambda shp: pl.BlockSpec(shp, lambda i: (0, 0))
    return pl.pallas_call(
        _fc_ln_head_kernel,
        out_shape=(
            jax.ShapeDtypeStruct((BT, U), jnp.float32),   # mu
            jax.ShapeDtypeStruct((BT, U), jnp.float32),   # pi
            jax.ShapeDtypeStruct((BT, 1), jnp.float32),   # log_pi
            jax.ShapeDtypeStruct((BT, U), jnp.float32),   # log_std
        ),
        grid=(1,),
        in_specs=[full((BT, Kf)), full((Kf, F)), full((1, F)), full((1, F)), full((1, F)),
                  full((F, U)), full((F, U)), full((BT, 1)), full((BT, U)), full((1, 1))],
        out_specs=(full((BT, U)), full((BT, U)), full((BT, 1)), full((BT, U))),
        compiler_params=pltpu.CompilerParams(dimension_semantics=("arbitrary",)),
    )(h2, fc_wt, fc_b.reshape(1, F), gamma.reshape(1, F), beta.reshape(1, F),
      k0t, kmapt, gmask, noise, log_std_init.reshape(1, 1))


# ------------------------------ XLA glue ------------------------------
def _im2col_t(x_nhwc, ksize, stride):
    """Transposed im2col: (K = C_in*kH*kW padded to x8, Npatch padded to x128).

    Row order is (c_in, dy, dx) to match torch_conv_weight.reshape(C_out, -1);
    column order is (b, ho, wo)."""
    B, H, W, C = x_nhwc.shape
    Ho = (H - ksize) // stride + 1
    Wo = (W - ksize) // stride + 1
    taps = []
    for dy in range(ksize):
        for dx in range(ksize):
            taps.append(x_nhwc[:, dy:dy + stride * Ho:stride,
                               dx:dx + stride * Wo:stride, :])
    p = jnp.stack(taps, axis=0)                        # (kH*kW, B, Ho, Wo, C)
    p = jnp.transpose(p, (4, 0, 1, 2, 3))              # (C, kH*kW, B, Ho, Wo)
    p = p.reshape(C * ksize * ksize, B * Ho * Wo)
    k_pad = _round_up(C * ksize * ksize, 8)
    n_pad = _round_up(B * Ho * Wo, 128)
    p = jnp.pad(p, ((0, k_pad - p.shape[0]), (0, n_pad - p.shape[1])))
    return p, Ho, Wo


def solve_lqr_gain_maps(A, Bm, q_diag_log, r_diag_log, T):
    """KoopmanLQR._solve_lqr with k[i] factored as Kmap_i @ goal (goal-linear).

    Returns K[0] (u,k) and Kmap0 (u,k) so the head (which needs g_goal) can be
    fused into the encoder-tail kernel.  Parameter-only, runs in plain JAX.
    """
    Q = jnp.diag(jnp.exp(q_diag_log))
    R = jnp.diag(jnp.exp(r_diag_log))
    V = Q
    Vmap = Q                      # v_i = Vmap_i @ goal; v_T = Q @ goal
    Bt = Bm.T
    K0, Kmap0 = None, None
    for _ in range(T):            # reversed(range(T)); last iter yields K[0], k[0]
        Vuu = Bt @ V @ Bm + R
        # TODO(synk): torch.linalg.solve has no Pallas equivalent; tiny (u x u) system.
        VuuinvBt = jnp.linalg.solve(Vuu, Bt)
        K_i = VuuinvBt @ V @ A
        Kmap_i = VuuinvBt @ Vmap
        A_BK = A - Bm @ K_i
        V = A.T @ V @ A_BK + Q
        Vmap = A_BK.T @ Vmap + Q
        K0, Kmap0 = K_i, Kmap_i
    return K0, Kmap0


@jax.jit
def koopman_actor_forward(params, obs, goal_obs, noise_key):
    B_obs = obs.shape[0]
    # One batched encoder pass: rows [0, B_obs) = obs, row B_obs = goal image.
    x = jnp.concatenate([obs, goal_obs], axis=0).astype(jnp.float32) / 255.0
    x = jnp.transpose(x, (0, 2, 3, 1))                       # NCHW -> NHWC
    BT = x.shape[0]

    # conv1 (3x3, stride 2) + ReLU as lane-dense transposed GEMM
    p1t, H1, W1 = _im2col_t(x, 3, 2)
    w1 = params["conv1_w"].reshape(NUM_FILTERS, -1)          # (8, 27)
    h1t = conv_gemm_t(p1t, w1, params["conv1_b"], jnp.float32)   # (8, Npad)
    h1 = h1t[:, :BT * H1 * W1].reshape(NUM_FILTERS, BT, H1, W1)
    h1 = jnp.transpose(h1, (1, 2, 3, 0))                     # NHWC for next im2col

    # conv2 (3x3, stride 1) + ReLU, bf16 output (MXU operand for the fc)
    p2t, H2, W2 = _im2col_t(h1, 3, 1)
    w2 = params["conv2_w"].reshape(NUM_FILTERS, -1)          # (8, 72)
    h2t = conv_gemm_t(p2t, w2, params["conv2_b"], jnp.bfloat16)  # (8, Npad) bf16
    # PyTorch flatten order (C, H, W) per image for the fc input
    h2 = h2t[:, :BT * H2 * W2].reshape(NUM_FILTERS, BT, H2, W2)
    h2 = jnp.transpose(h2, (1, 0, 2, 3)).reshape(BT, NUM_FILTERS * H2 * W2)
    fc_in = h2.shape[1]
    kf_pad = _round_up(fc_in, 128)
    h2 = jnp.pad(h2, ((0, 0), (0, kf_pad - fc_in)))

    # LQR gains (parameter-only, independent of the encoder output)
    K0, Kmap = solve_lqr_gain_maps(params["g_affine"], params["u_affine"],
                                   params["q_diag_log"], params["r_diag_log"],
                                   T_HORIZON)

    fc_wt = jnp.pad(params["fc_w"].T, ((0, kf_pad - fc_in), (0, 0))).astype(jnp.bfloat16)
    noise = jax.random.normal(noise_key, (B_obs, ACTION_DIM), jnp.float32)
    noise_full = jnp.pad(noise, ((0, BT - B_obs), (0, 0)))   # junk goal row, sliced off
    gmask = jnp.zeros((BT, 1), jnp.float32).at[BT - 1, 0].set(1.0)

    mu, pi, log_pi, log_std = fc_ln_head(
        h2, fc_wt, params["fc_b"], params["ln_gamma"], params["ln_beta"],
        K0.T, Kmap.T, gmask, noise_full, params["log_std_init"])
    return mu[:B_obs], pi[:B_obs], log_pi[:B_obs], log_std[:B_obs]


def init_params(key):
    ks = jax.random.split(key, 5)
    out_dim = ((IMG_HW - 3) // 2 + 1) - 2                    # 64 -> 31 -> 29 (OUT_DIM_64[2])
    fc_in = NUM_FILTERS * out_dim * out_dim
    return {
        # PyTorch layouts: conv (C_out, C_in, kH, kW), linear (out, in)
        "conv1_w": 0.1 * jax.random.normal(ks[0], (NUM_FILTERS, IMG_C, 3, 3), jnp.float32),
        "conv1_b": jnp.zeros((NUM_FILTERS,), jnp.float32),
        "conv2_w": 0.1 * jax.random.normal(ks[1], (NUM_FILTERS, NUM_FILTERS, 3, 3), jnp.float32),
        "conv2_b": jnp.zeros((NUM_FILTERS,), jnp.float32),
        "fc_w": (1.0 / math.sqrt(fc_in)) * jax.random.normal(ks[2], (FEATURE_DIM, fc_in), jnp.float32),
        "fc_b": jnp.zeros((FEATURE_DIM,), jnp.float32),
        "ln_gamma": jnp.ones((FEATURE_DIM,), jnp.float32),
        "ln_beta": jnp.zeros((FEATURE_DIM,), jnp.float32),
        # KoopmanLQR params (scaled vs torch's std=1 init for f32 stability over T=5)
        "g_affine": jax.random.normal(ks[3], (FEATURE_DIM, FEATURE_DIM), jnp.float32) / math.sqrt(FEATURE_DIM),
        "u_affine": jax.random.normal(ks[4], (FEATURE_DIM, ACTION_DIM), jnp.float32) / math.sqrt(FEATURE_DIM),
        "q_diag_log": jnp.zeros((FEATURE_DIM,), jnp.float32),
        "r_diag_log": jnp.zeros((ACTION_DIM,), jnp.float32),
        "log_std_init": jnp.array([math.log(1.0)], jnp.float32),
    }


if __name__ == "__main__":
    key = jax.random.PRNGKey(0)
    kp, kobs, kgoal, knoise = jax.random.split(key, 4)
    params = init_params(kp)
    obs = jax.random.uniform(kobs, (BATCH, IMG_C, IMG_HW, IMG_HW), jnp.float32, 0.0, 255.0)   # NCHW
    goal_obs = jax.random.uniform(kgoal, (1, IMG_C, IMG_HW, IMG_HW), jnp.float32, 0.0, 255.0)
    mu, pi, log_pi, log_std = koopman_actor_forward(params, obs, goal_obs, knoise)
    jax.block_until_ready((mu, pi, log_pi, log_std))
    assert mu.shape == (BATCH, ACTION_DIM)
    assert pi.shape == (BATCH, ACTION_DIM)
    assert log_pi.shape == (BATCH, 1)
    assert log_std.shape == (BATCH, ACTION_DIM)
    assert bool(jnp.all(jnp.isfinite(mu))) and bool(jnp.all(jnp.isfinite(pi)))
    assert bool(jnp.all(jnp.isfinite(log_pi))) and bool(jnp.all(jnp.isfinite(log_std)))
    print("KERNEL_OK")
</pallas_src>

<mosaic_0001>
module attributes {stable_mosaic.version = 11 : i64} {
  func.func @_conv_gemm_kernel(%arg0: i32, %arg1: memref<32x2944xf32, #tpu.memory_space<vmem>>, %arg2: memref<8x32xf32, #tpu.memory_space<vmem>>, %arg3: memref<8x1xf32, #tpu.memory_space<vmem>>, %arg4: memref<8x2944xf32, #tpu.memory_space<vmem>>) attributes {dimension_semantics = [#tpu.dimension_semantics<arbitrary>], iteration_bounds = array<i64: 1>, scalar_prefetch = 0 : i64, scratch_operands = 0 : i64, tpu.core_type = #tpu.core_type<tc>, window_params = [{pipeline_mode = #tpu.pipeline_mode<synchronous>, transform_indices = @transform_0, window_bounds = array<i64: 32, 2944>}, {pipeline_mode = #tpu.pipeline_mode<synchronous>, transform_indices = @transform_1, window_bounds = array<i64: 8, 32>}, {pipeline_mode = #tpu.pipeline_mode<synchronous>, transform_indices = @transform_2, window_bounds = array<i64: 8, 1>}, {pipeline_mode = #tpu.pipeline_mode<synchronous>, transform_indices = @transform_3, window_bounds = array<i64: 8, 2944>}]} {
    %c0 = arith.constant 0 : index
    %c0_0 = arith.constant 0 : index
    %0 = vector.load %arg2[%c0, %c0_0] : memref<8x32xf32, #tpu.memory_space<vmem>>, vector<8x32xf32>
    %c0_1 = arith.constant 0 : index
    %c0_2 = arith.constant 0 : index
    %1 = vector.load %arg1[%c0_1, %c0_2] : memref<32x2944xf32, #tpu.memory_space<vmem>>, vector<32x2944xf32>
    %cst = arith.constant dense<0.000000e+00> : vector<8x2944xf32>
    %2 = tpu.matmul %0, %1, %cst {dimension_numbers = #tpu.dot_dimension_numbers<[1], [0], [0], [1], [0, 0, 1, 1], [], []>} : vector<8x32xf32>, vector<32x2944xf32>, vector<8x2944xf32> -> vector<8x2944xf32>
    %c0_3 = arith.constant 0 : index
    %c0_4 = arith.constant 0 : index
    %3 = vector.load %arg3[%c0_3, %c0_4] : memref<8x1xf32, #tpu.memory_space<vmem>>, vector<8x1xf32>
    %4 = vector.broadcast %3 : vector<8x1xf32> to vector<8x2944xf32>
    %5 = arith.addf %2, %4 : vector<8x2944xf32>
    %cst_5 = arith.constant 0.000000e+00 : f32
    %6 = vector.broadcast %cst_5 : f32 to vector<8x2944xf32>
    %7 = arith.maximumf %5, %6 : vector<8x2944xf32>
    %c0_6 = arith.constant 0 : index
    %c0_7 = arith.constant 0 : index
    %8 = vector.load %arg4[%c0_6, %c0_7] : memref<8x2944xf32, #tpu.memory_space<vmem>>, vector<8x2944xf32>
    tpu.vector_store %arg4[%c0_6, %c0_7], %7 {strides = array<i32>} : memref<8x2944xf32, #tpu.memory_space<vmem>>, vector<8x2944xf32>,
    return
  }
  func.func @transform_0(%arg0: i32) -> (i32, i32) {
    %c0_i32 = arith.constant 0 : i32
    %c0_i32_0 = arith.constant 0 : i32
    %c0_i32_1 = arith.constant 0 : i32
    return %c0_i32, %c0_i32_0 : i32, i32
  }
  func.func @transform_1(%arg0: i32) -> (i32, i32) {
    %c0_i32 = arith.constant 0 : i32
    %c0_i32_0 = arith.constant 0 : i32
    %c0_i32_1 = arith.constant 0 : i32
    return %c0_i32, %c0_i32_0 : i32, i32
  }
  func.func @transform_2(%arg0: i32) -> (i32, i32) {
    %c0_i32 = arith.constant 0 : i32
    %c0_i32_0 = arith.constant 0 : i32
    %c0_i32_1 = arith.constant 0 : i32
    return %c0_i32, %c0_i32_0 : i32, i32
  }
  func.func @transform_3(%arg0: i32) -> (i32, i32) {
    %c0_i32 = arith.constant 0 : i32
    %c0_i32_0 = arith.constant 0 : i32
    %c0_i32_1 = arith.constant 0 : i32
    return %c0_i32, %c0_i32_0 : i32, i32
  }
}

module attributes {stable_mosaic.version = 11 : i64} {
  func.func @_conv_gemm_kernel(%arg0: i32, %arg1: memref<72x2560xf32, #tpu.memory_space<vmem>>, %arg2: memref<8x72xf32, #tpu.memory_space<vmem>>, %arg3: memref<8x1xf32, #tpu.memory_space<vmem>>, %arg4: memref<8x2560xbf16, #tpu.memory_space<vmem>>) attributes {dimension_semantics = [#tpu.dimension_semantics<arbitrary>], iteration_bounds = array<i64: 1>, scalar_prefetch = 0 : i64, scratch_operands = 0 : i64, tpu.core_type = #tpu.core_type<tc>, window_params = [{pipeline_mode = #tpu.pipeline_mode<synchronous>, transform_indices = @transform_0, window_bounds = array<i64: 72, 2560>}, {pipeline_mode = #tpu.pipeline_mode<synchronous>, transform_indices = @transform_1, window_bounds = array<i64: 8, 72>}, {pipeline_mode = #tpu.pipeline_mode<synchronous>, transform_indices = @transform_2, window_bounds = array<i64: 8, 1>}, {pipeline_mode = #tpu.pipeline_mode<synchronous>, transform_indices = @transform_3, window_bounds = array<i64: 8, 2560>}]} {
    %c0 = arith.constant 0 : index
    %c0_0 = arith.constant 0 : index
    %0 = vector.load %arg2[%c0, %c0_0] : memref<8x72xf32, #tpu.memory_space<vmem>>, vector<8x72xf32>
    %c0_1 = arith.constant 0 : index
    %c0_2 = arith.constant 0 : index
    %1 = vector.load %arg1[%c0_1, %c0_2] : memref<72x2560xf32, #tpu.memory_space<vmem>>, vector<72x2560xf32>
    %cst = arith.constant dense<0.000000e+00> : vector<8x2560xf32>
    %2 = tpu.matmul %0, %1, %cst {dimension_numbers = #tpu.dot_dimension_numbers<[1], [0], [0], [1], [0, 0, 1, 1], [], []>} : vector<8x72xf32>, vector<72x2560xf32>, vector<8x2560xf32> -> vector<8x2560xf32>
    %c0_3 = arith.constant 0 : index
    %c0_4 = arith.constant 0 : index
    %3 = vector.load %arg3[%c0_3, %c0_4] : memref<8x1xf32, #tpu.memory_space<vmem>>, vector<8x1xf32>
    %4 = vector.broadcast %3 : vector<8x1xf32> to vector<8x2560xf32>
    %5 = arith.addf %2, %4 : vector<8x2560xf32>
    %cst_5 = arith.constant 0.000000e+00 : f32
    %6 = vector.broadcast %cst_5 : f32 to vector<8x2560xf32>
    %7 = arith.maximumf %5, %6 : vector<8x2560xf32>
    %8 = arith.truncf %7 : vector<8x2560xf32> to vector<8x2560xbf16>
    %c0_6 = arith.constant 0 : index
    %c0_7 = arith.constant 0 : index
    %9 = vector.load %arg4[%c0_6, %c0_7] : memref<8x2560xbf16, #tpu.memory_space<vmem>>, vector<8x2560xbf16>
    tpu.vector_store %arg4[%c0_6, %c0_7], %8 {strides = array<i32>} : memref<8x2560xbf16, #tpu.memory_space<vmem>>, vector<8x2560xbf16>,
    return
  }
  func.func @transform_0(%arg0: i32) -> (i32, i32) {
    %c0_i32 = arith.constant 0 : i32
    %c0_i32_0 = arith.constant 0 : i32
    %c0_i32_1 = arith.constant 0 : i32
    return %c0_i32, %c0_i32_0 : i32, i32
  }
  func.func @transform_1(%arg0: i32) -> (i32, i32) {
    %c0_i32 = arith.constant 0 : i32
    %c0_i32_0 = arith.constant 0 : i32
    %c0_i32_1 = arith.constant 0 : i32
    return %c0_i32, %c0_i32_0 : i32, i32
  }
  func.func @transform_2(%arg0: i32) -> (i32, i32) {
    %c0_i32 = arith.constant 0 : i32
    %c0_i32_0 = arith.constant 0 : i32
    %c0_i32_1 = arith.constant 0 : i32
    return %c0_i32, %c0_i32_0 : i32, i32
  }
  func.func @transform_3(%arg0: i32) -> (i32, i32) {
    %c0_i32 = arith.constant 0 : i32
    %c0_i32_0 = arith.constant 0 : i32
    %c0_i32_1 = arith.constant 0 : i32
    return %c0_i32, %c0_i32_0 : i32, i32
  }
}

module attributes {stable_mosaic.version = 11 : i64} {
  func.func @_fc_ln_head_kernel(%arg0: i32, %arg1: memref<3x6784xbf16, #tpu.memory_space<vmem>>, %arg2: memref<6784x32xbf16, #tpu.memory_space<vmem>>, %arg3: memref<1x32xf32, #tpu.memory_space<vmem>>, %arg4: memref<1x32xf32, #tpu.memory_space<vmem>>, %arg5: memref<1x32xf32, #tpu.memory_space<vmem>>, %arg6: memref<32x4xf32, #tpu.memory_space<vmem>>, %arg7: memref<32x4xf32, #tpu.memory_space<vmem>>, %arg8: memref<3x1xf32, #tpu.memory_space<vmem>>, %arg9: memref<3x4xf32, #tpu.memory_space<vmem>>, %arg10: memref<1x1xf32, #tpu.memory_space<vmem>>, %arg11: memref<3x4xf32, #tpu.memory_space<vmem>>, %arg12: memref<3x4xf32, #tpu.memory_space<vmem>>, %arg13: memref<3x1xf32, #tpu.memory_space<vmem>>, %arg14: memref<3x4xf32, #tpu.memory_space<vmem>>) attributes {dimension_semantics = [#tpu.dimension_semantics<arbitrary>], iteration_bounds = array<i64: 1>, scalar_prefetch = 0 : i64, scratch_operands = 0 : i64, tpu.core_type = #tpu.core_type<tc>, window_params = [{pipeline_mode = #tpu.pipeline_mode<synchronous>, transform_indices = @transform_0, window_bounds = array<i64: 3, 6784>}, {pipeline_mode = #tpu.pipeline_mode<synchronous>, transform_indices = @transform_1, window_bounds = array<i64: 6784, 32>}, {pipeline_mode = #tpu.pipeline_mode<synchronous>, transform_indices = @transform_2, window_bounds = array<i64: 1, 32>}, {pipeline_mode = #tpu.pipeline_mode<synchronous>, transform_indices = @transform_3, window_bounds = array<i64: 1, 32>}, {pipeline_mode = #tpu.pipeline_mode<synchronous>, transform_indices = @transform_4, window_bounds = array<i64: 1, 32>}, {pipeline_mode = #tpu.pipeline_mode<synchronous>, transform_indices = @transform_5, window_bounds = array<i64: 32, 4>}, {pipeline_mode = #tpu.pipeline_mode<synchronous>, transform_indices = @transform_6, window_bounds = array<i64: 32, 4>}, {pipeline_mode = #tpu.pipeline_mode<synchronous>, transform_indices = @transform_7, window_bounds = array<i64: 3, 1>}, {pipeline_mode = #tpu.pipeline_mode<synchronous>, transform_indices = @transform_8, window_bounds = array<i64: 3, 4>}, {pipeline_mode = #tpu.pipeline_mode<synchronous>, transform_indices = @transform_9, window_bounds = array<i64: 1, 1>}, {pipeline_mode = #tpu.pipeline_mode<synchronous>, transform_indices = @transform_10, window_bounds = array<i64: 3, 4>}, {pipeline_mode = #tpu.pipeline_mode<synchronous>, transform_indices = @transform_11, window_bounds = array<i64: 3, 4>}, {pipeline_mode = #tpu.pipeline_mode<synchronous>, transform_indices = @transform_12, window_bounds = array<i64: 3, 1>}, {pipeline_mode = #tpu.pipeline_mode<synchronous>, transform_indices = @transform_13, window_bounds = array<i64: 3, 4>}]} {
    %c0 = arith.constant 0 : index
    %c0_0 = arith.constant 0 : index
    %0 = vector.load %arg1[%c0, %c0_0] : memref<3x6784xbf16, #tpu.memory_space<vmem>>, vector<3x6784xbf16>
    %c0_1 = arith.constant 0 : index
    %c0_2 = arith.constant 0 : index
    %1 = vector.load %arg2[%c0_1, %c0_2] : memref<6784x32xbf16, #tpu.memory_space<vmem>>, vector<6784x32xbf16>
    %cst = arith.constant dense<0.000000e+00> : vector<3x32xf32>
    %2 = tpu.matmul %0, %1, %cst {dimension_numbers = #tpu.dot_dimension_numbers<[1], [0], [0], [1], [0, 0, 1, 1], [], []>} : vector<3x6784xbf16>, vector<6784x32xbf16>, vector<3x32xf32> -> vector<3x32xf32>
    %c0_3 = arith.constant 0 : index
    %c0_4 = arith.constant 0 : index
    %3 = vector.load %arg3[%c0_3, %c0_4] : memref<1x32xf32, #tpu.memory_space<vmem>>, vector<1x32xf32>
    %4 = vector.broadcast %3 : vector<1x32xf32> to vector<3x32xf32>
    %5 = arith.addf %2, %4 : vector<3x32xf32>
    %cst_5 = arith.constant dense<0.000000e+00> : vector<3xf32>
    %6 = vector.multi_reduction <add>, %5, %cst_5 [1] : vector<3x32xf32> to vector<3xf32>
    %7 = vector.shape_cast %6 : vector<3xf32> to vector<3x1xf32>
    %cst_6 = arith.constant 3.200000e+01 : f32
    %8 = vector.broadcast %cst_6 : f32 to vector<3x1xf32>
    %9 = arith.divf %7, %8 : vector<3x1xf32>
    %10 = vector.broadcast %9 : vector<3x1xf32> to vector<3x32xf32>
    %11 = arith.subf %5, %10 : vector<3x32xf32>
    %12 = arith.mulf %11, %11 : vector<3x32xf32>
    %cst_7 = arith.constant dense<0.000000e+00> : vector<3xf32>
    %13 = vector.multi_reduction <add>, %12, %cst_7 [1] : vector<3x32xf32> to vector<3xf32>
    %14 = vector.shape_cast %13 : vector<3xf32> to vector<3x1xf32>
    %cst_8 = arith.constant 3.200000e+01 : f32
    %15 = vector.broadcast %cst_8 : f32 to vector<3x1xf32>
    %16 = arith.divf %14, %15 : vector<3x1xf32>
    %c0_9 = arith.constant 0 : index
    %c0_10 = arith.constant 0 : index
    %17 = vector.load %arg4[%c0_9, %c0_10] : memref<1x32xf32, #tpu.memory_space<vmem>>, vector<1x32xf32>
    %18 = vector.broadcast %9 : vector<3x1xf32> to vector<3x32xf32>
    %19 = arith.subf %5, %18 : vector<3x32xf32>
    %20 = vector.broadcast %17 : vector<1x32xf32> to vector<3x32xf32>
    %21 = arith.mulf %20, %19 : vector<3x32xf32>
    %cst_11 = arith.constant 9.99999974E-6 : f32
    %22 = vector.broadcast %cst_11 : f32 to vector<3x1xf32>
    %23 = arith.addf %16, %22 : vector<3x1xf32>
    %24 = math.rsqrt %23 : vector<3x1xf32>
    %25 = vector.broadcast %24 : vector<3x1xf32> to vector<3x32xf32>
    %26 = arith.mulf %21, %25 : vector<3x32xf32>
    %c0_12 = arith.constant 0 : index
    %c0_13 = arith.constant 0 : index
    %27 = vector.load %arg5[%c0_12, %c0_13] : memref<1x32xf32, #tpu.memory_space<vmem>>, vector<1x32xf32>
    %28 = vector.broadcast %27 : vector<1x32xf32> to vector<3x32xf32>
    %29 = arith.addf %26, %28 : vector<3x32xf32>
    %c0_14 = arith.constant 0 : index
    %c0_15 = arith.constant 0 : index
    %30 = vector.load %arg6[%c0_14, %c0_15] : memref<32x4xf32, #tpu.memory_space<vmem>>, vector<32x4xf32>
    %cst_16 = arith.constant dense<0.000000e+00> : vector<3x4xf32>
    %31 = tpu.matmul %29, %30, %cst_16 {dimension_numbers = #tpu.dot_dimension_numbers<[1], [0], [0], [1], [0, 0, 1, 1], [], []>} : vector<3x32xf32>, vector<32x4xf32>, vector<3x4xf32> -> vector<3x4xf32>
    %cst_17 = arith.constant 0.000000e+00 : f32
    %32 = vector.broadcast %cst_17 : f32 to vector<3x4xf32>
    %33 = arith.subf %32, %31 : vector<3x4xf32>
    %c0_18 = arith.constant 0 : index
    %c0_19 = arith.constant 0 : index
    %34 = vector.load %arg7[%c0_18, %c0_19] : memref<32x4xf32, #tpu.memory_space<vmem>>, vector<32x4xf32>
    %cst_20 = arith.constant dense<0.000000e+00> : vector<3x4xf32>
    %35 = tpu.matmul %29, %34, %cst_20 {dimension_numbers = #tpu.dot_dimension_numbers<[1], [0], [0], [1], [0, 0, 1, 1], [], []>} : vector<3x32xf32>, vector<32x4xf32>, vector<3x4xf32> -> vector<3x4xf32>
    %c0_21 = arith.constant 0 : index
    %c0_22 = arith.constant 0 : index
    %36 = vector.load %arg8[%c0_21, %c0_22] : memref<3x1xf32, #tpu.memory_space<vmem>>, vector<3x1xf32>
    %37 = vector.broadcast %36 : vector<3x1xf32> to vector<3x4xf32>
    %38 = arith.mulf %35, %37 : vector<3x4xf32>
    %cst_23 = arith.constant dense<0.000000e+00> : vector<4xf32>
    %39 = vector.multi_reduction <add>, %38, %cst_23 [0] : vector<3x4xf32> to vector<4xf32>
    %40 = vector.shape_cast %39 : vector<4xf32> to vector<1x4xf32>
    %41 = vector.broadcast %40 : vector<1x4xf32> to vector<3x4xf32>
    %42 = arith.addf %33, %41 : vector<3x4xf32>
    %c0_24 = arith.constant 0 : index
    %c0_25 = arith.constant 0 : index
    %43 = vector.load %arg9[%c0_24, %c0_25] : memref<3x4xf32, #tpu.memory_space<vmem>>, vector<3x4xf32>
    %c0_26 = arith.constant 0 : index
    %c0_27 = arith.constant 0 : index
    %44 = vector.load %arg10[%c0_26, %c0_27] : memref<1x1xf32, #tpu.memory_space<vmem>>, vector<1x1xf32>
    %cst_28 = arith.constant 0.000000e+00 : f32
    %45 = vector.broadcast %cst_28 : f32 to vector<3x4xf32>
    %46 = vector.broadcast %44 : vector<1x1xf32> to vector<3x4xf32>
    %47 = arith.addf %46, %45 : vector<3x4xf32>
    %48 = math.tanh %47 : vector<3x4xf32>
    %cst_29 = arith.constant 1.000000e+00 : f32
    %49 = vector.broadcast %cst_29 : f32 to vector<3x4xf32>
    %50 = arith.addf %48, %49 : vector<3x4xf32>
    %cst_30 = arith.constant 6.000000e+00 : f32
    %51 = vector.broadcast %cst_30 : f32 to vector<3x4xf32>
    %52 = arith.mulf %51, %50 : vector<3x4xf32>
    %cst_31 = arith.constant -1.000000e+01 : f32
    %53 = vector.broadcast %cst_31 : f32 to vector<3x4xf32>
    %54 = arith.addf %53, %52 : vector<3x4xf32>
    %55 = math.exp %54 : vector<3x4xf32>
    %56 = arith.mulf %43, %55 : vector<3x4xf32>
    %57 = arith.addf %42, %56 : vector<3x4xf32>
    %cst_32 = arith.constant -5.000000e-01 : f32
    %58 = vector.broadcast %cst_32 : f32 to vector<3x4xf32>
    %59 = arith.mulf %58, %43 : vector<3x4xf32>
    %60 = arith.mulf %59, %43 : vector<3x4xf32>
    %61 = arith.subf %60, %54 : vector<3x4xf32>
    %cst_33 = arith.constant dense<0.000000e+00> : vector<3xf32>
    %62 = vector.multi_reduction <add>, %61, %cst_33 [1] : vector<3x4xf32> to vector<3xf32>
    %63 = vector.shape_cast %62 : vector<3xf32> to vector<3x1xf32>
    %cst_34 = arith.constant 3.67575407 : f32
    %64 = vector.broadcast %cst_34 : f32 to vector<3x1xf32>
    %65 = arith.subf %63, %64 : vector<3x1xf32>
    %66 = math.tanh %42 : vector<3x4xf32>
    %67 = math.tanh %57 : vector<3x4xf32>
    %68 = arith.mulf %67, %67 : vector<3x4xf32>
    %cst_35 = arith.constant 1.000000e+00 : f32
    %69 = vector.broadcast %cst_35 : f32 to vector<3x4xf32>
    %70 = arith.subf %69, %68 : vector<3x4xf32>
    %cst_36 = arith.constant 0.000000e+00 : f32
    %71 = vector.broadcast %cst_36 : f32 to vector<3x4xf32>
    %72 = arith.maximumf %70, %71 : vector<3x4xf32>
    %cst_37 = arith.constant 9.99999997E-7 : f32
    %73 = vector.broadcast %cst_37 : f32 to vector<3x4xf32>
    %74 = arith.addf %72, %73 : vector<3x4xf32>
    %75 = math.log %74 : vector<3x4xf32>
    %cst_38 = arith.constant dense<0.000000e+00> : vector<3xf32>
    %76 = vector.multi_reduction <add>, %75, %cst_38 [1] : vector<3x4xf32> to vector<3xf32>
    %77 = vector.shape_cast %76 : vector<3xf32> to vector<3x1xf32>
    %78 = arith.subf %65, %77 : vector<3x1xf32>
    %c0_39 = arith.constant 0 : index
    %c0_40 = arith.constant 0 : index
    %79 = vector.load %arg11[%c0_39, %c0_40] : memref<3x4xf32, #tpu.memory_space<vmem>>, vector<3x4xf32>
    tpu.vector_store %arg11[%c0_39, %c0_40], %66 {strides = array<i32>} : memref<3x4xf32, #tpu.memory_space<vmem>>, vector<3x4xf32>,
    %c0_41 = arith.constant 0 : index
    %c0_42 = arith.constant 0 : index
    %80 = vector.load %arg12[%c0_41, %c0_42] : memref<3x4xf32, #tpu.memory_space<vmem>>, vector<3x4xf32>
    tpu.vector_store %arg12[%c0_41, %c0_42], %67 {strides = array<i32>} : memref<3x4xf32, #tpu.memory_space<vmem>>, vector<3x4xf32>,
    %c0_43 = arith.constant 0 : index
    %c0_44 = arith.constant 0 : index
    %81 = vector.load %arg13[%c0_43, %c0_44] : memref<3x1xf32, #tpu.memory_space<vmem>>, vector<3x1xf32>
    tpu.vector_store %arg13[%c0_43, %c0_44], %78 {strides = array<i32>} : memref<3x1xf32, #tpu.memory_space<vmem>>, vector<3x1xf32>,
    %c0_45 = arith.constant 0 : index
    %c0_46 = arith.constant 0 : index
    %82 = vector.load %arg14[%c0_45, %c0_46] : memref<3x4xf32, #tpu.memory_space<vmem>>, vector<3x4xf32>
    tpu.vector_store %arg14[%c0_45, %c0_46], %54 {strides = array<i32>} : memref<3x4xf32, #tpu.memory_space<vmem>>, vector<3x4xf32>,
    return
  }
  func.func @transform_0(%arg0: i32) -> (i32, i32) {
    %c0_i32 = arith.constant 0 : i32
    %c0_i32_0 = arith.constant 0 : i32
    %c0_i32_1 = arith.constant 0 : i32
    return %c0_i32, %c0_i32_0 : i32, i32
  }
  func.func @transform_1(%arg0: i32) -> (i32, i32) {
    %c0_i32 = arith.constant 0 : i32
    %c0_i32_0 = arith.constant 0 : i32
    %c0_i32_1 = arith.constant 0 : i32
    return %c0_i32, %c0_i32_0 : i32, i32
  }
  func.func @transform_2(%arg0: i32) -> (i32, i32) {
    %c0_i32 = arith.constant 0 : i32
    %c0_i32_0 = arith.constant 0 : i32
    %c0_i32_1 = arith.constant 0 : i32
    return %c0_i32, %c0_i32_0 : i32, i32
  }
  func.func @transform_3(%arg0: i32) -> (i32, i32) {
    %c0_i32 = arith.constant 0 : i32
    %c0_i32_0 = arith.constant 0 : i32
    %c0_i32_1 = arith.constant 0 : i32
    return %c0_i32, %c0_i32_0 : i32, i32
  }
  func.func @transform_4(%arg0: i32) -> (i32, i32) {
    %c0_i32 = arith.constant 0 : i32
    %c0_i32_0 = arith.constant 0 : i32
    %c0_i32_1 = arith.constant 0 : i32
    return %c0_i32, %c0_i32_0 : i32, i32
  }
  func.func @transform_5(%arg0: i32) -> (i32, i32) {
    %c0_i32 = arith.constant 0 : i32
    %c0_i32_0 = arith.constant 0 : i32
    %c0_i32_1 = arith.constant 0 : i32
    return %c0_i32, %c0_i32_0 : i32, i32
  }
  func.func @transform_6(%arg0: i32) -> (i32, i32) {
    %c0_i32 = arith.constant 0 : i32
    %c0_i32_0 = arith.constant 0 : i32
    %c0_i32_1 = arith.constant 0 : i32
    return %c0_i32, %c0_i32_0 : i32, i32
  }
  func.func @transform_7(%arg0: i32) -> (i32, i32) {
    %c0_i32 = arith.constant 0 : i32
    %c0_i32_0 = arith.constant 0 : i32
    %c0_i32_1 = arith.constant 0 : i32
    return %c0_i32, %c0_i32_0 : i32, i32
  }
  func.func @transform_8(%arg0: i32) -> (i32, i32) {
    %c0_i32 = arith.constant 0 : i32
    %c0_i32_0 = arith.constant 0 : i32
    %c0_i32_1 = arith.constant 0 : i32
    return %c0_i32, %c0_i32_0 : i32, i32
  }
  func.func @transform_9(%arg0: i32) -> (i32, i32) {
    %c0_i32 = arith.constant 0 : i32
    %c0_i32_0 = arith.constant 0 : i32
    %c0_i32_1 = arith.constant 0 : i32
    return %c0_i32, %c0_i32_0 : i32, i32
  }
  func.func @transform_10(%arg0: i32) -> (i32, i32) {
    %c0_i32 = arith.constant 0 : i32
    %c0_i32_0 = arith.constant 0 : i32
    %c0_i32_1 = arith.constant 0 : i32
    return %c0_i32, %c0_i32_0 : i32, i32
  }
  func.func @transform_11(%arg0: i32) -> (i32, i32) {
    %c0_i32 = arith.constant 0 : i32
    %c0_i32_0 = arith.constant 0 : i32
    %c0_i32_1 = arith.constant 0 : i32
    return %c0_i32, %c0_i32_0 : i32, i32
  }
  func.func @transform_12(%arg0: i32) -> (i32, i32) {
    %c0_i32 = arith.constant 0 : i32
    %c0_i32_0 = arith.constant 0 : i32
    %c0_i32_1 = arith.constant 0 : i32
    return %c0_i32, %c0_i32_0 : i32, i32
  }
  func.func @transform_13(%arg0: i32) -> (i32, i32) {
    %c0_i32 = arith.constant 0 : i32
    %c0_i32_0 = arith.constant 0 : i32
    %c0_i32_1 = arith.constant 0 : i32
    return %c0_i32, %c0_i32_0 : i32, i32
  }
}

</mosaic_0001>

<bundles_post_ra>
// kernel: koopman_actor_forward.3
= control target key start
LH: loop header
LB: loop body
LE: loop exit
PB: predicated region body
PF: predicated region fallthrough
CT: control target
= control target key end

     0   :  { %v1050_v3 = vmov 0.0   ;;  %vm113_vm0 = vcmask 261120   ;;  %vm1051_vm1 = vmmov 0   ;;  %s1491_s0 = inlined_call_operand.vmem [shape: f32[32,2944], index: 0, kind: input, shape index: {}]   ;;  %s1492_s1 = inlined_call_operand.vmem [shape: f32[8,32], index: 1, kind: input, shape index: {}]   ;;  %s1493_s2 = inlined_call_operand.vmem [shape: f32[8,1], index: 2, kind: input, shape index: {}]   ;;  %s1494_s3 = inlined_call_operand.vmem [shape: f32[8,2944], index: 3, kind: output, shape index: {}]  }
   0x1   :  { %v85_v0 = vld [vmem:[%s1491_s0 + $0x230] sm:$0xff]  ;;  %v87_v1 = vld [vmem:[%s1491_s0 + $0x240] sm:$0xff]  ;;  %v84_v2 = vld [vmem:[%s1491_s0 + $0x228] sm:$0xff]  ;;  %181 = vmatprep.mubr.f32.mxu0 %v1050_v3  ;;  %252 = vmatprep.mubr.f32.mxu1 %v1050_v3 }
   0x2   :  { %141 = vmatprep.subr.mxu0 %v85_v0  ;;  %212 = vmatprep.subr.mxu1 %v87_v1  ;;  %v86_v4 = vld [vmem:[%s1491_s0 + $0x238] sm:$0xff]  ;;  %v64_v6 = vld [vmem:[%s1491_s0 + $0x188] sm:$0xff]  ;;  %v61_v7 = vld [vmem:[%s1491_s0 + $0x170] sm:$0xff] }
   0x3   :  { %v62_v5 = vld [vmem:[%s1491_s0 + $0x178] sm:$0xff]  ;;  %142 = vmatpush1.msra.mxu0 %v84_v2  ;;  %213 = vmatpush1.msra.mxu1 %v86_v4  ;;  %v63_v8 = vld [vmem:[%s1491_s0 + $0x180] sm:$0xff]  ;;  %v41_v10 = vld [vmem:[%s1491_s0 + $0xd0] sm:$0xff] }
   0x4   :  { %v39_v9 = vld [vmem:[%s1491_s0 + $0xc0] sm:$0xff]  ;;  %143 = vmatprep.subr.mxu0 %v62_v5  ;;  %214 = vmatprep.subr.mxu1 %v64_v6  ;;  %v38_v11 = vld [vmem:[%s1491_s0 + $0xb8] sm:$0xff]  ;;  %v40_v12 = vld [vmem:[%s1491_s0 + $0xc8] sm:$0xff] }
   0x5   :  { %144 = vmatpush1.msra.mxu0 %v61_v7  ;;  %215 = vmatpush1.msra.mxu1 %v63_v8  ;;  %v16_v13 = vld [vmem:[%s1491_s0 + $0x8] sm:$0xff]  ;;  %v18_v14 = vld [vmem:[%s1491_s0 + $0x18] sm:$0xff]  ;;  %v15_v15 = vld [vmem:[%s1491_s0] sm:$0xff] }
   0x6   :  { %145 = vmatprep.subr.mxu0 %v39_v9  ;;  %216 = vmatprep.subr.mxu1 %v41_v10  ;;  %v17_v16 = vld [vmem:[%s1491_s0 + $0x10] sm:$0xff]  ;;  %v1126_v17 = vld [vmem:[%s1492_s1] sm:$0xff]  ;;  %v88_v20 = vld [vmem:[%s1491_s0 + $0x248] sm:$0xff] }
   0x7   :  { %146 = vmatpush1.msra.mxu0 %v38_v11  ;;  %217 = vmatpush1.msra.mxu1 %v40_v12  ;;  %v89_v18 = vld [vmem:[%s1491_s0 + $0x250] sm:$0xff]  ;;  %v91_v19 = vld [vmem:[%s1491_s0 + $0x260] sm:$0xff]  ;;  %v90_v21 = vld [vmem:[%s1491_s0 + $0x258] sm:$0xff] }
   0x8   :  { %147 = vmatprep.subr.mxu0 %v16_v13  ;;  %218 = vmatprep.subr.mxu1 %v18_v14  ;;  %v66_v22 = vld [vmem:[%s1491_s0 + $0x198] sm:$0xff]  ;;  %v68_v23 = vld [vmem:[%s1491_s0 + $0x1a8] sm:$0xff]  ;;  %v65_v24 = vld [vmem:[%s1491_s0 + $0x190] sm:$0xff] }
   0x9   :  { %148 = vmatpush1.msra.mxu0 %v15_v15  ;;  %219 = vmatpush1.msra.mxu1 %v17_v16  ;;  %v67_v25 = vld [vmem:[%s1491_s0 + $0x1a0] sm:$0xff]  ;;  %v45_v27 = vld [vmem:[%s1491_s0 + $0xf0] sm:$0xff]  ;;  %v42_v28 = vld [vmem:[%s1491_s0 + $0xd8] sm:$0xff] }
   0xa   :  { %1018 = vmatmul.mubr.msk.f32.vlgmr.msra.gmra.mxu0 %vm113_vm0, %v1126_v17  ;;  %283 = vmatprep.subr.mxu0 %v89_v18  ;;  %v43_v26 = vld [vmem:[%s1491_s0 + $0xe0] sm:$0xff]  ;;  %v44_v29 = vld [vmem:[%s1491_s0 + $0xe8] sm:$0xff]  ;;  %v22_v31 = vld [vmem:[%s1491_s0 + $0x38] sm:$0xff] }
   0xb   :  { %354 = vmatprep.subr.mxu1 %v91_v19  ;;  %1019 = vmatmul.mubr.msk.f32.vlgmr.msra.gmra.mxu1 %vm113_vm0, %v1126_v17  ;;  %v20_v30 = vld [vmem:[%s1491_s0 + $0x28] sm:$0xff]  ;;  %v19_v32 = vld [vmem:[%s1491_s0 + $0x20] sm:$0xff]  ;;  %v21_v33 = vld [vmem:[%s1491_s0 + $0x30] sm:$0xff] }
   0xc   :  { %284 = vmatpush1.msra.mxu0 %v88_v20  ;;  %355 = vmatpush1.msra.mxu1 %v90_v21  ;;  %v93_v34 = vld [vmem:[%s1491_s0 + $0x270] sm:$0xff]  ;;  %v95_v35 = vld [vmem:[%s1491_s0 + $0x280] sm:$0xff]  ;;  %v92_v36 = vld [vmem:[%s1491_s0 + $0x268] sm:$0xff] }
   0xd   :  { %285 = vmatprep.subr.mxu0 %v66_v22  ;;  %356 = vmatprep.subr.mxu1 %v68_v23  ;;  %v94_v37 = vld [vmem:[%s1491_s0 + $0x278] sm:$0xff]  ;;  %v72_v39 = vld [vmem:[%s1491_s0 + $0x1c8] sm:$0xff]  ;;  %v69_v40 = vld [vmem:[%s1491_s0 + $0x1b0] sm:$0xff] }
   0xe   :  { %286 = vmatpush1.msra.mxu0 %v65_v24  ;;  %357 = vmatpush1.msra.mxu1 %v67_v25  ;;  %v70_v38 = vld [vmem:[%s1491_s0 + $0x1b8] sm:$0xff]  ;;  %v71_v41 = vld [vmem:[%s1491_s0 + $0x1c0] sm:$0xff]  ;;  %v49_v43 = vld [vmem:[%s1491_s0 + $0x110] sm:$0xff] }
   0xf   :  { %287 = vmatprep.subr.mxu0 %v43_v26  ;;  %358 = vmatprep.subr.mxu1 %v45_v27  ;;  %v47_v42 = vld [vmem:[%s1491_s0 + $0x100] sm:$0xff]  ;;  %v46_v44 = vld [vmem:[%s1491_s0 + $0xf8] sm:$0xff]  ;;  %v48_v45 = vld [vmem:[%s1491_s0 + $0x108] sm:$0xff] }
  0x10   :  { %288 = vmatpush1.msra.mxu0 %v42_v28  ;;  %359 = vmatpush1.msra.mxu1 %v44_v29  ;;  %v24_v46 = vld [vmem:[%s1491_s0 + $0x48] sm:$0xff]  ;;  %v26_v47 = vld [vmem:[%s1491_s0 + $0x58] sm:$0xff]  ;;  %v23_v48 = vld [vmem:[%s1491_s0 + $0x40] sm:$0xff] }
  0x11   :  { %289 = vmatprep.subr.mxu0 %v20_v30  ;;  %360 = vmatprep.subr.mxu1 %v22_v31  ;;  %v25_v49 = vld [vmem:[%s1491_s0 + $0x50] sm:$0xff]  ;;  %v99_v51 = vld [vmem:[%s1491_s0 + $0x2a0] sm:$0xff]  ;;  %v96_v52 = vld [vmem:[%s1491_s0 + $0x288] sm:$0xff] }
  0x12   :  { %290 = vmatpush1.msra.mxu0 %v19_v32  ;;  %323 = vmatprep.mubr.f32.mxu0 %v1050_v3  ;;  %v97_v50 = vld [vmem:[%s1491_s0 + $0x290] sm:$0xff]  ;;  %v98_v53 = vld [vmem:[%s1491_s0 + $0x298] sm:$0xff]  ;;  %v76_v55 = vld [vmem:[%s1491_s0 + $0x1e8] sm:$0xff] }
  0x13   :  { %361 = vmatpush1.msra.mxu1 %v21_v33  ;;  %1020 = vmatmul.mubr.msk.f32.vlgmr.msra.gmra.mxu0 %vm113_vm0, %v1126_v17  ;;  %v74_v54 = vld [vmem:[%s1491_s0 + $0x1d8] sm:$0xff]  ;;  %v73_v56 = vld [vmem:[%s1491_s0 + $0x1d0] sm:$0xff]  ;;  %v75_v57 = vld [vmem:[%s1491_s0 + $0x1e0] sm:$0xff]  ;;  %v1052_v33 = vmov 0  }
  0x14   :  { %394 = vmatprep.mubr.f32.mxu1 %v1050_v3  ;;  %425 = vmatprep.subr.mxu0 %v93_v34  ;;  %v51_v58 = vld [vmem:[%s1491_s0 + $0x120] sm:$0xff]  ;;  %v53_v59 = vld [vmem:[%s1491_s0 + $0x130] sm:$0xff]  ;;  %v50_v60 = vld [vmem:[%s1491_s0 + $0x118] sm:$0xff] }
  0x15   :  { %496 = vmatprep.subr.mxu1 %v95_v35  ;;  %1021 = vmatmul.mubr.msk.f32.vlgmr.msra.gmra.mxu1 %vm113_vm0, %v1126_v17  ;;  %v52_v61 = vld [vmem:[%s1491_s0 + $0x128] sm:$0xff]  ;;  %v30_v63 = vld [vmem:[%s1491_s0 + $0x78] sm:$0xff]  ;;  %v27_v0 = vld [vmem:[%s1491_s0 + $0x60] sm:$0xff] }
  0x16   :  { %426 = vmatpush1.msra.mxu0 %v92_v36  ;;  %497 = vmatpush1.msra.mxu1 %v94_v37  ;;  %v28_v62 = vld [vmem:[%s1491_s0 + $0x68] sm:$0xff]  ;;  %v29_v1 = vld [vmem:[%s1491_s0 + $0x70] sm:$0xff]  ;;  %v103_v4 = vld [vmem:[%s1491_s0 + $0x2c0] sm:$0xff] }
  0x17   :  { %427 = vmatprep.subr.mxu0 %v70_v38  ;;  %498 = vmatprep.subr.mxu1 %v72_v39  ;;  %v101_v2 = vld [vmem:[%s1491_s0 + $0x2b0] sm:$0xff]  ;;  %v100_v5 = vld [vmem:[%s1491_s0 + $0x2a8] sm:$0xff]  ;;  %v102_v6 = vld [vmem:[%s1491_s0 + $0x2b8] sm:$0xff] }
  0x18   :  { %428 = vmatpush1.msra.mxu0 %v69_v40  ;;  %499 = vmatpush1.msra.mxu1 %v71_v41  ;;  %v78_v7 = vld [vmem:[%s1491_s0 + $0x1f8] sm:$0xff]  ;;  %v80_v8 = vld [vmem:[%s1491_s0 + $0x208] sm:$0xff]  ;;  %v77_v9 = vld [vmem:[%s1491_s0 + $0x1f0] sm:$0xff] }
  0x19   :  { %429 = vmatprep.subr.mxu0 %v47_v42  ;;  %500 = vmatprep.subr.mxu1 %v49_v43  ;;  %v79_v10 = vld [vmem:[%s1491_s0 + $0x200] sm:$0xff]  ;;  %v57_v12 = vld [vmem:[%s1491_s0 + $0x150] sm:$0xff]  ;;  %v54_v13 = vld [vmem:[%s1491_s0 + $0x138] sm:$0xff] }
  0x1a   :  { %430 = vmatpush1.msra.mxu0 %v46_v44  ;;  %501 = vmatpush1.msra.mxu1 %v48_v45  ;;  %v55_v11 = vld [vmem:[%s1491_s0 + $0x140] sm:$0xff]  ;;  %v56_v14 = vld [vmem:[%s1491_s0 + $0x148] sm:$0xff]  ;;  %v34_v16 = vld [vmem:[%s1491_s0 + $0x98] sm:$0xff] }
  0x1b   :  { %431 = vmatprep.subr.mxu0 %v24_v46  ;;  %502 = vmatprep.subr.mxu1 %v26_v47  ;;  %v32_v15 = vld [vmem:[%s1491_s0 + $0x88] sm:$0xff]  ;;  %v31_v18 = vld [vmem:[%s1491_s0 + $0x80] sm:$0xff]  ;;  %v33_v19 = vld [vmem:[%s1491_s0 + $0x90] sm:$0xff] }
  0x1c   :  { %432 = vmatpush1.msra.mxu0 %v23_v48  ;;  %465 = vmatprep.mubr.f32.mxu0 %v1050_v3  ;;  %v105_v20 = vld [vmem:[%s1491_s0 + $0x2d0] sm:$0xff]  ;;  %v104_v21 = vld [vmem:[%s1491_s0 + $0x2c8] sm:$0xff]  ;;  %v106_v22 = vld [vmem:[%s1491_s0 + $0x2d8] sm:$0xff] }
  0x1d   :  { %503 = vmatpush1.msra.mxu1 %v25_v49  ;;  %1022 = vmatmul.mubr.msk.f32.vlgmr.msra.gmra.mxu0 %vm113_vm0, %v1126_v17  ;;  %v82_v23 = vld [vmem:[%s1491_s0 + $0x218] sm:$0xff]  ;;  %v81_v24 = vld [vmem:[%s1491_s0 + $0x210] sm:$0xff]  ;;  %v83_v25 = vld [vmem:[%s1491_s0 + $0x220] sm:$0xff] }
  0x1e   :  { %536 = vmatprep.mubr.f32.mxu1 %v1050_v3  ;;  %567 = vmatprep.subr.mxu0 %v97_v50  ;;  %v59_v26 = vld [vmem:[%s1491_s0 + $0x160] sm:$0xff]  ;;  %v58_v27 = vld [vmem:[%s1491_s0 + $0x158] sm:$0xff]  ;;  %v60_v28 = vld [vmem:[%s1491_s0 + $0x168] sm:$0xff] }
  0x1f   :  { %638 = vmatprep.subr.mxu1 %v99_v51  ;;  %1023 = vmatmul.mubr.msk.f32.vlgmr.msra.gmra.mxu1 %vm113_vm0, %v1126_v17  ;;  %v36_v29 = vld [vmem:[%s1491_s0 + $0xa8] sm:$0xff]  ;;  %v35_v30 = vld [vmem:[%s1491_s0 + $0xa0] sm:$0xff]  ;;  %v37_v31 = vld [vmem:[%s1491_s0 + $0xb0] sm:$0xff] }
  0x20   :  { %568 = vmatpush1.msra.mxu0 %v96_v52  ;;  %639 = vmatpush1.msra.mxu1 %v98_v53  ;;  %v107_v32 = vld [vmem:[%s1493_s2] sm:$0xff] }
  0x21   :  { %569 = vmatprep.subr.mxu0 %v74_v54  ;;  %640 = vmatprep.subr.mxu1 %v76_v55 }
  0x22   :  { %570 = vmatpush1.msra.mxu0 %v73_v56  ;;  %641 = vmatpush1.msra.mxu1 %v75_v57 }
  0x23   :  { %571 = vmatprep.subr.mxu0 %v51_v58  ;;  %642 = vmatprep.subr.mxu1 %v53_v59 }
  0x24   :  { %572 = vmatpush1.msra.mxu0 %v50_v60  ;;  %643 = vmatpush1.msra.mxu1 %v52_v61 }
  0x25   :  { %573 = vmatprep.subr.mxu0 %v28_v62  ;;  %644 = vmatprep.subr.mxu1 %v30_v63 }
  0x26   :  { %574 = vmatpush1.msra.mxu0 %v27_v0  ;;  %607 = vmatprep.mubr.f32.mxu0 %v1050_v3 }
  0x27   :  { %645 = vmatpush1.msra.mxu1 %v29_v1  ;;  %1024 = vmatmul.mubr.msk.f32.vlgmr.msra.gmra.mxu0 %vm113_vm0, %v1126_v17 }
  0x28   :  { %678 = vmatprep.mubr.f32.mxu1 %v1050_v3  ;;  %709 = vmatprep.subr.mxu0 %v101_v2 }
  0x29   :  { %780 = vmatprep.subr.mxu1 %v103_v4  ;;  %1025 = vmatmul.mubr.msk.f32.vlgmr.msra.gmra.mxu1 %vm113_vm0, %v1126_v17 }
  0x2a   :  { %710 = vmatpush1.msra.mxu0 %v100_v5  ;;  %781 = vmatpush1.msra.mxu1 %v102_v6 }
  0x2b   :  { %711 = vmatprep.subr.mxu0 %v78_v7  ;;  %782 = vmatprep.subr.mxu1 %v80_v8 }
  0x2c   :  { %712 = vmatpush1.msra.mxu0 %v77_v9  ;;  %783 = vmatpush1.msra.mxu1 %v79_v10 }
  0x2d   :  { %713 = vmatprep.subr.mxu0 %v55_v11  ;;  %784 = vmatprep.subr.mxu1 %v57_v12 }
  0x2e   :  { %714 = vmatpush1.msra.mxu0 %v54_v13  ;;  %785 = vmatpush1.msra.mxu1 %v56_v14 }
  0x2f   :  { %715 = vmatprep.subr.mxu0 %v32_v15  ;;  %786 = vmatprep.subr.mxu1 %v34_v16 }
  0x30   :  { %716 = vmatpush1.msra.mxu0 %v31_v18  ;;  %749 = vmatprep.mubr.f32.mxu0 %v1050_v3 }
  0x31   :  { %787 = vmatpush1.msra.mxu1 %v33_v19  ;;  %1026 = vmatmul.mubr.msk.f32.vlgmr.msra.gmra.mxu0 %vm113_vm0, %v1126_v17 }
  0x32   :  { %820 = vmatprep.mubr.f32.mxu1 %v1050_v3  ;;  %851 = vmatprep.subr.mxu0 %v105_v20 }
  0x33   :  { %1035 = vmatprep.subr.mxu1 %v1050_v3  ;;  %1027 = vmatmul.mubr.msk.f32.vlgmr.msra.gmra.mxu1 %vm113_vm0, %v1126_v17 }
  0x34   :  { %852 = vmatpush1.msra.mxu0 %v104_v21  ;;  %1036 = vmatpush3.msra.mxu1 %v106_v22 }
  0x35   :  { %853 = vmatprep.subr.mxu0 %v82_v23  ;;  %1037 = vmatprep.subr.mxu1 %v1050_v3 }
  0x36   :  { %854 = vmatpush1.msra.mxu0 %v81_v24  ;;  %1038 = vmatpush3.msra.mxu1 %v83_v25 }
  0x37   :  { %855 = vmatprep.subr.mxu0 %v59_v26  ;;  %1039 = vmatprep.subr.mxu1 %v1050_v3 }
  0x38   :  { %856 = vmatpush1.msra.mxu0 %v58_v27  ;;  %1040 = vmatpush3.msra.mxu1 %v60_v28 }
  0x39   :  { %857 = vmatprep.subr.mxu0 %v36_v29  ;;  %1041 = vmatprep.subr.mxu1 %v1050_v3 }
  0x3a   :  { %858 = vmatpush1.msra.mxu0 %v35_v30  ;;  %891 = vmatprep.mubr.f32.mxu0 %v1050_v3 }
  0x3b   :  { %1042 = vmatpush3.msra.mxu1 %v37_v31  ;;  %1043 = vmatprep.mubr.msk.f32.mxu1 %vm1051_vm1, %v1050_v3 }
  0x3c   :  { %1028 = vmatmul.mubr.msk.f32.vlgmr.msra.gmra.mxu0 %vm113_vm0, %v1126_v17  ;;  %1044 = vmatmul.mubr.msk.f32.vlgmr.msra.gmra.mxu1 %vm113_vm0, %v1126_v17 }
  0x3d   :  { %1049 = vset.pattern.permute.xlu0 %v1052_v33 }
  0x3e   :  { %110 = vperm.xlu0 %1049, %v107_v32  }
  0xb9   :  { %v1397_v34 = vpop.permute.xlu0 %110 }
  0xca   :  { %v183_v35 = vpop.f32.mrf.mxu0 }
  0xcb   :  { %v184_v36 = vadd.f32 %v183_v35, %v1397_v34  ;;  %v254_v37 = vpop.f32.mrf.mxu1 }
  0xcc   :  { %v255_v3 = vadd.f32 %v254_v37, %v1397_v34  ;;  %v185_v38 = vpop.f32.mrf.mxu0 }
  0xcd   :  { %v968_v39 = vmax.f32 %v184_v36, 0.0  ;;  %v186_v40 = vadd.f32 %v185_v38, %v1397_v34  ;;  %v256_v41 = vpop.f32.mrf.mxu1 }
  0xce   :  { %v970_v42 = vmax.f32 %v255_v3, 0.0  ;;  %v257_v43 = vadd.f32 %v256_v41, %v1397_v34 }
  0xcf   :  { %991 = vst [vmem:[%s1494_s3] sm:$0xff] %v968_v39  ;;  %v969_v17 = vmax.f32 %v186_v40, 0.0 }
  0xd0   :  { %993 = vst [vmem:[%s1494_s3 + $0x10] sm:$0xff] %v970_v42  ;;  %v971_v44 = vmax.f32 %v257_v43, 0.0 }
  0xd1   :  { %992 = vst [vmem:[%s1494_s3 + $0x8] sm:$0xff] %v969_v17 }
  0xd2   :  { %994 = vst [vmem:[%s1494_s3 + $0x18] sm:$0xff] %v971_v44 }
  0xd3   :  { %v325_v45 = vpop.f32.mrf.mxu0 }
  0xd4   :  { %v326_v46 = vadd.f32 %v325_v45, %v1397_v34 }
  0xd5   :  { %v396_v47 = vpop.f32.mrf.mxu1  ;;  %v327_v48 = vpop.f32.mrf.mxu0 }
  0xd6   :  { %v972_v49 = vmax.f32 %v326_v46, 0.0  ;;  %v397_v50 = vadd.f32 %v396_v47, %v1397_v34  ;;  %v328_v51 = vadd.f32 %v327_v48, %v1397_v34 }
  0xd7   :  { %v398_v52 = vpop.f32.mrf.mxu1 }
  0xd8   :  { %995 = vst [vmem:[%s1494_s3 + $0x20] sm:$0xff] %v972_v49  ;;  %v974_v53 = vmax.f32 %v397_v50, 0.0  ;;  %v973_v54 = vmax.f32 %v328_v51, 0.0  ;;  %v399_v55 = vadd.f32 %v398_v52, %v1397_v34 }
  0xda   :  { %997 = vst [vmem:[%s1494_s3 + $0x30] sm:$0xff] %v974_v53  ;;  %996 = vst [vmem:[%s1494_s3 + $0x28] sm:$0xff] %v973_v54  ;;  %v975_v56 = vmax.f32 %v399_v55, 0.0 }
  0xdc   :  { %998 = vst [vmem:[%s1494_s3 + $0x38] sm:$0xff] %v975_v56 }
  0xdd   :  { %v467_v57 = vpop.f32.mrf.mxu0 }
  0xde   :  { %v468_v58 = vadd.f32 %v467_v57, %v1397_v34 }
  0xdf   :  { %v538_v59 = vpop.f32.mrf.mxu1  ;;  %v469_v60 = vpop.f32.mrf.mxu0 }
  0xe0   :  { %v976_v61 = vmax.f32 %v468_v58, 0.0  ;;  %v539_v62 = vadd.f32 %v538_v59, %v1397_v34  ;;  %v470_v63 = vadd.f32 %v469_v60, %v1397_v34 }
  0xe1   :  { %v540_v0 = vpop.f32.mrf.mxu1 }
  0xe2   :  { %999 = vst [vmem:[%s1494_s3 + $0x40] sm:$0xff] %v976_v61  ;;  %v978_v1 = vmax.f32 %v539_v62, 0.0  ;;  %v977_v2 = vmax.f32 %v470_v63, 0.0  ;;  %v541_v4 = vadd.f32 %v540_v0, %v1397_v34 }
  0xe4   :  { %1001 = vst [vmem:[%s1494_s3 + $0x50] sm:$0xff] %v978_v1  ;;  %1000 = vst [vmem:[%s1494_s3 + $0x48] sm:$0xff] %v977_v2  ;;  %v979_v5 = vmax.f32 %v541_v4, 0.0 }
  0xe6   :  { %1002 = vst [vmem:[%s1494_s3 + $0x58] sm:$0xff] %v979_v5 }
  0xe7   :  { %v609_v6 = vpop.f32.mrf.mxu0 }
  0xe8   :  { %v610_v7 = vadd.f32 %v609_v6, %v1397_v34 }
  0xe9   :  { %v680_v8 = vpop.f32.mrf.mxu1  ;;  %v611_v9 = vpop.f32.mrf.mxu0 }
  0xea   :  { %v980_v10 = vmax.f32 %v610_v7, 0.0  ;;  %v681_v11 = vadd.f32 %v680_v8, %v1397_v34  ;;  %v612_v12 = vadd.f32 %v611_v9, %v1397_v34 }
  0xeb   :  { %v682_v13 = vpop.f32.mrf.mxu1 }
  0xec   :  { %1003 = vst [vmem:[%s1494_s3 + $0x60] sm:$0xff] %v980_v10  ;;  %v982_v14 = vmax.f32 %v681_v11, 0.0  ;;  %v981_v15 = vmax.f32 %v612_v12, 0.0  ;;  %v683_v16 = vadd.f32 %v682_v13, %v1397_v34 }
  0xee   :  { %1005 = vst [vmem:[%s1494_s3 + $0x70] sm:$0xff] %v982_v14  ;;  %1004 = vst [vmem:[%s1494_s3 + $0x68] sm:$0xff] %v981_v15  ;;  %v983_v18 = vmax.f32 %v683_v16, 0.0 }
  0xf0   :  { %1006 = vst [vmem:[%s1494_s3 + $0x78] sm:$0xff] %v983_v18 }
  0xf1   :  { %v751_v19 = vpop.f32.mrf.mxu0 }
  0xf2   :  { %v752_v20 = vadd.f32 %v751_v19, %v1397_v34 }
  0xf3   :  { %v822_v21 = vpop.f32.mrf.mxu1  ;;  %v753_v22 = vpop.f32.mrf.mxu0 }
  0xf4   :  { %v984_v23 = vmax.f32 %v752_v20, 0.0  ;;  %v823_v24 = vadd.f32 %v822_v21, %v1397_v34  ;;  %v754_v25 = vadd.f32 %v753_v22, %v1397_v34 }
  0xf5   :  { %v824_v26 = vpop.f32.mrf.mxu1 }
  0xf6   :  { %1007 = vst [vmem:[%s1494_s3 + $0x80] sm:$0xff] %v984_v23  ;;  %v986_v27 = vmax.f32 %v823_v24, 0.0  ;;  %v985_v28 = vmax.f32 %v754_v25, 0.0  ;;  %v825_v29 = vadd.f32 %v824_v26, %v1397_v34 }
  0xf8   :  { %1009 = vst [vmem:[%s1494_s3 + $0x90] sm:$0xff] %v986_v27  ;;  %1008 = vst [vmem:[%s1494_s3 + $0x88] sm:$0xff] %v985_v28  ;;  %v987_v30 = vmax.f32 %v825_v29, 0.0 }
  0xfa   :  { %1010 = vst [vmem:[%s1494_s3 + $0x98] sm:$0xff] %v987_v30 }
  0xfc   :  { %v893_v31 = vpop.f32.mrf.mxu0  ;;  %v964_v32 = vpop.f32.mrf.mxu1 }
  0xfd   :  { %v894_v33 = vadd.f32 %v893_v31, %v1397_v34  ;;  %v965_v35 = vadd.f32 %v964_v32, %v1397_v34 }
  0xfe   :  { %v895_v36 = vpop.f32.mrf.mxu0  ;;  %v1045_v37 = vpop.f32.mrf.mxu1 }
  0xff   :  { %v988_v3 = vmax.f32 %v894_v33, 0.0  ;;  %v990_v38 = vmax.f32 %v965_v35, 0.0  ;;  %v896_v39 = vadd.f32 %v895_v36, %v1397_v34 }
 0x101   :  { %1011 = vst [vmem:[%s1494_s3 + $0xa0] sm:$0xff] %v988_v3  ;;  %1013 = vst [vmem:[%s1494_s3 + $0xb0] sm:$0xff] %v990_v38  ;;  %v989_v40 = vmax.f32 %v896_v39, 0.0 }
 0x103   :  { %1012 = vst [vmem:[%s1494_s3 + $0xa8] sm:$0xff] %v989_v40 }

// kernel: koopman_actor_forward.4
= control target key start
LH: loop header
LB: loop body
LE: loop exit
PB: predicated region body
PF: predicated region fallthrough
CT: control target
= control target key end

     0   :  { %v1062_v3 = vmov 0.0   ;;  %vm201_vm0 = vcmask 588800   ;;  %s1714_s0 = inlined_call_operand.vmem [shape: f32[72,2560], index: 0, kind: input, shape index: {}]   ;;  %s1715_s1 = inlined_call_operand.vmem [shape: f32[8,72], index: 1, kind: input, shape index: {}]   ;;  %s1716_s2 = inlined_call_operand.vmem [shape: f32[8,1], index: 2, kind: input, shape index: {}]   ;;  %s1717_s3 = inlined_call_operand.vmem [shape: bf16[8,2560], index: 3, kind: output, shape index: {}]  }
   0x1   :  { %v176_v0 = vld [vmem:[%s1714_s0 + $0x508] sm:$0xff]  ;;  %v178_v1 = vld [vmem:[%s1714_s0 + $0x518] sm:$0xff]  ;;  %v175_v2 = vld [vmem:[%s1714_s0 + $0x500] sm:$0xff]  ;;  %269 = vmatprep.mubr.f32.mxu0 %v1062_v3  ;;  %340 = vmatprep.mubr.f32.mxu1 %v1062_v3 }
   0x2   :  { %219 = vmatprep.subr.mxu0 %v176_v0  ;;  %290 = vmatprep.subr.mxu1 %v178_v1  ;;  %v177_v4 = vld [vmem:[%s1714_s0 + $0x510] sm:$0xff]  ;;  %v156_v5 = vld [vmem:[%s1714_s0 + $0x468] sm:$0xff]  ;;  %v158_v6 = vld [vmem:[%s1714_s0 + $0x478] sm:$0xff] }
   0x3   :  { %220 = vmatpush1.msra.mxu0 %v175_v2  ;;  %291 = vmatpush1.msra.mxu1 %v177_v4  ;;  %v155_v7 = vld [vmem:[%s1714_s0 + $0x460] sm:$0xff]  ;;  %v157_v8 = vld [vmem:[%s1714_s0 + $0x470] sm:$0xff]  ;;  %v136_v9 = vld [vmem:[%s1714_s0 + $0x3c8] sm:$0xff] }
   0x4   :  { %221 = vmatprep.subr.mxu0 %v156_v5  ;;  %292 = vmatprep.subr.mxu1 %v158_v6  ;;  %v138_v10 = vld [vmem:[%s1714_s0 + $0x3d8] sm:$0xff]  ;;  %v135_v11 = vld [vmem:[%s1714_s0 + $0x3c0] sm:$0xff]  ;;  %v137_v12 = vld [vmem:[%s1714_s0 + $0x3d0] sm:$0xff] }
   0x5   :  { %222 = vmatpush1.msra.mxu0 %v155_v7  ;;  %293 = vmatpush1.msra.mxu1 %v157_v8  ;;  %v116_v13 = vld [vmem:[%s1714_s0 + $0x328] sm:$0xff]  ;;  %v118_v14 = vld [vmem:[%s1714_s0 + $0x338] sm:$0xff]  ;;  %v115_v15 = vld [vmem:[%s1714_s0 + $0x320] sm:$0xff] }
   0x6   :  { %223 = vmatprep.subr.mxu0 %v136_v9  ;;  %294 = vmatprep.subr.mxu1 %v138_v10  ;;  %v117_v16 = vld [vmem:[%s1714_s0 + $0x330] sm:$0xff]  ;;  %v96_v17 = vld [vmem:[%s1714_s0 + $0x288] sm:$0xff]  ;;  %v98_v18 = vld [vmem:[%s1714_s0 + $0x298] sm:$0xff] }
   0x7   :  { %224 = vmatpush1.msra.mxu0 %v135_v11  ;;  %295 = vmatpush1.msra.mxu1 %v137_v12  ;;  %v95_v19 = vld [vmem:[%s1714_s0 + $0x280] sm:$0xff]  ;;  %v97_v20 = vld [vmem:[%s1714_s0 + $0x290] sm:$0xff]  ;;  %v76_v21 = vld [vmem:[%s1714_s0 + $0x1e8] sm:$0xff] }
   0x8   :  { %225 = vmatprep.subr.mxu0 %v116_v13  ;;  %296 = vmatprep.subr.mxu1 %v118_v14  ;;  %v78_v22 = vld [vmem:[%s1714_s0 + $0x1f8] sm:$0xff]  ;;  %v75_v23 = vld [vmem:[%s1714_s0 + $0x1e0] sm:$0xff]  ;;  %v77_v24 = vld [vmem:[%s1714_s0 + $0x1f0] sm:$0xff] }
   0x9   :  { %226 = vmatpush1.msra.mxu0 %v115_v15  ;;  %297 = vmatpush1.msra.mxu1 %v117_v16  ;;  %v56_v25 = vld [vmem:[%s1714_s0 + $0x148] sm:$0xff]  ;;  %v58_v26 = vld [vmem:[%s1714_s0 + $0x158] sm:$0xff]  ;;  %v55_v27 = vld [vmem:[%s1714_s0 + $0x140] sm:$0xff] }
   0xa   :  { %227 = vmatprep.subr.mxu0 %v96_v17  ;;  %298 = vmatprep.subr.mxu1 %v98_v18  ;;  %v57_v28 = vld [vmem:[%s1714_s0 + $0x150] sm:$0xff]  ;;  %v36_v29 = vld [vmem:[%s1714_s0 + $0xa8] sm:$0xff]  ;;  %v38_v30 = vld [vmem:[%s1714_s0 + $0xb8] sm:$0xff] }
   0xb   :  { %228 = vmatpush1.msra.mxu0 %v95_v19  ;;  %299 = vmatpush1.msra.mxu1 %v97_v20  ;;  %v35_v31 = vld [vmem:[%s1714_s0 + $0xa0] sm:$0xff]  ;;  %v37_v32 = vld [vmem:[%s1714_s0 + $0xb0] sm:$0xff]  ;;  %v16_v33 = vld [vmem:[%s1714_s0 + $0x8] sm:$0xff] }
   0xc   :  { %229 = vmatprep.subr.mxu0 %v76_v21  ;;  %300 = vmatprep.subr.mxu1 %v78_v22  ;;  %v18_v34 = vld [vmem:[%s1714_s0 + $0x18] sm:$0xff]  ;;  %v15_v35 = vld [vmem:[%s1714_s0] sm:$0xff]  ;;  %v17_v36 = vld [vmem:[%s1714_s0 + $0x10] sm:$0xff] }
   0xd   :  { %230 = vmatpush1.msra.mxu0 %v75_v23  ;;  %301 = vmatpush1.msra.mxu1 %v77_v24  ;;  %v1197_v37 = vld [vmem:[%s1715_s1] sm:$0xff]  ;;  %v180_v38 = vld [vmem:[%s1714_s0 + $0x528] sm:$0xff]  ;;  %v182_v39 = vld [vmem:[%s1714_s0 + $0x538] sm:$0xff] }
   0xe   :  { %231 = vmatprep.subr.mxu0 %v56_v25  ;;  %302 = vmatprep.subr.mxu1 %v58_v26  ;;  %v179_v40 = vld [vmem:[%s1714_s0 + $0x520] sm:$0xff]  ;;  %v181_v41 = vld [vmem:[%s1714_s0 + $0x530] sm:$0xff]  ;;  %v160_v42 = vld [vmem:[%s1714_s0 + $0x488] sm:$0xff] }
   0xf   :  { %232 = vmatpush1.msra.mxu0 %v55_v27  ;;  %303 = vmatpush1.msra.mxu1 %v57_v28  ;;  %v162_v43 = vld [vmem:[%s1714_s0 + $0x498] sm:$0xff]  ;;  %v159_v44 = vld [vmem:[%s1714_s0 + $0x480] sm:$0xff]  ;;  %v161_v45 = vld [vmem:[%s1714_s0 + $0x490] sm:$0xff] }
  0x10   :  { %233 = vmatprep.subr.mxu0 %v36_v29  ;;  %304 = vmatprep.subr.mxu1 %v38_v30  ;;  %v140_v46 = vld [vmem:[%s1714_s0 + $0x3e8] sm:$0xff]  ;;  %v142_v47 = vld [vmem:[%s1714_s0 + $0x3f8] sm:$0xff]  ;;  %v139_v48 = vld [vmem:[%s1714_s0 + $0x3e0] sm:$0xff] }
  0x11   :  { %234 = vmatpush1.msra.mxu0 %v35_v31  ;;  %305 = vmatpush1.msra.mxu1 %v37_v32  ;;  %v141_v49 = vld [vmem:[%s1714_s0 + $0x3f0] sm:$0xff]  ;;  %v120_v50 = vld [vmem:[%s1714_s0 + $0x348] sm:$0xff]  ;;  %v122_v51 = vld [vmem:[%s1714_s0 + $0x358] sm:$0xff] }
  0x12   :  { %235 = vmatprep.subr.mxu0 %v16_v33  ;;  %306 = vmatprep.subr.mxu1 %v18_v34  ;;  %v119_v52 = vld [vmem:[%s1714_s0 + $0x340] sm:$0xff]  ;;  %v121_v53 = vld [vmem:[%s1714_s0 + $0x350] sm:$0xff]  ;;  %v100_v54 = vld [vmem:[%s1714_s0 + $0x2a8] sm:$0xff] }
  0x13   :  { %236 = vmatpush1.msra.mxu0 %v15_v35  ;;  %307 = vmatpush1.msra.mxu1 %v17_v36  ;;  %v102_v55 = vld [vmem:[%s1714_s0 + $0x2b8] sm:$0xff]  ;;  %v99_v56 = vld [vmem:[%s1714_s0 + $0x2a0] sm:$0xff]  ;;  %v101_v57 = vld [vmem:[%s1714_s0 + $0x2b0] sm:$0xff] }
  0x14   :  { %1029 = vmatmul.mubr.msk.f32.vlgmr.msra.gmra.mxu0 %vm201_vm0, %v1197_v37  ;;  %1030 = vmatmul.mubr.msk.f32.vlgmr.msra.gmra.mxu1 %vm201_vm0, %v1197_v37  ;;  %v80_v58 = vld [vmem:[%s1714_s0 + $0x208] sm:$0xff]  ;;  %v82_v59 = vld [vmem:[%s1714_s0 + $0x218] sm:$0xff]  ;;  %v79_v60 = vld [vmem:[%s1714_s0 + $0x200] sm:$0xff] }
  0x15   :  { %361 = vmatprep.subr.mxu0 %v180_v38  ;;  %432 = vmatprep.subr.mxu1 %v182_v39  ;;  %v81_v61 = vld [vmem:[%s1714_s0 + $0x210] sm:$0xff]  ;;  %v60_v62 = vld [vmem:[%s1714_s0 + $0x168] sm:$0xff]  ;;  %v62_v63 = vld [vmem:[%s1714_s0 + $0x178] sm:$0xff] }
  0x16   :  { %362 = vmatpush1.msra.mxu0 %v179_v40  ;;  %433 = vmatpush1.msra.mxu1 %v181_v41  ;;  %v59_v0 = vld [vmem:[%s1714_s0 + $0x160] sm:$0xff]  ;;  %v61_v1 = vld [vmem:[%s1714_s0 + $0x170] sm:$0xff]  ;;  %v40_v2 = vld [vmem:[%s1714_s0 + $0xc8] sm:$0xff] }
  0x17   :  { %363 = vmatprep.subr.mxu0 %v160_v42  ;;  %434 = vmatprep.subr.mxu1 %v162_v43  ;;  %v42_v4 = vld [vmem:[%s1714_s0 + $0xd8] sm:$0xff]  ;;  %v39_v5 = vld [vmem:[%s1714_s0 + $0xc0] sm:$0xff]  ;;  %v41_v6 = vld [vmem:[%s1714_s0 + $0xd0] sm:$0xff] }
  0x18   :  { %364 = vmatpush1.msra.mxu0 %v159_v44  ;;  %435 = vmatpush1.msra.mxu1 %v161_v45  ;;  %v20_v7 = vld [vmem:[%s1714_s0 + $0x28] sm:$0xff]  ;;  %v22_v8 = vld [vmem:[%s1714_s0 + $0x38] sm:$0xff]  ;;  %v19_v9 = vld [vmem:[%s1714_s0 + $0x20] sm:$0xff] }
  0x19   :  { %365 = vmatprep.subr.mxu0 %v140_v46  ;;  %436 = vmatprep.subr.mxu1 %v142_v47  ;;  %v21_v10 = vld [vmem:[%s1714_s0 + $0x30] sm:$0xff]  ;;  %v184_v11 = vld [vmem:[%s1714_s0 + $0x548] sm:$0xff]  ;;  %v186_v12 = vld [vmem:[%s1714_s0 + $0x558] sm:$0xff] }
  0x1a   :  { %366 = vmatpush1.msra.mxu0 %v139_v48  ;;  %437 = vmatpush1.msra.mxu1 %v141_v49  ;;  %v183_v13 = vld [vmem:[%s1714_s0 + $0x540] sm:$0xff]  ;;  %v185_v14 = vld [vmem:[%s1714_s0 + $0x550] sm:$0xff]  ;;  %v164_v15 = vld [vmem:[%s1714_s0 + $0x4a8] sm:$0xff] }
  0x1b   :  { %367 = vmatprep.subr.mxu0 %v120_v50  ;;  %438 = vmatprep.subr.mxu1 %v122_v51  ;;  %v166_v16 = vld [vmem:[%s1714_s0 + $0x4b8] sm:$0xff]  ;;  %v163_v17 = vld [vmem:[%s1714_s0 + $0x4a0] sm:$0xff]  ;;  %v165_v18 = vld [vmem:[%s1714_s0 + $0x4b0] sm:$0xff] }
  0x1c   :  { %368 = vmatpush1.msra.mxu0 %v119_v52  ;;  %439 = vmatpush1.msra.mxu1 %v121_v53  ;;  %v144_v19 = vld [vmem:[%s1714_s0 + $0x408] sm:$0xff]  ;;  %v146_v20 = vld [vmem:[%s1714_s0 + $0x418] sm:$0xff]  ;;  %v143_v21 = vld [vmem:[%s1714_s0 + $0x400] sm:$0xff] }
  0x1d   :  { %369 = vmatprep.subr.mxu0 %v100_v54  ;;  %440 = vmatprep.subr.mxu1 %v102_v55  ;;  %v145_v22 = vld [vmem:[%s1714_s0 + $0x410] sm:$0xff]  ;;  %v124_v23 = vld [vmem:[%s1714_s0 + $0x368] sm:$0xff]  ;;  %v126_v24 = vld [vmem:[%s1714_s0 + $0x378] sm:$0xff] }
  0x1e   :  { %370 = vmatpush1.msra.mxu0 %v99_v56  ;;  %441 = vmatpush1.msra.mxu1 %v101_v57  ;;  %v123_v25 = vld [vmem:[%s1714_s0 + $0x360] sm:$0xff]  ;;  %v125_v26 = vld [vmem:[%s1714_s0 + $0x370] sm:$0xff]  ;;  %v104_v27 = vld [vmem:[%s1714_s0 + $0x2c8] sm:$0xff] }
  0x1f   :  { %371 = vmatprep.subr.mxu0 %v80_v58  ;;  %442 = vmatprep.subr.mxu1 %v82_v59  ;;  %v106_v28 = vld [vmem:[%s1714_s0 + $0x2d8] sm:$0xff]  ;;  %v103_v29 = vld [vmem:[%s1714_s0 + $0x2c0] sm:$0xff]  ;;  %v105_v30 = vld [vmem:[%s1714_s0 + $0x2d0] sm:$0xff] }
  0x20   :  { %372 = vmatpush1.msra.mxu0 %v79_v60  ;;  %443 = vmatpush1.msra.mxu1 %v81_v61  ;;  %v84_v31 = vld [vmem:[%s1714_s0 + $0x228] sm:$0xff]  ;;  %v86_v32 = vld [vmem:[%s1714_s0 + $0x238] sm:$0xff]  ;;  %v83_v33 = vld [vmem:[%s1714_s0 + $0x220] sm:$0xff] }
  0x21   :  { %373 = vmatprep.subr.mxu0 %v60_v62  ;;  %444 = vmatprep.subr.mxu1 %v62_v63  ;;  %v85_v34 = vld [vmem:[%s1714_s0 + $0x230] sm:$0xff]  ;;  %v64_v35 = vld [vmem:[%s1714_s0 + $0x188] sm:$0xff]  ;;  %v66_v36 = vld [vmem:[%s1714_s0 + $0x198] sm:$0xff] }
  0x22   :  { %374 = vmatpush1.msra.mxu0 %v59_v0  ;;  %445 = vmatpush1.msra.mxu1 %v61_v1  ;;  %v63_v38 = vld [vmem:[%s1714_s0 + $0x180] sm:$0xff]  ;;  %v65_v39 = vld [vmem:[%s1714_s0 + $0x190] sm:$0xff]  ;;  %v44_v40 = vld [vmem:[%s1714_s0 + $0xe8] sm:$0xff] }
  0x23   :  { %375 = vmatprep.subr.mxu0 %v40_v2  ;;  %446 = vmatprep.subr.mxu1 %v42_v4  ;;  %v46_v41 = vld [vmem:[%s1714_s0 + $0xf8] sm:$0xff]  ;;  %v43_v42 = vld [vmem:[%s1714_s0 + $0xe0] sm:$0xff]  ;;  %v45_v43 = vld [vmem:[%s1714_s0 + $0xf0] sm:$0xff] }
  0x24   :  { %376 = vmatpush1.msra.mxu0 %v39_v5  ;;  %447 = vmatpush1.msra.mxu1 %v41_v6  ;;  %v24_v44 = vld [vmem:[%s1714_s0 + $0x48] sm:$0xff]  ;;  %v26_v45 = vld [vmem:[%s1714_s0 + $0x58] sm:$0xff]  ;;  %v23_v46 = vld [vmem:[%s1714_s0 + $0x40] sm:$0xff] }
  0x25   :  { %377 = vmatprep.subr.mxu0 %v20_v7  ;;  %448 = vmatprep.subr.mxu1 %v22_v8  ;;  %v25_v47 = vld [vmem:[%s1714_s0 + $0x50] sm:$0xff]  ;;  %v188_v48 = vld [vmem:[%s1714_s0 + $0x568] sm:$0xff]  ;;  %v190_v49 = vld [vmem:[%s1714_s0 + $0x578] sm:$0xff] }
  0x26   :  { %378 = vmatpush1.msra.mxu0 %v19_v9  ;;  %411 = vmatprep.mubr.f32.mxu0 %v1062_v3  ;;  %v187_v50 = vld [vmem:[%s1714_s0 + $0x560] sm:$0xff]  ;;  %v189_v51 = vld [vmem:[%s1714_s0 + $0x570] sm:$0xff]  ;;  %v168_v52 = vld [vmem:[%s1714_s0 + $0x4c8] sm:$0xff] }
  0x27   :  { %449 = vmatpush1.msra.mxu1 %v21_v10  ;;  %482 = vmatprep.mubr.f32.mxu1 %v1062_v3  ;;  %v170_v53 = vld [vmem:[%s1714_s0 + $0x4d8] sm:$0xff]  ;;  %v167_v54 = vld [vmem:[%s1714_s0 + $0x4c0] sm:$0xff]  ;;  %v169_v55 = vld [vmem:[%s1714_s0 + $0x4d0] sm:$0xff] }
  0x28   :  { %1031 = vmatmul.mubr.msk.f32.vlgmr.msra.gmra.mxu0 %vm201_vm0, %v1197_v37  ;;  %1032 = vmatmul.mubr.msk.f32.vlgmr.msra.gmra.mxu1 %vm201_vm0, %v1197_v37  ;;  %v148_v56 = vld [vmem:[%s1714_s0 + $0x428] sm:$0xff]  ;;  %v150_v57 = vld [vmem:[%s1714_s0 + $0x438] sm:$0xff]  ;;  %v147_v58 = vld [vmem:[%s1714_s0 + $0x420] sm:$0xff] }
  0x29   :  { %503 = vmatprep.subr.mxu0 %v184_v11  ;;  %574 = vmatprep.subr.mxu1 %v186_v12  ;;  %v149_v59 = vld [vmem:[%s1714_s0 + $0x430] sm:$0xff]  ;;  %v128_v60 = vld [vmem:[%s1714_s0 + $0x388] sm:$0xff]  ;;  %v130_v61 = vld [vmem:[%s1714_s0 + $0x398] sm:$0xff] }
  0x2a   :  { %504 = vmatpush1.msra.mxu0 %v183_v13  ;;  %575 = vmatpush1.msra.mxu1 %v185_v14  ;;  %v127_v62 = vld [vmem:[%s1714_s0 + $0x380] sm:$0xff]  ;;  %v129_v63 = vld [vmem:[%s1714_s0 + $0x390] sm:$0xff]  ;;  %v108_v0 = vld [vmem:[%s1714_s0 + $0x2e8] sm:$0xff] }
  0x2b   :  { %505 = vmatprep.subr.mxu0 %v164_v15  ;;  %576 = vmatprep.subr.mxu1 %v166_v16  ;;  %v110_v1 = vld [vmem:[%s1714_s0 + $0x2f8] sm:$0xff]  ;;  %v107_v2 = vld [vmem:[%s1714_s0 + $0x2e0] sm:$0xff]  ;;  %v109_v4 = vld [vmem:[%s1714_s0 + $0x2f0] sm:$0xff] }
  0x2c   :  { %506 = vmatpush1.msra.mxu0 %v163_v17  ;;  %577 = vmatpush1.msra.mxu1 %v165_v18  ;;  %v88_v5 = vld [vmem:[%s1714_s0 + $0x248] sm:$0xff]  ;;  %v90_v6 = vld [vmem:[%s1714_s0 + $0x258] sm:$0xff]  ;;  %v87_v7 = vld [vmem:[%s1714_s0 + $0x240] sm:$0xff] }
  0x2d   :  { %507 = vmatprep.subr.mxu0 %v144_v19  ;;  %578 = vmatprep.subr.mxu1 %v146_v20  ;;  %v89_v8 = vld [vmem:[%s1714_s0 + $0x250] sm:$0xff]  ;;  %v68_v9 = vld [vmem:[%s1714_s0 + $0x1a8] sm:$0xff]  ;;  %v70_v10 = vld [vmem:[%s1714_s0 + $0x1b8] sm:$0xff] }
  0x2e   :  { %508 = vmatpush1.msra.mxu0 %v143_v21  ;;  %579 = vmatpush1.msra.mxu1 %v145_v22  ;;  %v67_v11 = vld [vmem:[%s1714_s0 + $0x1a0] sm:$0xff]  ;;  %v69_v12 = vld [vmem:[%s1714_s0 + $0x1b0] sm:$0xff]  ;;  %v48_v13 = vld [vmem:[%s1714_s0 + $0x108] sm:$0xff] }
  0x2f   :  { %509 = vmatprep.subr.mxu0 %v124_v23  ;;  %580 = vmatprep.subr.mxu1 %v126_v24  ;;  %v50_v14 = vld [vmem:[%s1714_s0 + $0x118] sm:$0xff]  ;;  %v47_v15 = vld [vmem:[%s1714_s0 + $0x100] sm:$0xff]  ;;  %v49_v16 = vld [vmem:[%s1714_s0 + $0x110] sm:$0xff] }
  0x30   :  { %510 = vmatpush1.msra.mxu0 %v123_v25  ;;  %581 = vmatpush1.msra.mxu1 %v125_v26  ;;  %v28_v17 = vld [vmem:[%s1714_s0 + $0x68] sm:$0xff]  ;;  %v30_v18 = vld [vmem:[%s1714_s0 + $0x78] sm:$0xff]  ;;  %v27_v19 = vld [vmem:[%s1714_s0 + $0x60] sm:$0xff] }
  0x31   :  { %511 = vmatprep.subr.mxu0 %v104_v27  ;;  %582 = vmatprep.subr.mxu1 %v106_v28  ;;  %v29_v20 = vld [vmem:[%s1714_s0 + $0x70] sm:$0xff]  ;;  %v192_v21 = vld [vmem:[%s1714_s0 + $0x588] sm:$0xff]  ;;  %v194_v22 = vld [vmem:[%s1714_s0 + $0x598] sm:$0xff] }
  0x32   :  { %512 = vmatpush1.msra.mxu0 %v103_v29  ;;  %583 = vmatpush1.msra.mxu1 %v105_v30  ;;  %v191_v23 = vld [vmem:[%s1714_s0 + $0x580] sm:$0xff]  ;;  %v193_v24 = vld [vmem:[%s1714_s0 + $0x590] sm:$0xff]  ;;  %v172_v25 = vld [vmem:[%s1714_s0 + $0x4e8] sm:$0xff] }
  0x33   :  { %513 = vmatprep.subr.mxu0 %v84_v31  ;;  %584 = vmatprep.subr.mxu1 %v86_v32  ;;  %v174_v26 = vld [vmem:[%s1714_s0 + $0x4f8] sm:$0xff]  ;;  %v171_v27 = vld [vmem:[%s1714_s0 + $0x4e0] sm:$0xff]  ;;  %v173_v28 = vld [vmem:[%s1714_s0 + $0x4f0] sm:$0xff] }
  0x34   :  { %514 = vmatpush1.msra.mxu0 %v83_v33  ;;  %585 = vmatpush1.msra.mxu1 %v85_v34  ;;  %v152_v29 = vld [vmem:[%s1714_s0 + $0x448] sm:$0xff]  ;;  %v154_v30 = vld [vmem:[%s1714_s0 + $0x458] sm:$0xff]  ;;  %v151_v31 = vld [vmem:[%s1714_s0 + $0x440] sm:$0xff] }
  0x35   :  { %515 = vmatprep.subr.mxu0 %v64_v35  ;;  %586 = vmatprep.subr.mxu1 %v66_v36  ;;  %v153_v32 = vld [vmem:[%s1714_s0 + $0x450] sm:$0xff]  ;;  %v132_v33 = vld [vmem:[%s1714_s0 + $0x3a8] sm:$0xff]  ;;  %v134_v34 = vld [vmem:[%s1714_s0 + $0x3b8] sm:$0xff] }
  0x36   :  { %516 = vmatpush1.msra.mxu0 %v63_v38  ;;  %587 = vmatpush1.msra.mxu1 %v65_v39  ;;  %v131_v35 = vld [vmem:[%s1714_s0 + $0x3a0] sm:$0xff]  ;;  %v133_v36 = vld [vmem:[%s1714_s0 + $0x3b0] sm:$0xff]  ;;  %v112_v38 = vld [vmem:[%s1714_s0 + $0x308] sm:$0xff] }
  0x37   :  { %517 = vmatprep.subr.mxu0 %v44_v40  ;;  %588 = vmatprep.subr.mxu1 %v46_v41  ;;  %v114_v39 = vld [vmem:[%s1714_s0 + $0x318] sm:$0xff]  ;;  %v111_v40 = vld [vmem:[%s1714_s0 + $0x300] sm:$0xff]  ;;  %v113_v41 = vld [vmem:[%s1714_s0 + $0x310] sm:$0xff] }
  0x38   :  { %518 = vmatpush1.msra.mxu0 %v43_v42  ;;  %589 = vmatpush1.msra.mxu1 %v45_v43  ;;  %v92_v42 = vld [vmem:[%s1714_s0 + $0x268] sm:$0xff]  ;;  %v94_v43 = vld [vmem:[%s1714_s0 + $0x278] sm:$0xff] }
  0x39   :  { %519 = vmatprep.subr.mxu0 %v24_v44  ;;  %590 = vmatprep.subr.mxu1 %v26_v45  ;;  %v91_v44 = vld [vmem:[%s1714_s0 + $0x260] sm:$0xff]  ;;  %v93_v45 = vld [vmem:[%s1714_s0 + $0x270] sm:$0xff] }
  0x3a   :  { %520 = vmatpush1.msra.mxu0 %v23_v46  ;;  %553 = vmatprep.mubr.f32.mxu0 %v1062_v3  ;;  %v72_v46 = vld [vmem:[%s1714_s0 + $0x1c8] sm:$0xff] }
  0x3b   :  { %591 = vmatpush1.msra.mxu1 %v25_v47  ;;  %624 = vmatprep.mubr.f32.mxu1 %v1062_v3  ;;  %v74_v47 = vld [vmem:[%s1714_s0 + $0x1d8] sm:$0xff] }
  0x3c   :  { %1033 = vmatmul.mubr.msk.f32.vlgmr.msra.gmra.mxu0 %vm201_vm0, %v1197_v37  ;;  %1034 = vmatmul.mubr.msk.f32.vlgmr.msra.gmra.mxu1 %vm201_vm0, %v1197_v37 }
  0x3d   :  { %645 = vmatprep.subr.mxu0 %v188_v48  ;;  %716 = vmatprep.subr.mxu1 %v190_v49  ;;  %v71_v48 = vld [vmem:[%s1714_s0 + $0x1c0] sm:$0xff]  ;;  %v73_v49 = vld [vmem:[%s1714_s0 + $0x1d0] sm:$0xff] }
  0x3e   :  { %646 = vmatpush1.msra.mxu0 %v187_v50  ;;  %717 = vmatpush1.msra.mxu1 %v189_v51  ;;  %v52_v50 = vld [vmem:[%s1714_s0 + $0x128] sm:$0xff]  ;;  %v54_v51 = vld [vmem:[%s1714_s0 + $0x138] sm:$0xff] }
  0x3f   :  { %647 = vmatprep.subr.mxu0 %v168_v52  ;;  %718 = vmatprep.subr.mxu1 %v170_v53  ;;  %v51_v52 = vld [vmem:[%s1714_s0 + $0x120] sm:$0xff]  ;;  %v53_v53 = vld [vmem:[%s1714_s0 + $0x130] sm:$0xff] }
  0x40   :  { %648 = vmatpush1.msra.mxu0 %v167_v54  ;;  %719 = vmatpush1.msra.mxu1 %v169_v55  ;;  %v195_v54 = vld [vmem:[%s1716_s2] sm:$0xff]  ;;  %v32_v55 = vld [vmem:[%s1714_s0 + $0x88] sm:$0xff] }
  0x41   :  { %649 = vmatprep.subr.mxu0 %v148_v56  ;;  %720 = vmatprep.subr.mxu1 %v150_v57  ;;  %v34_v56 = vld [vmem:[%s1714_s0 + $0x98] sm:$0xff]  ;;  %v1063_v57 = vmov 0  }
  0x42   :  { %650 = vmatpush1.msra.mxu0 %v147_v58  ;;  %721 = vmatpush1.msra.mxu1 %v149_v59  ;;  %v31_v58 = vld [vmem:[%s1714_s0 + $0x80] sm:$0xff]  ;;  %v33_v59 = vld [vmem:[%s1714_s0 + $0x90] sm:$0xff] }
  0x43   :  { %651 = vmatprep.subr.mxu0 %v128_v60  ;;  %722 = vmatprep.subr.mxu1 %v130_v61 }
  0x44   :  { %652 = vmatpush1.msra.mxu0 %v127_v62  ;;  %723 = vmatpush1.msra.mxu1 %v129_v63 }
  0x45   :  { %653 = vmatprep.subr.mxu0 %v108_v0  ;;  %724 = vmatprep.subr.mxu1 %v110_v1 }
  0x46   :  { %654 = vmatpush1.msra.mxu0 %v107_v2  ;;  %725 = vmatpush1.msra.mxu1 %v109_v4 }
  0x47   :  { %655 = vmatprep.subr.mxu0 %v88_v5  ;;  %726 = vmatprep.subr.mxu1 %v90_v6 }
  0x48   :  { %656 = vmatpush1.msra.mxu0 %v87_v7  ;;  %727 = vmatpush1.msra.mxu1 %v89_v8 }
  0x49   :  { %657 = vmatprep.subr.mxu0 %v68_v9  ;;  %728 = vmatprep.subr.mxu1 %v70_v10 }
  0x4a   :  { %658 = vmatpush1.msra.mxu0 %v67_v11  ;;  %729 = vmatpush1.msra.mxu1 %v69_v12 }
  0x4b   :  { %659 = vmatprep.subr.mxu0 %v48_v13  ;;  %730 = vmatprep.subr.mxu1 %v50_v14 }
  0x4c   :  { %660 = vmatpush1.msra.mxu0 %v47_v15  ;;  %731 = vmatpush1.msra.mxu1 %v49_v16 }
  0x4d   :  { %661 = vmatprep.subr.mxu0 %v28_v17  ;;  %732 = vmatprep.subr.mxu1 %v30_v18 }
  0x4e   :  { %662 = vmatpush1.msra.mxu0 %v27_v19  ;;  %695 = vmatprep.mubr.f32.mxu0 %v1062_v3 }
  0x4f   :  { %733 = vmatpush1.msra.mxu1 %v29_v20  ;;  %766 = vmatprep.mubr.f32.mxu1 %v1062_v3 }
  0x50   :  { %1035 = vmatmul.mubr.msk.f32.vlgmr.msra.gmra.mxu0 %vm201_vm0, %v1197_v37  ;;  %1036 = vmatmul.mubr.msk.f32.vlgmr.msra.gmra.mxu1 %vm201_vm0, %v1197_v37 }
  0x51   :  { %787 = vmatprep.subr.mxu0 %v192_v21  ;;  %858 = vmatprep.subr.mxu1 %v194_v22 }
  0x52   :  { %788 = vmatpush1.msra.mxu0 %v191_v23  ;;  %859 = vmatpush1.msra.mxu1 %v193_v24 }
  0x53   :  { %789 = vmatprep.subr.mxu0 %v172_v25  ;;  %860 = vmatprep.subr.mxu1 %v174_v26 }
  0x54   :  { %790 = vmatpush1.msra.mxu0 %v171_v27  ;;  %861 = vmatpush1.msra.mxu1 %v173_v28 }
  0x55   :  { %791 = vmatprep.subr.mxu0 %v152_v29  ;;  %862 = vmatprep.subr.mxu1 %v154_v30 }
  0x56   :  { %792 = vmatpush1.msra.mxu0 %v151_v31  ;;  %863 = vmatpush1.msra.mxu1 %v153_v32 }
  0x57   :  { %793 = vmatprep.subr.mxu0 %v132_v33  ;;  %864 = vmatprep.subr.mxu1 %v134_v34 }
  0x58   :  { %794 = vmatpush1.msra.mxu0 %v131_v35  ;;  %865 = vmatpush1.msra.mxu1 %v133_v36 }
  0x59   :  { %795 = vmatprep.subr.mxu0 %v112_v38  ;;  %866 = vmatprep.subr.mxu1 %v114_v39 }
  0x5a   :  { %796 = vmatpush1.msra.mxu0 %v111_v40  ;;  %867 = vmatpush1.msra.mxu1 %v113_v41 }
  0x5b   :  { %797 = vmatprep.subr.mxu0 %v92_v42  ;;  %868 = vmatprep.subr.mxu1 %v94_v43 }
  0x5c   :  { %798 = vmatpush1.msra.mxu0 %v91_v44  ;;  %869 = vmatpush1.msra.mxu1 %v93_v45 }
  0x5d   :  { %799 = vmatprep.subr.mxu0 %v72_v46  ;;  %870 = vmatprep.subr.mxu1 %v74_v47 }
  0x5e   :  { %800 = vmatpush1.msra.mxu0 %v71_v48  ;;  %871 = vmatpush1.msra.mxu1 %v73_v49 }
  0x5f   :  { %801 = vmatprep.subr.mxu0 %v52_v50  ;;  %872 = vmatprep.subr.mxu1 %v54_v51 }
  0x60   :  { %1061 = vset.pattern.permute.xlu0 %v1063_v57  ;;  %802 = vmatpush1.msra.mxu0 %v51_v52 }
  0x61   :  { %873 = vmatpush1.msra.mxu1 %v53_v53  ;;  %198 = vperm.xlu0 %1061, %v195_v54  }
  0x62   :  { %803 = vmatprep.subr.mxu0 %v32_v55  ;;  %874 = vmatprep.subr.mxu1 %v34_v56 }
  0x63   :  { %804 = vmatpush1.msra.mxu0 %v31_v58  ;;  %837 = vmatprep.mubr.f32.mxu0 %v1062_v3 }
  0x64   :  { %875 = vmatpush1.msra.mxu1 %v33_v59  ;;  %908 = vmatprep.mubr.f32.mxu1 %v1062_v3 }
  0x65   :  { %1037 = vmatmul.mubr.msk.f32.vlgmr.msra.gmra.mxu0 %vm201_vm0, %v1197_v37  ;;  %1038 = vmatmul.mubr.msk.f32.vlgmr.msra.gmra.mxu1 %vm201_vm0, %v1197_v37 }
  0xd4   :  { %v271_v60 = vpop.f32.mrf.mxu0  ;;  %v342_v61 = vpop.f32.mrf.mxu1 }
  0xd6   :  { %v273_v62 = vpop.f32.mrf.mxu0  ;;  %v344_v63 = vpop.f32.mrf.mxu1 }
  0xdc   :  { %v1662_v0 = vpop.permute.xlu0 %198 }
  0xdd   :  { %v272_v1 = vadd.f32 %v271_v60, %v1662_v0  ;;  %v274_v2 = vadd.f32 %v273_v62, %v1662_v0  ;;  %v343_v4 = vadd.f32 %v342_v61, %v1662_v0  ;;  %v345_v3 = vadd.f32 %v344_v63, %v1662_v0 }
  0xdf   :  { %v915_v5 = vmax.f32 %v272_v1, 0.0  ;;  %v916_v6 = vmax.f32 %v274_v2, 0.0  ;;  %v917_v7 = vmax.f32 %v343_v4, 0.0  ;;  %v918_v8 = vmax.f32 %v345_v3, 0.0 }
  0xe1   :  { %v1049_v9 = vpack.c.bf16 %v916_v6, %v915_v5  ;;  %v1050_v37 = vpack.c.bf16 %v918_v8, %v917_v7 }
  0xe3   :  { %1015 = vst [vmem:[%s1717_s3] sm:$0xff] %v1049_v9  ;;  %1016 = vst [vmem:[%s1717_s3 + $0x8] sm:$0xff] %v1050_v37 }
  0xe8   :  { %v413_v10 = vpop.f32.mrf.mxu0  ;;  %v484_v11 = vpop.f32.mrf.mxu1 }
  0xe9   :  { %v414_v12 = vadd.f32 %v413_v10, %v1662_v0  ;;  %v485_v13 = vadd.f32 %v484_v11, %v1662_v0 }
  0xea   :  { %v415_v14 = vpop.f32.mrf.mxu0  ;;  %v486_v15 = vpop.f32.mrf.mxu1 }
  0xeb   :  { %v919_v16 = vmax.f32 %v414_v12, 0.0  ;;  %v921_v17 = vmax.f32 %v485_v13, 0.0  ;;  %v416_v18 = vadd.f32 %v415_v14, %v1662_v0  ;;  %v487_v19 = vadd.f32 %v486_v15, %v1662_v0 }
  0xed   :  { %v920_v20 = vmax.f32 %v416_v18, 0.0  ;;  %v922_v21 = vmax.f32 %v487_v19, 0.0 }
  0xef   :  { %v1051_v22 = vpack.c.bf16 %v920_v20, %v919_v16  ;;  %v1052_v23 = vpack.c.bf16 %v922_v21, %v921_v17 }
  0xf1   :  { %1017 = vst [vmem:[%s1717_s3 + $0x10] sm:$0xff] %v1051_v22  ;;  %1018 = vst [vmem:[%s1717_s3 + $0x18] sm:$0xff] %v1052_v23 }
  0xfc   :  { %v555_v24 = vpop.f32.mrf.mxu0  ;;  %v626_v25 = vpop.f32.mrf.mxu1 }
  0xfd   :  { %v556_v26 = vadd.f32 %v555_v24, %v1662_v0  ;;  %v627_v27 = vadd.f32 %v626_v25, %v1662_v0 }
  0xfe   :  { %v557_v28 = vpop.f32.mrf.mxu0  ;;  %v628_v29 = vpop.f32.mrf.mxu1 }
  0xff   :  { %v923_v30 = vmax.f32 %v556_v26, 0.0  ;;  %v925_v31 = vmax.f32 %v627_v27, 0.0  ;;  %v558_v32 = vadd.f32 %v557_v28, %v1662_v0  ;;  %v629_v33 = vadd.f32 %v628_v29, %v1662_v0 }
 0x101   :  { %v924_v34 = vmax.f32 %v558_v32, 0.0  ;;  %v926_v35 = vmax.f32 %v629_v33, 0.0 }
 0x103   :  { %v1053_v36 = vpack.c.bf16 %v924_v34, %v923_v30  ;;  %v1054_v38 = vpack.c.bf16 %v926_v35, %v925_v31 }
 0x105   :  { %1019 = vst [vmem:[%s1717_s3 + $0x20] sm:$0xff] %v1053_v36  ;;  %1020 = vst [vmem:[%s1717_s3 + $0x28] sm:$0xff] %v1054_v38 }
 0x110   :  { %v697_v39 = vpop.f32.mrf.mxu0  ;;  %v768_v40 = vpop.f32.mrf.mxu1 }
 0x111   :  { %v698_v41 = vadd.f32 %v697_v39, %v1662_v0  ;;  %v769_v42 = vadd.f32 %v768_v40, %v1662_v0 }
 0x112   :  { %v699_v43 = vpop.f32.mrf.mxu0  ;;  %v770_v44 = vpop.f32.mrf.mxu1 }
 0x113   :  { %v927_v45 = vmax.f32 %v698_v41, 0.0  ;;  %v929_v46 = vmax.f32 %v769_v42, 0.0  ;;  %v700_v47 = vadd.f32 %v699_v43, %v1662_v0  ;;  %v771_v48 = vadd.f32 %v770_v44, %v1662_v0 }
 0x115   :  { %v928_v49 = vmax.f32 %v700_v47, 0.0  ;;  %v930_v50 = vmax.f32 %v771_v48, 0.0 }
 0x117   :  { %v1055_v51 = vpack.c.bf16 %v928_v49, %v927_v45  ;;  %v1056_v52 = vpack.c.bf16 %v930_v50, %v929_v46 }
 0x119   :  { %1021 = vst [vmem:[%s1717_s3 + $0x30] sm:$0xff] %v1055_v51  ;;  %1022 = vst [vmem:[%s1717_s3 + $0x38] sm:$0xff] %v1056_v52 }
 0x125   :  { %v839_v53 = vpop.f32.mrf.mxu0  ;;  %v910_v54 = vpop.f32.mrf.mxu1 }
 0x126   :  { %v840_v55 = vadd.f32 %v839_v53, %v1662_v0  ;;  %v911_v56 = vadd.f32 %v910_v54, %v1662_v0 }
 0x127   :  { %v841_v57 = vpop.f32.mrf.mxu0  ;;  %v912_v58 = vpop.f32.mrf.mxu1 }
 0x128   :  { %v842_v59 = vadd.f32 %v841_v57, %v1662_v0  ;;  %v913_v60 = vadd.f32 %v912_v58, %v1662_v0  ;;  %v931_v61 = vmax.f32 %v840_v55, 0.0  ;;  %v933_v62 = vmax.f32 %v911_v56, 0.0 }
 0x12a   :  { %v932_v63 = vmax.f32 %v842_v59, 0.0  ;;  %v934_v1 = vmax.f32 %v913_v60, 0.0 }
 0x12c   :  { %v1057_v2 = vpack.c.bf16 %v932_v63, %v931_v61  ;;  %v1058_v4 = vpack.c.bf16 %v934_v1, %v933_v62 }
 0x12e   :  { %1023 = vst [vmem:[%s1717_s3 + $0x40] sm:$0xff] %v1057_v2  ;;  %1024 = vst [vmem:[%s1717_s3 + $0x48] sm:$0xff] %v1058_v4 }

// kernel: custom-call.15
= control target key start
LH: loop header
LB: loop body
LE: loop exit
PB: predicated region body
PF: predicated region fallthrough
CT: control target
= control target key end

     0   :  { %5 = vsyncpa [#allocation6], 0  ;;  %v77_v1 = vlaneseq  ;;  %v534_v2 = vmov 0   ;;  %s563_s14 = smov 0   ;;  %s604_s0 = inlined_call_operand.vmem [shape: f32[4,4], index: 0, kind: input, shape index: {}]   ;;  %s605_s1 = inlined_call_operand.vmem [shape: f32[4,4], index: 1, kind: output, shape index: {0}]   ;;  %s606_s2 = inlined_call_operand.hbm [shape: s32[4], index: 2, kind: output, shape index: {1}]   ;;  %s607_s3 = inlined_call_operand.vmem [shape: s32[4], index: 3, kind: output, shape index: {2}]  }
   0x1   :  { %v67_v0 = vld [vmem:[%s604_s0] sm:$0xf]  ;;  %76 = vst [vmem:[#allocation4] sm:$0x1] %v534_v2 }
   0x2   :  { %68 = vst [vmem:[#allocation1] sm:$0xf] %v67_v0  ;;  %v560_v3 = vshrl.u32 %v77_v1, 7 }
   0x4   :  { %81 = vst [vmem:[#allocation9] sm:$0xff] %v560_v3 }
   0x9   :  { %v72_v4 = vld [vmem:[#allocation1] sm:$0xf] }
   0xa   :  { %73 = vst [vmem:[#allocation0] sm:$0xf] %v72_v4 }
  0x11   :  { %v74_v5 = vld [vmem:[#allocation0] sm:$0xff] }
  0x12   :  { %75 = vst [vmem:[#allocation2] sm:$0xff] %v74_v5 }
  0x13 LB: > { %vm97_vm0 = vcmp.lt.s32.totalorder %v560_v3, 4  ;;  %v570_v8 = vstv %s532_s14  ;;  %s138_s0 = ssub.s32 128, %s532_s14  ;;  %v144_v38 = vand.u32 127, %v77_v1  ;;  %v147_v40 = vld [vmem:[#allocation4] ss:$0 sm:$0xff]  ;;  %s150_s15 = scalar_lea.vmem [#allocation2], %s532_s14  ;;  %s532_s14 = sphi %s563_s14, %s87_s14  }
  0x14   : > { %vm96_vm1 = vcmp.ge.s32.totalorder %v560_v3, %v570_v8  ;;  %s156_s17 = scalar_lea.vmem [#allocation9], %s532_s14  ;;  %vm176_vm15 = vcmp.gt.s32.totalorder %v560_v3, %v570_v8  ;;  %s87_s14 = sadd.s32 1, %s532_s14  }
  0x15   : > { %vm98_vm3 = vmand %vm96_vm1, %vm97_vm0  ;;  %vm168_vm12 = vcmp.gt.s32.totalorder %v144_v38, %v570_v8  ;;  %vm145_vm13 = vcmp.eq.s32.totalorder %v144_v38, %v570_v8  ;;  %v158_v42 = vld [vmem:[%s156_s17] ss:$0 sm:$0xff]  ;;  %p84_p0 = scmp.ge.s32.totalorder %s87_s14, 4  }
  0x16   : > { %vm180_vm1 = vmand %vm176_vm15, %vm145_vm13  ;;  %s535_s20 = smov (%p84_p0), [#allocation5]  }
  0x17   :  { %s328_s21 = sshll.u32 (%p84_p0), %s535_s20, 4  ;;  %s329_s21 = int_to_ptr.vmem [resolvable:$true] %s328_s21 }
  0x18   :  { %s504_s24 = scalar_lea.vmem (%p84_p0), %s329_s21, 16  ;;  %s508_s25 = scalar_lea.vmem (%p84_p0), %s329_s21, 32 }
  0x19   : > { %v92_v6 = vld [vmem:[#allocation2] sm:$0xff]  ;;  %v152_v41 = vld [vmem:[%s150_s15] ss:$0 sm:$0xff]  ;;  %p505_p1 = scmp.ne.s32.totalorder (%p84_p0), %s329_s21, %s504_s24  ;;  %p509_p2 = scmp.lt.s32.totalorder (%p84_p0), %s329_s21, %s329_s21 }
  0x1a   : > { %v93_v7 = vand.u32 2147483647, %v92_v6  ;;  %p510_p3 = scmp.lt.s32.totalorder (%p84_p0), %s508_s25, %s504_s24 }
  0x1c   : > { %vm483_vm2 = vcmp.gt.f32.partialorder %v93_v7, -inf  ;;  %p511_p4 = por (%p84_p0), %p510_p3, %p509_p2 }
  0x1d   : > { %vm100_vm4 = vmand %vm98_vm3, %vm483_vm2 }
  0x1e   : > { %v101_v9 = vsel %vm100_vm4, %v560_v3, %v570_v8  ;;  %v102_v10 = vsel %vm100_vm4, %v93_v7, -inf  ;;  %p512_p5 = pnand (%p84_p0), %p511_p4, %p505_p1 }
  0x1f   : > { %v103_v11 = vrot.slane %v102_v10, 1  ;;  %v104_v12 = vrot.slane %v101_v9, 1 }
  0x21   : > { %vm105_vm5 = vcmp.ge.f32.partialorder %v103_v11, %v102_v10  ;;  %v108_v13 = vrot.slane %v103_v11, 1  ;;  %v109_v14 = vrot.slane %v104_v12, 1 }
  0x22   : > { %v106_v15 = vsel %vm105_vm5, %v103_v11, %v102_v10  ;;  %v107_v16 = vsel %vm105_vm5, %v104_v12, %v101_v9 }
  0x23   : > { %vm110_vm6 = vcmp.ge.f32.partialorder %v108_v13, %v106_v15  ;;  %v113_v17 = vrot.slane %v108_v13, 1  ;;  %v114_v18 = vrot.slane %v109_v14, 1 }
  0x24   : > { %v111_v19 = vsel %vm110_vm6, %v108_v13, %v106_v15  ;;  %v112_v20 = vsel %vm110_vm6, %v109_v14, %v107_v16 }
  0x25   : > { %vm115_vm7 = vcmp.ge.f32.partialorder %v113_v17, %v111_v19  ;;  %v118_v21 = vrot.slane %v113_v17, 1  ;;  %v119_v22 = vrot.slane %v114_v18, 1 }
  0x26   : > { %v116_v23 = vsel %vm115_vm7, %v113_v17, %v111_v19  ;;  %v117_v24 = vsel %vm115_vm7, %v114_v18, %v112_v20 }
  0x27   : > { %vm120_vm8 = vcmp.ge.f32.partialorder %v118_v21, %v116_v23  ;;  %v123_v25 = vrot.slane %v118_v21, 1  ;;  %v124_v26 = vrot.slane %v119_v22, 1 }
  0x28   : > { %v121_v27 = vsel %vm120_vm8, %v118_v21, %v116_v23  ;;  %v122_v28 = vsel %vm120_vm8, %v119_v22, %v117_v24 }
  0x29   : > { %vm125_vm9 = vcmp.ge.f32.partialorder %v123_v25, %v121_v27  ;;  %v128_v29 = vrot.slane %v123_v25, 1  ;;  %v129_v30 = vrot.slane %v124_v26, 1 }
  0x2a   : > { %v126_v31 = vsel %vm125_vm9, %v123_v25, %v121_v27  ;;  %v127_v32 = vsel %vm125_vm9, %v124_v26, %v122_v28 }
  0x2b   : > { %vm130_vm10 = vcmp.ge.f32.partialorder %v128_v29, %v126_v31  ;;  %v133_v33 = vrot.slane %v128_v29, 1  ;;  %v134_v34 = vrot.slane %v129_v30, 1 }
  0x2c   : > { %v131_v35 = vsel %vm130_vm10, %v128_v29, %v126_v31  ;;  %v132_v36 = vsel %vm130_vm10, %v129_v30, %v127_v32 }
  0x2d   : > { %vm135_vm11 = vcmp.ge.f32.partialorder %v133_v33, %v131_v35 }
  0x2e   : > { %v137_v37 = vsel %vm135_vm11, %v134_v34, %v132_v36 }
  0x2f   : > { %139 = vrot.lane.b32.xlu0 %v137_v37, %s138_s0 }
  0xa1   : > { %v140_v39 = vpop.permute.xlu0 %139 }
  0xa2   : > { %490 = vpush %v140_v39 }
  0xd3   : > { %s491_s16 = spop %490 }
  0xd4   : > { %v146_v43 = vstv %s491_s16  ;;  %s151_s18 = scalar_lea.vmem [#allocation2], %s491_s16  ;;  %s157_s19 = scalar_lea.vmem [#allocation9], %s491_s16 }
  0xd5   : > { %v153_v44 = vld [vmem:[%s151_s18] ss:$0 sm:$0xff]  ;;  %v148_v46 = vsel %vm145_vm13, %v146_v43, %v147_v40 }
  0xd6   : > { %v159_v45 = vld [vmem:[%s157_s19] ss:$0 sm:$0xff]  ;;  %154 = vst [vmem:[%s151_s18] sm:$0x1] %v152_v41  ;;  %vm162_vm14 = vcmp.ne.f32.partialorder %v153_v44, 0.0  ;;  %149 = vst [vmem:[#allocation4] sm:$0x1] %v148_v46 }
  0xd7   : > { %160 = vst [vmem:[%s157_s19] sm:$0x1] %v158_v42  ;;  %155 = vst [vmem:[%s150_s15] sm:$0x1] %v153_v44  ;;  %v169_v53 = vsel %vm168_vm12, %v153_v44, 0.0 }
  0xd8   : > { %161 = vst [vmem:[%s156_s17] sm:$0x1] %v159_v45  ;;  %vm163_vm0 = vmand %vm145_vm13, %vm162_vm14 }
  0xd9   : > { %v164_v47 = vsel %vm163_vm0, %v153_v44, 1.0 }
  0xda   : > { %v177_v48 = vsel %vm176_vm15, %v164_v47, 1.0 }
  0xdb   : > { %502 = vrcp.f32 %v177_v48 }
  0xdd   :  { %v248_v59 = vld [vmem:[#allocation4] sm:$0x1] (%p84_p0) }
  0xde   : > { %v173_v50 = vld [vmem:[#allocation2] sm:$0xff]  ;;  %251 = vst [vmem:[#allocation5] sm:$0x1] (%p84_p0), %v248_v59 }
  0xdf   :  { %v187_v57 = vld [vmem:[#allocation9] sm:$0xff] (%p84_p0) }
  0xe8   : > { %v503_v49 = vpop.eup %502 }
  0xe9   : > { %v179_v51 = vmul.f32 %v503_v49, %v173_v50 }
  0xeb   : > { %v181_v52 = vsel %vm180_vm1, %v179_v51, 0.0 }
  0xec   : > { %182 = vadd.xlane.f32.xlu0 %v181_v52 }
 0x119   :  { %203 = vxpose.xlu0.b32.start.end [1/1] (short) (narrow) (%p84_p0), %v187_v57, 8 }
 0x175   : > { %v183_v54 = vpop.xlane.xlu0 %182 }
 0x176   : > { %v184_v55 = vmul.f32 %v183_v54, %v169_v53  ;;  %86 = sbr.rel (!%p84_p0) target bundleno = 19 (0x13), region = 163 }
 0x178   : > { %v185_v56 = vsub.f32 %v179_v51, %v184_v55 }
 0x17a   : > { %186 = vst [vmem:[#allocation2] sm:$0xff] %v185_v56 }
 0x181   :  { %v240_v58 = vld [vmem:[#allocation2] sm:$0xf] }
 0x182   :  { %243 = vst [vmem:[#allocation3] sm:$0xf] %v240_v58 }
 0x189   :  { %v321_v60 = vld [vmem:[#allocation3] sm:$0xf] }
 0x18a   :  { %322 = vst [vmem:[%s605_s1] sm:$0xf] %v321_v60 }
 0x18b   :  { %515 = shalt.err (!%p512_p5)
}
 0x18c   :  { %331 = dma.vmem_to_hbm [thread:$0]  %s329_s21, 16, %s606_s2, [#allocation6]  }
 0x195   :  { %v219_v61 = vpop.trf.xlu0 }
 0x196   :  { %235 = vst [vmem:[#allocation7] sm:$0x1] %v219_v61 }
 0x19d   :  { %v256_v62 = vld [vmem:[#allocation7] sm:$0x1] }
 0x19e   :  { %259 = vst [vmem:[#allocation8] sm:$0x1] %v256_v62 }
 0x1a5   :  { %v395_v63 = vld [vmem:[#allocation8] sm:$0x1] }
 0x1a6   :  { %396 = vst [vmem:[%s607_s3] sm:$0x1] %v395_v63 }
 0x1a7   :  { %528 = dma.done.wait [#allocation6], 16  }
 0x1a8   :  { %529 = vsyncadd [#allocation6], 4294967280 }
 0x1a9   :  { %402 = vsyncpa [#allocation6], 1 }

// kernel: custom-call.17
= control target key start
LH: loop header
LB: loop body
LE: loop exit
PB: predicated region body
PF: predicated region fallthrough
CT: control target
= control target key end

     0   :  { %v40_v1 = vlaneseq  ;;  %v155_v11 = vmov -1.0   ;;  %s172_s0 = inlined_call_operand.vmem [shape: f32[1,4,4], index: 0, kind: input, shape index: {}]   ;;  %s173_s1 = inlined_call_operand.vmem [shape: f32[1,4,4], index: 1, kind: output, shape index: {}]  }
   0x1   :  { %v18_v0 = vld [vmem:[%s172_s0] sm:$0xf] }
   0x2   :  { %19 = vst [vmem:[#allocation1] sm:$0xf] %v18_v0  ;;  %v41_v3 = vand.u32 127, %v40_v1  ;;  %v44_v4 = vshrl.u32 %v40_v1, 7 }
   0x4   :  { %vm42_vm0 = vcmp.lt.s32.totalorder %v41_v3, 4  ;;  %vm51_vm1 = vcmp.ge.s32.totalorder %v44_v4, %v41_v3  ;;  %vm46_vm2 = vcmp.eq.s32.totalorder %v44_v4, %v41_v3  ;;  %vm65_vm4 = vcmp.eq.s32.totalorder %v41_v3, 0 }
   0x5   :  { %vm52_vm3 = vmand %vm51_vm1, %vm42_vm0  ;;  %vm62_vm5 = vcmp.eq.s32.totalorder %v41_v3, %v44_v4  ;;  %v66_v12 = vsel %vm65_vm4, 1.0, %v155_v11  ;;  %vm73_vm6 = vcmp.eq.s32.totalorder %v41_v3, 1  ;;  %vm83_vm7 = vcmp.eq.s32.totalorder %v41_v3, 2 }
   0x6   :  { %v67_v13 = vsel %vm62_vm5, %v66_v12, 0.0  ;;  %vm93_vm8 = vcmp.eq.s32.totalorder %v41_v3, 3 }
   0x9   :  { %v38_v2 = vld [vmem:[#allocation1] sm:$0xf] }
   0xa   :  { %39 = vst [vmem:[#allocation0] sm:$0xf] %v38_v2 }
  0x11   :  { %v47_v5 = vld [vmem:[#allocation0] sm:$0xff] }
  0x12   :  { %v48_v6 = vsel %vm46_vm2, %v47_v5, 0.0  ;;  %v53_v7 = vsel %vm52_vm3, %v47_v5, 0.0 }
  0x13   :  { %49 = vadd.xlane.f32.xlu0 %v48_v6 }
  0x9c   :  { %v50_v8 = vpop.xlane.xlu0 %49 }
  0x9d   :  { %153 = vrcp.f32 %v50_v8  ;;  %vm100_vm9 = vweird.f32 %v50_v8 }
  0xaa   :  { %v154_v9 = vpop.eup %153 }
  0xab   :  { %v55_v10 = vmul.f32 %v154_v9, %v53_v7 }
  0xad   :  { %56 = vst [vmem:[#allocation4] sm:$0xff] %v55_v10 }
  0xb4   :  { %v69_v14 = vld [vmem:[#allocation4 + $0x1] ss:$0 sm:$0xff]  ;;  %v79_v17 = vld [vmem:[#allocation4 + $0x2] ss:$0 sm:$0xff]  ;;  %v89_v22 = vld [vmem:[#allocation4 + $0x3] ss:$0 sm:$0xff] }
  0xb5   :  { %v70_v15 = vxor.u32 2147483648, %v69_v14  ;;  %v80_v19 = vxor.u32 2147483648, %v79_v17  ;;  %v90_v24 = vxor.u32 2147483648, %v89_v22 }
  0xb7   :  { %v74_v16 = vmul.f32 %v70_v15, %v67_v13 }
  0xb9   :  { %75 = vadd.xlane.f32.xlu0 %v74_v16 }
 0x142   :  { %v76_v18 = vpop.xlane.xlu0 %75 }
 0x143   :  { %v77_v20 = vsel %vm73_vm6, %v76_v18, %v67_v13 }
 0x144   :  { %v84_v21 = vmul.f32 %v80_v19, %v77_v20 }
 0x146   :  { %85 = vadd.xlane.f32.xlu1 %v84_v21 }
 0x1cf   :  { %v86_v23 = vpop.xlane.xlu1 %85 }
 0x1d0   :  { %v87_v25 = vsel %vm83_vm7, %v86_v23, %v77_v20 }
 0x1d1   :  { %v94_v26 = vmul.f32 %v90_v24, %v87_v25 }
 0x1d3   :  { %95 = vadd.xlane.f32.xlu1 %v94_v26 }
 0x25c   :  { %v96_v27 = vpop.xlane.xlu1 %95 }
 0x25d   :  { %v97_v28 = vsel %vm93_vm8, %v96_v27, %v87_v25 }
 0x25e   :  { %v99_v29 = vmul.f32 %v154_v9, %v97_v28 }
 0x260   :  { %v101_v30 = vsel %vm100_vm9, %v97_v28, %v99_v29 }
 0x261   :  { %102 = vst [vmem:[#allocation2] sm:$0xff] %v101_v30 }
 0x268   :  { %v107_v31 = vld [vmem:[#allocation2] sm:$0xf] }
 0x269   :  { %110 = vst [vmem:[#allocation3] sm:$0xf] %v107_v31 }
 0x270   :  { %v127_v32 = vld [vmem:[#allocation3] sm:$0xf] }
 0x271   :  { %128 = vst [vmem:[%s173_s1] sm:$0xf] %v127_v32 }

// kernel: custom-call.16
= control target key start
LH: loop header
LB: loop body
LE: loop exit
PB: predicated region body
PF: predicated region fallthrough
CT: control target
= control target key end

     0   :  { %v40_v1 = vlaneseq  ;;  %v154_v11 = vmov -1.0   ;;  %s171_s0 = inlined_call_operand.vmem [shape: f32[1,4,4], index: 0, kind: input, shape index: {}]   ;;  %s172_s1 = inlined_call_operand.vmem [shape: f32[1,4,4], index: 1, kind: output, shape index: {}]  }
   0x1   :  { %v18_v0 = vld [vmem:[%s171_s0] sm:$0xf] }
   0x2   :  { %19 = vst [vmem:[#allocation1] sm:$0xf] %v18_v0  ;;  %v41_v3 = vand.u32 127, %v40_v1  ;;  %v44_v4 = vshrl.u32 %v40_v1, 7 }
   0x4   :  { %vm42_vm0 = vcmp.lt.s32.totalorder %v41_v3, 4  ;;  %vm51_vm1 = vcmp.le.s32.totalorder %v44_v4, %v41_v3  ;;  %vm46_vm2 = vcmp.eq.s32.totalorder %v44_v4, %v41_v3  ;;  %vm65_vm4 = vcmp.eq.s32.totalorder %v41_v3, 3 }
   0x5   :  { %vm52_vm3 = vmand %vm51_vm1, %vm42_vm0  ;;  %vm62_vm5 = vcmp.eq.s32.totalorder %v41_v3, %v44_v4  ;;  %v66_v12 = vsel %vm65_vm4, 1.0, %v154_v11  ;;  %vm73_vm6 = vcmp.eq.s32.totalorder %v41_v3, 2  ;;  %vm83_vm7 = vcmp.eq.s32.totalorder %v41_v3, 1 }
   0x6   :  { %v67_v13 = vsel %vm62_vm5, %v66_v12, 0.0  ;;  %vm92_vm8 = vcmp.eq.s32.totalorder %v41_v3, 0 }
   0x9   :  { %v38_v2 = vld [vmem:[#allocation1] sm:$0xf] }
   0xa   :  { %39 = vst [vmem:[#allocation0] sm:$0xf] %v38_v2 }
  0x11   :  { %v47_v5 = vld [vmem:[#allocation0] sm:$0xff] }
  0x12   :  { %v48_v6 = vsel %vm46_vm2, %v47_v5, 0.0  ;;  %v53_v7 = vsel %vm52_vm3, %v47_v5, 0.0 }
  0x13   :  { %49 = vadd.xlane.f32.xlu0 %v48_v6 }
  0x9c   :  { %v50_v8 = vpop.xlane.xlu0 %49 }
  0x9d   :  { %152 = vrcp.f32 %v50_v8  ;;  %vm99_vm9 = vweird.f32 %v50_v8 }
  0xaa   :  { %v153_v9 = vpop.eup %152 }
  0xab   :  { %v55_v10 = vmul.f32 %v153_v9, %v53_v7 }
  0xad   :  { %56 = vst [vmem:[#allocation4] sm:$0xff] %v55_v10 }
  0xb4   :  { %v69_v14 = vld [vmem:[#allocation4 + $0x2] ss:$0 sm:$0xff]  ;;  %v79_v17 = vld [vmem:[#allocation4 + $0x1] ss:$0 sm:$0xff]  ;;  %v88_v22 = vld [vmem:[#allocation4] ss:$0 sm:$0xff] }
  0xb5   :  { %v70_v15 = vxor.u32 2147483648, %v69_v14  ;;  %v80_v19 = vxor.u32 2147483648, %v79_v17  ;;  %v89_v24 = vxor.u32 2147483648, %v88_v22 }
  0xb7   :  { %v74_v16 = vmul.f32 %v70_v15, %v67_v13 }
  0xb9   :  { %75 = vadd.xlane.f32.xlu0 %v74_v16 }
 0x142   :  { %v76_v18 = vpop.xlane.xlu0 %75 }
 0x143   :  { %v77_v20 = vsel %vm73_vm6, %v76_v18, %v67_v13 }
 0x144   :  { %v84_v21 = vmul.f32 %v80_v19, %v77_v20 }
 0x146   :  { %85 = vadd.xlane.f32.xlu1 %v84_v21 }
 0x1cf   :  { %v86_v23 = vpop.xlane.xlu1 %85 }
 0x1d0   :  { %v87_v25 = vsel %vm83_vm7, %v86_v23, %v77_v20 }
 0x1d1   :  { %v93_v26 = vmul.f32 %v89_v24, %v87_v25 }
 0x1d3   :  { %94 = vadd.xlane.f32.xlu1 %v93_v26 }
 0x25c   :  { %v95_v27 = vpop.xlane.xlu1 %94 }
 0x25d   :  { %v96_v28 = vsel %vm92_vm8, %v95_v27, %v87_v25 }
 0x25e   :  { %v98_v29 = vmul.f32 %v153_v9, %v96_v28 }
 0x260   :  { %v100_v30 = vsel %vm99_vm9, %v96_v28, %v98_v29 }
 0x261   :  { %101 = vst [vmem:[#allocation2] sm:$0xff] %v100_v30 }
 0x268   :  { %v106_v31 = vld [vmem:[#allocation2] sm:$0xf] }
 0x269   :  { %109 = vst [vmem:[#allocation3] sm:$0xf] %v106_v31 }
 0x270   :  { %v126_v32 = vld [vmem:[#allocation3] sm:$0xf] }
 0x271   :  { %127 = vst [vmem:[%s172_s1] sm:$0xf] %v126_v32 }

// kernel: koopman_actor_forward.5
= control target key start
LH: loop header
LB: loop body
LE: loop exit
PB: predicated region body
PF: predicated region fallthrough
CT: control target
= control target key end

     0   :  { %v6610_v21 = vmov 1983009808   ;;  %v929_v23 = vlaneseq  ;;  %vm6612_vm0 = vmmov 0   ;;  %vm4830_vm1 = vcmask 256000   ;;  %s8126_s1 = inlined_call_operand.vmem [shape: bf16[6784,32], index: 1, kind: input, shape index: {}]   ;;  %s8127_s0 = inlined_call_operand.vmem [shape: bf16[3,6784], index: 0, kind: input, shape index: {}]   ;;  %s8128_s2 = inlined_call_operand.vmem [shape: f32[1,32], index: 2, kind: input, shape index: {}]   ;;  %s8129_s5 = inlined_call_operand.vmem [shape: f32[32,4], index: 5, kind: input, shape index: {}]   ;;  %s8130_s9 = inlined_call_operand.<no memory space> [shape: f32[1,1], index: 9, kind: input, shape index: {}]   ;;  %s8131_s7 = inlined_call_operand.vmem [shape: f32[3,1], index: 7, kind: input, shape index: {}]   ;;  %s8132_s3 = inlined_call_operand.vmem [shape: f32[1,32], index: 3, kind: input, shape index: {}]   ;;  %s8133_s4 = inlined_call_operand.vmem [shape: f32[1,32], index: 4, kind: input, shape index: {}]   ;;  %s8134_s6 = inlined_call_operand.vmem [shape: f32[32,4], index: 6, kind: input, shape index: {}]   ;;  %s8135_s13 = inlined_call_operand.vmem [shape: f32[3,4], index: 13, kind: output, shape index: {3}]   ;;  %s8136_s8 = inlined_call_operand.vmem [shape: f32[3,4], index: 8, kind: input, shape index: {}]   ;;  %s8137_s10 = inlined_call_operand.vmem [shape: f32[3,4], index: 10, kind: output, shape index: {0}]   ;;  %s8138_s11 = inlined_call_operand.vmem [shape: f32[3,4], index: 11, kind: output, shape index: {1}]   ;;  %s8139_s12 = inlined_call_operand.vmem [shape: f32[3,1], index: 12, kind: output, shape index: {2}]  }
   0x1   :  { %v6161_v0 = vld [vmem:[%s8126_s1 + $0x78] sm:$0xff]   ;;  %v6165_v4 = vld [vmem:[%s8126_s1 + $0x70] sm:$0xff]   ;;  %v6169_v8 = vld [vmem:[%s8126_s1 + $0x68] sm:$0xff]   ;;  %v927_v22 = vunpack.c.l.s4 %v6610_v21  ;;  %vm4865_vm2 = vcmask 261120   ;;  %vm5021_vm3 = vcmask 26624   ;;  %vm5071_vm4 = vcmask 2048  }
   0x2   :  { %v6162_v1 = vld [vmem:[%s8126_s1 + $0x38] sm:$0xff]   ;;  %5522 = vmatprep.subr.bf16.mxu0 %v6161_v0  ;;  %v6166_v5 = vld [vmem:[%s8126_s1 + $0x30] sm:$0xff]   ;;  %v6170_v9 = vld [vmem:[%s8126_s1 + $0x28] sm:$0xff]   ;;  %v930_v29 = vshrl.u32 %v929_v23, 7 }
   0x3   :  { %v6163_v2 = vld [vmem:[%s8126_s1 + $0xf8] sm:$0xff]   ;;  %5523 = vmatpush3.bf16.msra.mxu0 %v6162_v1  ;;  %v6167_v6 = vld [vmem:[%s8126_s1 + $0xf0] sm:$0xff]   ;;  %v6171_v10 = vld [vmem:[%s8126_s1 + $0xe8] sm:$0xff]   ;;  %v928_v28 = vunpack.c.0.s8 %v927_v22 }
   0x4   :  { %v6164_v3 = vld [vmem:[%s8126_s1 + $0xb8] sm:$0xff]   ;;  %5544 = vmatprep.subr.bf16.mxu1 %v6163_v2  ;;  %5524 = vmatprep.subr.bf16.mxu0 %v6165_v4  ;;  %v6168_v7 = vld [vmem:[%s8126_s1 + $0xb0] sm:$0xff]   ;;  %v6172_v11 = vld [vmem:[%s8126_s1 + $0xa8] sm:$0xff]  }
   0x5   :  { %5545 = vmatpush3.bf16.msra.mxu1 %v6164_v3  ;;  %v6173_v12 = vld [vmem:[%s8126_s1 + $0x60] sm:$0xff]   ;;  %v6177_v16 = vld [vmem:[%s8126_s1 + $0x58] sm:$0xff]   ;;  %v6181_v20 = vld [vmem:[%s8126_s1 + $0x50] sm:$0xff]   ;;  %v6771_v34 = vsub.s32 %v928_v28, %v930_v29 }
   0x6   :  { %5546 = vmatprep.subr.bf16.mxu1 %v6167_v6  ;;  %v6174_v13 = vld [vmem:[%s8126_s1 + $0x20] sm:$0xff]   ;;  %v6178_v17 = vld [vmem:[%s8126_s1 + $0x18] sm:$0xff]   ;;  %v6182_v24 = vld [vmem:[%s8126_s1 + $0x10] sm:$0xff]  }
   0x7   :  { %5525 = vmatpush3.bf16.msra.mxu0 %v6166_v5  ;;  %v6175_v14 = vld [vmem:[%s8126_s1 + $0xe0] sm:$0xff]   ;;  %v6179_v18 = vld [vmem:[%s8126_s1 + $0xd8] sm:$0xff]   ;;  %v6183_v25 = vld [vmem:[%s8126_s1 + $0xd0] sm:$0xff]  }
   0x8   :  { %5526 = vmatprep.subr.bf16.mxu0 %v6169_v8  ;;  %v6176_v15 = vld [vmem:[%s8126_s1 + $0xa0] sm:$0xff]   ;;  %v6180_v19 = vld [vmem:[%s8126_s1 + $0x98] sm:$0xff]   ;;  %v6184_v26 = vld [vmem:[%s8126_s1 + $0x90] sm:$0xff]  }
   0x9   :  { %5547 = vmatpush3.bf16.msra.mxu1 %v6168_v7  ;;  %v6185_v27 = vld [vmem:[%s8126_s1 + $0x48] sm:$0xff]   ;;  %v6189_v33 = vld [vmem:[%s8126_s1 + $0x40] sm:$0xff]   ;;  %v6193_v41 = vld [vmem:[%s8126_s1 + $0x178] sm:$0xff]  }
   0xa   :  { %5548 = vmatprep.subr.bf16.mxu1 %v6171_v10  ;;  %v6186_v30 = vld [vmem:[%s8126_s1 + $0x8] sm:$0xff]   ;;  %v6190_v35 = vld [vmem:[%s8126_s1] sm:$0xff]   ;;  %v6195_v44 = vld [vmem:[%s8126_s1 + $0x138] sm:$0xff]  }
   0xb   :  { %5527 = vmatpush3.bf16.msra.mxu0 %v6170_v9  ;;  %v6187_v31 = vld [vmem:[%s8126_s1 + $0xc8] sm:$0xff]   ;;  %v6191_v36 = vld [vmem:[%s8126_s1 + $0xc0] sm:$0xff]   ;;  %v6196_v45 = vld [vmem:[%s8126_s1 + $0x1f8] sm:$0xff]  }
   0xc   :  { %5528 = vmatprep.subr.bf16.mxu0 %v6173_v12  ;;  %v6188_v32 = vld [vmem:[%s8126_s1 + $0x88] sm:$0xff]   ;;  %v42_v37 = vld [vmem:[%s8127_s0] sm:$0xff]  ;;  %v6197_v47 = vld [vmem:[%s8126_s1 + $0x1b8] sm:$0xff]  }
   0xd   :  { %5549 = vmatpush3.bf16.msra.mxu1 %v6172_v11  ;;  %v932_v38 = vrot.slane %v42_v37, %v6771_v34  ;;  %v6192_v39 = vld [vmem:[%s8126_s1 + $0x80] sm:$0xff]   ;;  %v925_v40 = vcombine.high %v42_v37, %v42_v37  ;;  %v6198_v48 = vld [vmem:[%s8126_s1 + $0x170] sm:$0xff]   ;;  %v6202_v52 = vld [vmem:[%s8126_s1 + $0x168] sm:$0xff]  }
   0xe   :  { %5550 = vmatprep.subr.bf16.mxu1 %v6175_v14  ;;  %v6199_v49 = vld [vmem:[%s8126_s1 + $0x130] sm:$0xff]   ;;  %v6203_v53 = vld [vmem:[%s8126_s1 + $0x128] sm:$0xff]   ;;  %v6206_v56 = vld [vmem:[%s8126_s1 + $0x160] sm:$0xff]  }
   0xf   :  { %5529 = vmatpush3.bf16.msra.mxu0 %v6174_v13  ;;  %v940_v42 = vcombine.high %v932_v38, %v932_v38  ;;  %v939_v43 = vrot.slane %v925_v40, %v6771_v34  ;;  %v6200_v50 = vld [vmem:[%s8126_s1 + $0x1f0] sm:$0xff]   ;;  %v6204_v54 = vld [vmem:[%s8126_s1 + $0x1e8] sm:$0xff]   ;;  %v6207_v57 = vld [vmem:[%s8126_s1 + $0x120] sm:$0xff]  }
  0x10   :  { %5530 = vmatprep.subr.bf16.mxu0 %v6177_v16  ;;  %v6201_v51 = vld [vmem:[%s8126_s1 + $0x1b0] sm:$0xff]   ;;  %v6205_v55 = vld [vmem:[%s8126_s1 + $0x1a8] sm:$0xff]   ;;  %v6208_v58 = vld [vmem:[%s8126_s1 + $0x1e0] sm:$0xff]  }
  0x11   :  { %5551 = vmatpush3.bf16.msra.mxu1 %v6176_v15  ;;  %3782 = vmatprep.mubr.bf16.mxu0 %v940_v42  ;;  %v941_v46 = vcombine.high %v939_v43, %v939_v43  ;;  %v6209_v59 = vld [vmem:[%s8126_s1 + $0x1a0] sm:$0xff]   ;;  %v6210_v60 = vld [vmem:[%s8126_s1 + $0x158] sm:$0xff]   ;;  %v6214_v0 = vld [vmem:[%s8126_s1 + $0x150] sm:$0xff]  }
  0x12   :  { %5552 = vmatprep.subr.bf16.mxu1 %v6179_v18  ;;  %v6211_v61 = vld [vmem:[%s8126_s1 + $0x118] sm:$0xff]   ;;  %v6215_v1 = vld [vmem:[%s8126_s1 + $0x110] sm:$0xff]   ;;  %v6218_v4 = vld [vmem:[%s8126_s1 + $0x148] sm:$0xff]  }
  0x13   :  { %5531 = vmatpush3.bf16.msra.mxu0 %v6178_v17  ;;  %3822 = vmatprep.mubr.bf16.mxu1 %v941_v46  ;;  %v6212_v62 = vld [vmem:[%s8126_s1 + $0x1d8] sm:$0xff]   ;;  %v6216_v2 = vld [vmem:[%s8126_s1 + $0x1d0] sm:$0xff]   ;;  %v6219_v5 = vld [vmem:[%s8126_s1 + $0x108] sm:$0xff]  }
  0x14   :  { %5532 = vmatprep.subr.bf16.mxu0 %v6181_v20  ;;  %v6213_v63 = vld [vmem:[%s8126_s1 + $0x198] sm:$0xff]   ;;  %v6217_v3 = vld [vmem:[%s8126_s1 + $0x190] sm:$0xff]   ;;  %v6220_v6 = vld [vmem:[%s8126_s1 + $0x1c8] sm:$0xff]  }
  0x15   :  { %5553 = vmatpush3.bf16.msra.mxu1 %v6180_v19  ;;  %v6221_v7 = vld [vmem:[%s8126_s1 + $0x188] sm:$0xff]   ;;  %v6222_v8 = vld [vmem:[%s8126_s1 + $0x140] sm:$0xff]   ;;  %v6226_v15 = vld [vmem:[%s8126_s1 + $0x278] sm:$0xff]  }
  0x16   :  { %5554 = vmatprep.subr.bf16.mxu1 %v6183_v25  ;;  %v6223_v9 = vld [vmem:[%s8126_s1 + $0x100] sm:$0xff]   ;;  %v43_v11 = vld [vmem:[%s8127_s0 + $0x8] sm:$0xff]  ;;  %v6228_v18 = vld [vmem:[%s8126_s1 + $0x238] sm:$0xff]  }
  0x17   :  { %5533 = vmatpush3.bf16.msra.mxu0 %v6182_v24  ;;  %v6224_v10 = vld [vmem:[%s8126_s1 + $0x1c0] sm:$0xff]   ;;  %v949_v12 = vrot.slane %v43_v11, %v6771_v34  ;;  %v942_v14 = vcombine.high %v43_v11, %v43_v11  ;;  %v6229_v19 = vld [vmem:[%s8126_s1 + $0x2f8] sm:$0xff]   ;;  %v6231_v22 = vld [vmem:[%s8126_s1 + $0x270] sm:$0xff]  }
  0x18   :  { %5534 = vmatprep.subr.bf16.mxu0 %v6185_v27  ;;  %v6225_v13 = vld [vmem:[%s8126_s1 + $0x180] sm:$0xff]   ;;  %v6230_v21 = vld [vmem:[%s8126_s1 + $0x2b8] sm:$0xff]   ;;  %v6232_v23 = vld [vmem:[%s8126_s1 + $0x230] sm:$0xff]  }
  0x19   :  { %5555 = vmatpush3.bf16.msra.mxu1 %v6184_v26  ;;  %v957_v16 = vcombine.high %v949_v12, %v949_v12  ;;  %v956_v17 = vrot.slane %v942_v14, %v6771_v34  ;;  %v6233_v24 = vld [vmem:[%s8126_s1 + $0x2f0] sm:$0xff]   ;;  %v6235_v26 = vld [vmem:[%s8126_s1 + $0x268] sm:$0xff]   ;;  %v6245_v37 = vld [vmem:[%s8126_s1 + $0x2d8] sm:$0xff]  }
  0x1a   :  { %5556 = vmatprep.subr.bf16.mxu1 %v6187_v31  ;;  %v6234_v25 = vld [vmem:[%s8126_s1 + $0x2b0] sm:$0xff]   ;;  %v6236_v27 = vld [vmem:[%s8126_s1 + $0x228] sm:$0xff]   ;;  %v6240_v31 = vld [vmem:[%s8126_s1 + $0x220] sm:$0xff]  }
  0x1b   :  { %5535 = vmatpush3.bf16.msra.mxu0 %v6186_v30  ;;  %v958_v20 = vcombine.high %v956_v17, %v956_v17  ;;  %v6237_v28 = vld [vmem:[%s8126_s1 + $0x2e8] sm:$0xff]   ;;  %v6239_v30 = vld [vmem:[%s8126_s1 + $0x260] sm:$0xff]   ;;  %v6248_v40 = vld [vmem:[%s8126_s1 + $0x210] sm:$0xff]  }
  0x1c   :  { %5536 = vmatprep.subr.bf16.mxu0 %v6189_v33  ;;  %v6238_v29 = vld [vmem:[%s8126_s1 + $0x2a8] sm:$0xff]   ;;  %v6242_v33 = vld [vmem:[%s8126_s1 + $0x2a0] sm:$0xff]   ;;  %v6250_v42 = vld [vmem:[%s8126_s1 + $0x290] sm:$0xff]  }
  0x1d   :  { %5557 = vmatpush3.bf16.msra.mxu1 %v6188_v32  ;;  %v6241_v32 = vld [vmem:[%s8126_s1 + $0x2e0] sm:$0xff]   ;;  %v6254_v46 = vld [vmem:[%s8126_s1 + $0x288] sm:$0xff]   ;;  %v6278_v11 = vld [vmem:[%s8126_s1 + $0x3d8] sm:$0xff]  }
  0x1e   :  { %5558 = vmatprep.subr.bf16.mxu1 %v6191_v36  ;;  %v6244_v36 = vld [vmem:[%s8126_s1 + $0x218] sm:$0xff]   ;;  %v6281_v14 = vld [vmem:[%s8126_s1 + $0x310] sm:$0xff]  }
  0x1f   :  { %5537 = vmatpush3.bf16.msra.mxu0 %v6190_v35  ;;  %v6243_v35 = vld [vmem:[%s8126_s1 + $0x258] sm:$0xff]  }
  0x20   :  { %5566 = vmatprep.subr.bf16.mxu0 %v6193_v41  ;;  %v6249_v41 = vld [vmem:[%s8126_s1 + $0x2d0] sm:$0xff]  }
  0x21   :  { %5559 = vmatpush3.bf16.msra.mxu1 %v6192_v39  ;;  %v6247_v39 = vld [vmem:[%s8126_s1 + $0x250] sm:$0xff]  }
  0x22   :  { %3783 = vmatmul.mubr.bf16.vlgmr.msra.gmra.mxu0 %v932_v38  ;;  %5588 = vmatprep.subr.bf16.mxu1 %v6196_v45  ;;  %v6246_v38 = vld [vmem:[%s8126_s1 + $0x298] sm:$0xff]   ;;  %v6253_v45 = vld [vmem:[%s8126_s1 + $0x2c8] sm:$0xff]  }
  0x23   :  { %5567 = vmatpush3.bf16.msra.mxu0 %v6195_v44  ;;  %3862 = vmatprep.mubr.bf16.mxu0 %v957_v16  ;;  %v6252_v44 = vld [vmem:[%s8126_s1 + $0x208] sm:$0xff]   ;;  %v6283_v16 = vld [vmem:[%s8126_s1 + $0x390] sm:$0xff]  }
  0x24   :  { %3823 = vmatmul.mubr.bf16.vlgmr.msra.gmra.mxu1 %v939_v43  ;;  %5568 = vmatprep.subr.bf16.mxu0 %v6198_v48  ;;  %v6251_v43 = vld [vmem:[%s8126_s1 + $0x248] sm:$0xff]   ;;  %v6256_v48 = vld [vmem:[%s8126_s1 + $0x200] sm:$0xff]  }
  0x25   :  { %5589 = vmatpush3.bf16.msra.mxu1 %v6197_v47  ;;  %3902 = vmatprep.mubr.bf16.mxu1 %v958_v20  ;;  %v6255_v47 = vld [vmem:[%s8126_s1 + $0x240] sm:$0xff]   ;;  %v6287_v20 = vld [vmem:[%s8126_s1 + $0x388] sm:$0xff]  }
  0x26   :  { %5590 = vmatprep.subr.bf16.mxu1 %v6200_v50  ;;  %v44_v50 = vld [vmem:[%s8127_s0 + $0x10] sm:$0xff] }
  0x27   :  { %5569 = vmatpush3.bf16.msra.mxu0 %v6199_v49  ;;  %v6257_v49 = vld [vmem:[%s8126_s1 + $0x2c0] sm:$0xff]  }
  0x28   :  { %5570 = vmatprep.subr.bf16.mxu0 %v6202_v52  ;;  %v6258_v52 = vld [vmem:[%s8126_s1 + $0x280] sm:$0xff]  }
  0x29   :  { %5591 = vmatpush3.bf16.msra.mxu1 %v6201_v51  ;;  %v966_v51 = vrot.slane %v44_v50, %v6771_v34 }
  0x2a   :  { %5592 = vmatprep.subr.bf16.mxu1 %v6204_v54  ;;  %v6259_v54 = vld [vmem:[%s8126_s1 + $0x378] sm:$0xff]  }
  0x2b   :  { %5571 = vmatpush3.bf16.msra.mxu0 %v6203_v53  ;;  %v959_v53 = vcombine.high %v44_v50, %v44_v50  ;;  %v6311_v50 = vld [vmem:[%s8126_s1 + $0x4d8] sm:$0xff]  }
  0x2c   :  { %5572 = vmatprep.subr.bf16.mxu0 %v6206_v56 }
  0x2d   :  { %5593 = vmatpush3.bf16.msra.mxu1 %v6205_v55  ;;  %v974_v55 = vcombine.high %v966_v51, %v966_v51  ;;  %v973_v56 = vrot.slane %v959_v53, %v6771_v34  ;;  %v6314_v53 = vld [vmem:[%s8126_s1 + $0x410] sm:$0xff]  }
  0x2e   :  { %5594 = vmatprep.subr.bf16.mxu1 %v6208_v58  ;;  %v6262_v58 = vld [vmem:[%s8126_s1 + $0x3f8] sm:$0xff]  }
  0x2f   :  { %5573 = vmatpush3.bf16.msra.mxu0 %v6207_v57  ;;  %v6261_v57 = vld [vmem:[%s8126_s1 + $0x338] sm:$0xff]  }
  0x30   :  { %5574 = vmatprep.subr.bf16.mxu0 %v6210_v60  ;;  %v6263_v60 = vld [vmem:[%s8126_s1 + $0x3b8] sm:$0xff]  }
  0x31   :  { %5595 = vmatpush3.bf16.msra.mxu1 %v6209_v59  ;;  %v975_v59 = vcombine.high %v973_v56, %v973_v56 }
  0x32   :  { %5596 = vmatprep.subr.bf16.mxu1 %v6212_v62  ;;  %v6265_v62 = vld [vmem:[%s8126_s1 + $0x330] sm:$0xff]  }
  0x33   :  { %5575 = vmatpush3.bf16.msra.mxu0 %v6211_v61  ;;  %v6264_v61 = vld [vmem:[%s8126_s1 + $0x370] sm:$0xff]  }
  0x34   :  { %5576 = vmatprep.subr.bf16.mxu0 %v6214_v0  ;;  %v6267_v0 = vld [vmem:[%s8126_s1 + $0x3b0] sm:$0xff]  }
  0x35   :  { %5597 = vmatpush3.bf16.msra.mxu1 %v6213_v63  ;;  %v6266_v63 = vld [vmem:[%s8126_s1 + $0x3f0] sm:$0xff]  }
  0x36   :  { %5598 = vmatprep.subr.bf16.mxu1 %v6216_v2  ;;  %v6269_v2 = vld [vmem:[%s8126_s1 + $0x328] sm:$0xff]  }
  0x37   :  { %5577 = vmatpush3.bf16.msra.mxu0 %v6215_v1  ;;  %v6268_v1 = vld [vmem:[%s8126_s1 + $0x368] sm:$0xff]  }
  0x38   :  { %5578 = vmatprep.subr.bf16.mxu0 %v6218_v4  ;;  %v6271_v4 = vld [vmem:[%s8126_s1 + $0x3a8] sm:$0xff]  }
  0x39   :  { %5599 = vmatpush3.bf16.msra.mxu1 %v6217_v3  ;;  %v6270_v3 = vld [vmem:[%s8126_s1 + $0x3e8] sm:$0xff]  }
  0x3a   :  { %5600 = vmatprep.subr.bf16.mxu1 %v6220_v6  ;;  %v6273_v6 = vld [vmem:[%s8126_s1 + $0x320] sm:$0xff]  }
  0x3b   :  { %5579 = vmatpush3.bf16.msra.mxu0 %v6219_v5  ;;  %v6272_v5 = vld [vmem:[%s8126_s1 + $0x360] sm:$0xff]  }
  0x3c   :  { %5580 = vmatprep.subr.bf16.mxu0 %v6222_v8  ;;  %v6275_v8 = vld [vmem:[%s8126_s1 + $0x3a0] sm:$0xff]  }
  0x3d   :  { %5601 = vmatpush3.bf16.msra.mxu1 %v6221_v7  ;;  %v6274_v7 = vld [vmem:[%s8126_s1 + $0x3e0] sm:$0xff]  }
  0x3e   :  { %5602 = vmatprep.subr.bf16.mxu1 %v6224_v10  ;;  %v6277_v10 = vld [vmem:[%s8126_s1 + $0x318] sm:$0xff]  }
  0x3f   :  { %5581 = vmatpush3.bf16.msra.mxu0 %v6223_v9  ;;  %v6276_v9 = vld [vmem:[%s8126_s1 + $0x358] sm:$0xff]  }
  0x40   :  { %5610 = vmatprep.subr.bf16.mxu0 %v6226_v15  ;;  %v6282_v15 = vld [vmem:[%s8126_s1 + $0x3d0] sm:$0xff]  }
  0x41   :  { %5603 = vmatpush3.bf16.msra.mxu1 %v6225_v13  ;;  %v6280_v13 = vld [vmem:[%s8126_s1 + $0x350] sm:$0xff]  }
  0x42   :  { %3863 = vmatmul.mubr.bf16.vlgmr.msra.gmra.mxu0 %v949_v12  ;;  %5632 = vmatprep.subr.bf16.mxu1 %v6229_v19  ;;  %v6279_v12 = vld [vmem:[%s8126_s1 + $0x398] sm:$0xff]   ;;  %v6286_v19 = vld [vmem:[%s8126_s1 + $0x3c8] sm:$0xff]  }
  0x43   :  { %5611 = vmatpush3.bf16.msra.mxu0 %v6228_v18  ;;  %3942 = vmatprep.mubr.bf16.mxu0 %v974_v55  ;;  %v6285_v18 = vld [vmem:[%s8126_s1 + $0x308] sm:$0xff]   ;;  %v6316_v55 = vld [vmem:[%s8126_s1 + $0x490] sm:$0xff]  }
  0x44   :  { %3903 = vmatmul.mubr.bf16.vlgmr.msra.gmra.mxu1 %v956_v17  ;;  %5612 = vmatprep.subr.bf16.mxu0 %v6231_v22  ;;  %v6284_v17 = vld [vmem:[%s8126_s1 + $0x348] sm:$0xff]   ;;  %v6289_v22 = vld [vmem:[%s8126_s1 + $0x300] sm:$0xff]  }
  0x45   :  { %5633 = vmatpush3.bf16.msra.mxu1 %v6230_v21  ;;  %3982 = vmatprep.mubr.bf16.mxu1 %v975_v59  ;;  %v6288_v21 = vld [vmem:[%s8126_s1 + $0x340] sm:$0xff]   ;;  %v6320_v59 = vld [vmem:[%s8126_s1 + $0x488] sm:$0xff]  }
  0x46   :  { %5634 = vmatprep.subr.bf16.mxu1 %v6233_v24  ;;  %v45_v24 = vld [vmem:[%s8127_s0 + $0x18] sm:$0xff] }
  0x47   :  { %5613 = vmatpush3.bf16.msra.mxu0 %v6232_v23  ;;  %v6290_v23 = vld [vmem:[%s8126_s1 + $0x3c0] sm:$0xff]  }
  0x48   :  { %5614 = vmatprep.subr.bf16.mxu0 %v6235_v26  ;;  %v6291_v26 = vld [vmem:[%s8126_s1 + $0x380] sm:$0xff]  }
  0x49   :  { %5635 = vmatpush3.bf16.msra.mxu1 %v6234_v25  ;;  %v983_v25 = vrot.slane %v45_v24, %v6771_v34 }
  0x4a   :  { %5636 = vmatprep.subr.bf16.mxu1 %v6237_v28  ;;  %v6292_v28 = vld [vmem:[%s8126_s1 + $0x478] sm:$0xff]  }
  0x4b   :  { %5615 = vmatpush3.bf16.msra.mxu0 %v6236_v27  ;;  %v976_v27 = vcombine.high %v45_v24, %v45_v24  ;;  %v6344_v24 = vld [vmem:[%s8126_s1 + $0x5d8] sm:$0xff]  }
  0x4c   :  { %5616 = vmatprep.subr.bf16.mxu0 %v6239_v30 }
  0x4d   :  { %5637 = vmatpush3.bf16.msra.mxu1 %v6238_v29  ;;  %v991_v29 = vcombine.high %v983_v25, %v983_v25  ;;  %v990_v30 = vrot.slane %v976_v27, %v6771_v34  ;;  %v6347_v27 = vld [vmem:[%s8126_s1 + $0x510] sm:$0xff]  }
  0x4e   :  { %5638 = vmatprep.subr.bf16.mxu1 %v6241_v32  ;;  %v6295_v32 = vld [vmem:[%s8126_s1 + $0x4f8] sm:$0xff]  }
  0x4f   :  { %5617 = vmatpush3.bf16.msra.mxu0 %v6240_v31  ;;  %v6294_v31 = vld [vmem:[%s8126_s1 + $0x438] sm:$0xff]  }
  0x50   :  { %5618 = vmatprep.subr.bf16.mxu0 %v6243_v35  ;;  %v6296_v35 = vld [vmem:[%s8126_s1 + $0x4b8] sm:$0xff]  }
  0x51   :  { %5639 = vmatpush3.bf16.msra.mxu1 %v6242_v33  ;;  %v992_v33 = vcombine.high %v990_v30, %v990_v30 }
  0x52   :  { %5640 = vmatprep.subr.bf16.mxu1 %v6245_v37  ;;  %v6298_v37 = vld [vmem:[%s8126_s1 + $0x430] sm:$0xff]  }
  0x53   :  { %5619 = vmatpush3.bf16.msra.mxu0 %v6244_v36  ;;  %v6297_v36 = vld [vmem:[%s8126_s1 + $0x470] sm:$0xff]  }
  0x54   :  { %5620 = vmatprep.subr.bf16.mxu0 %v6247_v39  ;;  %v6300_v39 = vld [vmem:[%s8126_s1 + $0x4b0] sm:$0xff]  }
  0x55   :  { %5641 = vmatpush3.bf16.msra.mxu1 %v6246_v38  ;;  %v6299_v38 = vld [vmem:[%s8126_s1 + $0x4f0] sm:$0xff]  }
  0x56   :  { %5642 = vmatprep.subr.bf16.mxu1 %v6249_v41  ;;  %v6302_v41 = vld [vmem:[%s8126_s1 + $0x428] sm:$0xff]  }
  0x57   :  { %5621 = vmatpush3.bf16.msra.mxu0 %v6248_v40  ;;  %v6301_v40 = vld [vmem:[%s8126_s1 + $0x468] sm:$0xff]  }
  0x58   :  { %5622 = vmatprep.subr.bf16.mxu0 %v6251_v43  ;;  %v6304_v43 = vld [vmem:[%s8126_s1 + $0x4a8] sm:$0xff]  }
  0x59   :  { %5643 = vmatpush3.bf16.msra.mxu1 %v6250_v42  ;;  %v6303_v42 = vld [vmem:[%s8126_s1 + $0x4e8] sm:$0xff]  }
  0x5a   :  { %5644 = vmatprep.subr.bf16.mxu1 %v6253_v45  ;;  %v6306_v45 = vld [vmem:[%s8126_s1 + $0x420] sm:$0xff]  }
  0x5b   :  { %5623 = vmatpush3.bf16.msra.mxu0 %v6252_v44  ;;  %v6305_v44 = vld [vmem:[%s8126_s1 + $0x460] sm:$0xff]  }
  0x5c   :  { %5624 = vmatprep.subr.bf16.mxu0 %v6255_v47  ;;  %v6308_v47 = vld [vmem:[%s8126_s1 + $0x4a0] sm:$0xff]  }
  0x5d   :  { %5645 = vmatpush3.bf16.msra.mxu1 %v6254_v46  ;;  %v6307_v46 = vld [vmem:[%s8126_s1 + $0x4e0] sm:$0xff]  }
  0x5e   :  { %5646 = vmatprep.subr.bf16.mxu1 %v6257_v49  ;;  %v6310_v49 = vld [vmem:[%s8126_s1 + $0x418] sm:$0xff]  }
  0x5f   :  { %5625 = vmatpush3.bf16.msra.mxu0 %v6256_v48  ;;  %v6309_v48 = vld [vmem:[%s8126_s1 + $0x458] sm:$0xff]  }
  0x60   :  { %5654 = vmatprep.subr.bf16.mxu0 %v6259_v54  ;;  %v6315_v54 = vld [vmem:[%s8126_s1 + $0x4d0] sm:$0xff]  }
  0x61   :  { %5647 = vmatpush3.bf16.msra.mxu1 %v6258_v52  ;;  %v6313_v52 = vld [vmem:[%s8126_s1 + $0x450] sm:$0xff]  }
  0x62   :  { %3943 = vmatmul.mubr.bf16.vlgmr.msra.gmra.mxu0 %v966_v51  ;;  %5676 = vmatprep.subr.bf16.mxu1 %v6262_v58  ;;  %v6312_v51 = vld [vmem:[%s8126_s1 + $0x498] sm:$0xff]   ;;  %v6319_v58 = vld [vmem:[%s8126_s1 + $0x4c8] sm:$0xff]  }
  0x63   :  { %5655 = vmatpush3.bf16.msra.mxu0 %v6261_v57  ;;  %4022 = vmatprep.mubr.bf16.mxu0 %v991_v29  ;;  %v6318_v57 = vld [vmem:[%s8126_s1 + $0x408] sm:$0xff]   ;;  %v6349_v29 = vld [vmem:[%s8126_s1 + $0x590] sm:$0xff]  }
  0x64   :  { %3983 = vmatmul.mubr.bf16.vlgmr.msra.gmra.mxu1 %v973_v56  ;;  %5656 = vmatprep.subr.bf16.mxu0 %v6264_v61  ;;  %v6317_v56 = vld [vmem:[%s8126_s1 + $0x448] sm:$0xff]   ;;  %v6322_v61 = vld [vmem:[%s8126_s1 + $0x400] sm:$0xff]  }
  0x65   :  { %5677 = vmatpush3.bf16.msra.mxu1 %v6263_v60  ;;  %4062 = vmatprep.mubr.bf16.mxu1 %v992_v33  ;;  %v6321_v60 = vld [vmem:[%s8126_s1 + $0x440] sm:$0xff]   ;;  %v6353_v33 = vld [vmem:[%s8126_s1 + $0x588] sm:$0xff]  }
  0x66   :  { %5678 = vmatprep.subr.bf16.mxu1 %v6266_v63  ;;  %v46_v63 = vld [vmem:[%s8127_s0 + $0x20] sm:$0xff] }
  0x67   :  { %5657 = vmatpush3.bf16.msra.mxu0 %v6265_v62  ;;  %v6323_v62 = vld [vmem:[%s8126_s1 + $0x4c0] sm:$0xff]  }
  0x68   :  { %5658 = vmatprep.subr.bf16.mxu0 %v6268_v1  ;;  %v6324_v1 = vld [vmem:[%s8126_s1 + $0x480] sm:$0xff]  }
  0x69   :  { %5679 = vmatpush3.bf16.msra.mxu1 %v6267_v0  ;;  %v1000_v0 = vrot.slane %v46_v63, %v6771_v34 }
  0x6a   :  { %5680 = vmatprep.subr.bf16.mxu1 %v6270_v3  ;;  %v6325_v3 = vld [vmem:[%s8126_s1 + $0x578] sm:$0xff]  }
  0x6b   :  { %5659 = vmatpush3.bf16.msra.mxu0 %v6269_v2  ;;  %v993_v2 = vcombine.high %v46_v63, %v46_v63  ;;  %v6377_v63 = vld [vmem:[%s8126_s1 + $0x6d8] sm:$0xff]  }
  0x6c   :  { %5660 = vmatprep.subr.bf16.mxu0 %v6272_v5 }
  0x6d   :  { %5681 = vmatpush3.bf16.msra.mxu1 %v6271_v4  ;;  %v1008_v4 = vcombine.high %v1000_v0, %v1000_v0  ;;  %v1007_v5 = vrot.slane %v993_v2, %v6771_v34  ;;  %v6380_v2 = vld [vmem:[%s8126_s1 + $0x610] sm:$0xff]  }
  0x6e   :  { %5682 = vmatprep.subr.bf16.mxu1 %v6274_v7  ;;  %v6328_v7 = vld [vmem:[%s8126_s1 + $0x5f8] sm:$0xff]  }
  0x6f   :  { %5661 = vmatpush3.bf16.msra.mxu0 %v6273_v6  ;;  %v6327_v6 = vld [vmem:[%s8126_s1 + $0x538] sm:$0xff]  }
  0x70   :  { %5662 = vmatprep.subr.bf16.mxu0 %v6276_v9  ;;  %v6329_v9 = vld [vmem:[%s8126_s1 + $0x5b8] sm:$0xff]  }
  0x71   :  { %5683 = vmatpush3.bf16.msra.mxu1 %v6275_v8  ;;  %v1009_v8 = vcombine.high %v1007_v5, %v1007_v5 }
  0x72   :  { %5684 = vmatprep.subr.bf16.mxu1 %v6278_v11  ;;  %v6331_v11 = vld [vmem:[%s8126_s1 + $0x530] sm:$0xff]  }
  0x73   :  { %5663 = vmatpush3.bf16.msra.mxu0 %v6277_v10  ;;  %v6330_v10 = vld [vmem:[%s8126_s1 + $0x570] sm:$0xff]  }
  0x74   :  { %5664 = vmatprep.subr.bf16.mxu0 %v6280_v13  ;;  %v6333_v13 = vld [vmem:[%s8126_s1 + $0x5b0] sm:$0xff]  }
  0x75   :  { %5685 = vmatpush3.bf16.msra.mxu1 %v6279_v12  ;;  %v6332_v12 = vld [vmem:[%s8126_s1 + $0x5f0] sm:$0xff]  }
  0x76   :  { %5686 = vmatprep.subr.bf16.mxu1 %v6282_v15  ;;  %v6335_v15 = vld [vmem:[%s8126_s1 + $0x528] sm:$0xff]  }
  0x77   :  { %5665 = vmatpush3.bf16.msra.mxu0 %v6281_v14  ;;  %v6334_v14 = vld [vmem:[%s8126_s1 + $0x568] sm:$0xff]  }
  0x78   :  { %5666 = vmatprep.subr.bf16.mxu0 %v6284_v17  ;;  %v6337_v17 = vld [vmem:[%s8126_s1 + $0x5a8] sm:$0xff]  }
  0x79   :  { %5687 = vmatpush3.bf16.msra.mxu1 %v6283_v16  ;;  %v6336_v16 = vld [vmem:[%s8126_s1 + $0x5e8] sm:$0xff]  }
  0x7a   :  { %5688 = vmatprep.subr.bf16.mxu1 %v6286_v19  ;;  %v6339_v19 = vld [vmem:[%s8126_s1 + $0x520] sm:$0xff]  }
  0x7b   :  { %5667 = vmatpush3.bf16.msra.mxu0 %v6285_v18  ;;  %v6338_v18 = vld [vmem:[%s8126_s1 + $0x560] sm:$0xff]  }
  0x7c   :  { %5668 = vmatprep.subr.bf16.mxu0 %v6288_v21  ;;  %v6341_v21 = vld [vmem:[%s8126_s1 + $0x5a0] sm:$0xff]  }
  0x7d   :  { %5689 = vmatpush3.bf16.msra.mxu1 %v6287_v20  ;;  %v6340_v20 = vld [vmem:[%s8126_s1 + $0x5e0] sm:$0xff]  }
  0x7e   :  { %5690 = vmatprep.subr.bf16.mxu1 %v6290_v23  ;;  %v6343_v23 = vld [vmem:[%s8126_s1 + $0x518] sm:$0xff]  }
  0x7f   :  { %5669 = vmatpush3.bf16.msra.mxu0 %v6289_v22  ;;  %v6342_v22 = vld [vmem:[%s8126_s1 + $0x558] sm:$0xff]  }
  0x80   :  { %5698 = vmatprep.subr.bf16.mxu0 %v6292_v28  ;;  %v6348_v28 = vld [vmem:[%s8126_s1 + $0x5d0] sm:$0xff]  }
  0x81   :  { %5691 = vmatpush3.bf16.msra.mxu1 %v6291_v26  ;;  %v6346_v26 = vld [vmem:[%s8126_s1 + $0x550] sm:$0xff]  }
  0x82   :  { %4023 = vmatmul.mubr.bf16.vlgmr.msra.gmra.mxu0 %v983_v25  ;;  %5720 = vmatprep.subr.bf16.mxu1 %v6295_v32  ;;  %v6345_v25 = vld [vmem:[%s8126_s1 + $0x598] sm:$0xff]   ;;  %v6352_v32 = vld [vmem:[%s8126_s1 + $0x5c8] sm:$0xff]  }
  0x83   :  { %5699 = vmatpush3.bf16.msra.mxu0 %v6294_v31  ;;  %4102 = vmatprep.mubr.bf16.mxu0 %v1008_v4  ;;  %v6351_v31 = vld [vmem:[%s8126_s1 + $0x508] sm:$0xff]   ;;  %v6382_v4 = vld [vmem:[%s8126_s1 + $0x690] sm:$0xff]  }
  0x84   :  { %4063 = vmatmul.mubr.bf16.vlgmr.msra.gmra.mxu1 %v990_v30  ;;  %5700 = vmatprep.subr.bf16.mxu0 %v6297_v36  ;;  %v6350_v30 = vld [vmem:[%s8126_s1 + $0x548] sm:$0xff]   ;;  %v6355_v36 = vld [vmem:[%s8126_s1 + $0x500] sm:$0xff]  }
  0x85   :  { %5721 = vmatpush3.bf16.msra.mxu1 %v6296_v35  ;;  %4142 = vmatprep.mubr.bf16.mxu1 %v1009_v8  ;;  %v6354_v35 = vld [vmem:[%s8126_s1 + $0x540] sm:$0xff]   ;;  %v6386_v8 = vld [vmem:[%s8126_s1 + $0x688] sm:$0xff]  }
  0x86   :  { %5722 = vmatprep.subr.bf16.mxu1 %v6299_v38  ;;  %v47_v38 = vld [vmem:[%s8127_s0 + $0x28] sm:$0xff] }
  0x87   :  { %5701 = vmatpush3.bf16.msra.mxu0 %v6298_v37  ;;  %v6356_v37 = vld [vmem:[%s8126_s1 + $0x5c0] sm:$0xff]  }
  0x88   :  { %5702 = vmatprep.subr.bf16.mxu0 %v6301_v40  ;;  %v6357_v40 = vld [vmem:[%s8126_s1 + $0x580] sm:$0xff]  }
  0x89   :  { %5723 = vmatpush3.bf16.msra.mxu1 %v6300_v39  ;;  %v1017_v39 = vrot.slane %v47_v38, %v6771_v34 }
  0x8a   :  { %5724 = vmatprep.subr.bf16.mxu1 %v6303_v42  ;;  %v6358_v42 = vld [vmem:[%s8126_s1 + $0x678] sm:$0xff]  }
  0x8b   :  { %5703 = vmatpush3.bf16.msra.mxu0 %v6302_v41  ;;  %v1010_v41 = vcombine.high %v47_v38, %v47_v38  ;;  %v6400_v38 = vld [vmem:[%s8126_s1 + $0x768] sm:$0xff]  }
  0x8c   :  { %5704 = vmatprep.subr.bf16.mxu0 %v6305_v44 }
  0x8d   :  { %5725 = vmatpush3.bf16.msra.mxu1 %v6304_v43  ;;  %v1025_v43 = vcombine.high %v1017_v39, %v1017_v39  ;;  %v1024_v44 = vrot.slane %v1010_v41, %v6771_v34  ;;  %v6401_v41 = vld [vmem:[%s8126_s1 + $0x728] sm:$0xff]  }
  0x8e   :  { %5726 = vmatprep.subr.bf16.mxu1 %v6307_v46  ;;  %v6361_v46 = vld [vmem:[%s8126_s1 + $0x6f8] sm:$0xff]  }
  0x8f   :  { %5705 = vmatpush3.bf16.msra.mxu0 %v6306_v45  ;;  %v6360_v45 = vld [vmem:[%s8126_s1 + $0x638] sm:$0xff]  }
  0x90   :  { %5706 = vmatprep.subr.bf16.mxu0 %v6309_v48  ;;  %v6362_v48 = vld [vmem:[%s8126_s1 + $0x6b8] sm:$0xff]  }
  0x91   :  { %5727 = vmatpush3.bf16.msra.mxu1 %v6308_v47  ;;  %v1026_v47 = vcombine.high %v1024_v44, %v1024_v44 }
  0x92   :  { %5728 = vmatprep.subr.bf16.mxu1 %v6311_v50  ;;  %v6364_v50 = vld [vmem:[%s8126_s1 + $0x630] sm:$0xff]  }
  0x93   :  { %5707 = vmatpush3.bf16.msra.mxu0 %v6310_v49  ;;  %v6363_v49 = vld [vmem:[%s8126_s1 + $0x670] sm:$0xff]  }
  0x94   :  { %5708 = vmatprep.subr.bf16.mxu0 %v6313_v52  ;;  %v6366_v52 = vld [vmem:[%s8126_s1 + $0x6b0] sm:$0xff]  }
  0x95   :  { %5729 = vmatpush3.bf16.msra.mxu1 %v6312_v51  ;;  %v6365_v51 = vld [vmem:[%s8126_s1 + $0x6f0] sm:$0xff]  }
  0x96   :  { %5730 = vmatprep.subr.bf16.mxu1 %v6315_v54  ;;  %v6368_v54 = vld [vmem:[%s8126_s1 + $0x628] sm:$0xff]  }
  0x97   :  { %5709 = vmatpush3.bf16.msra.mxu0 %v6314_v53  ;;  %v6367_v53 = vld [vmem:[%s8126_s1 + $0x668] sm:$0xff]  }
  0x98   :  { %5710 = vmatprep.subr.bf16.mxu0 %v6317_v56  ;;  %v6370_v56 = vld [vmem:[%s8126_s1 + $0x6a8] sm:$0xff]  }
  0x99   :  { %5731 = vmatpush3.bf16.msra.mxu1 %v6316_v55  ;;  %v6369_v55 = vld [vmem:[%s8126_s1 + $0x6e8] sm:$0xff]  }
  0x9a   :  { %5732 = vmatprep.subr.bf16.mxu1 %v6319_v58  ;;  %v6372_v58 = vld [vmem:[%s8126_s1 + $0x620] sm:$0xff]  }
  0x9b   :  { %5711 = vmatpush3.bf16.msra.mxu0 %v6318_v57  ;;  %v6371_v57 = vld [vmem:[%s8126_s1 + $0x660] sm:$0xff]  }
  0x9c   :  { %5712 = vmatprep.subr.bf16.mxu0 %v6321_v60  ;;  %v6374_v60 = vld [vmem:[%s8126_s1 + $0x6a0] sm:$0xff]  }
  0x9d   :  { %5733 = vmatpush3.bf16.msra.mxu1 %v6320_v59  ;;  %v6373_v59 = vld [vmem:[%s8126_s1 + $0x6e0] sm:$0xff]  }
  0x9e   :  { %5734 = vmatprep.subr.bf16.mxu1 %v6323_v62  ;;  %v6376_v62 = vld [vmem:[%s8126_s1 + $0x618] sm:$0xff]  }
  0x9f   :  { %5713 = vmatpush3.bf16.msra.mxu0 %v6322_v61  ;;  %v6375_v61 = vld [vmem:[%s8126_s1 + $0x658] sm:$0xff]  }
  0xa0   :  { %5742 = vmatprep.subr.bf16.mxu0 %v6325_v3  ;;  %v6381_v3 = vld [vmem:[%s8126_s1 + $0x6d0] sm:$0xff]  }
  0xa1   :  { %5735 = vmatpush3.bf16.msra.mxu1 %v6324_v1  ;;  %v6379_v1 = vld [vmem:[%s8126_s1 + $0x650] sm:$0xff]  }
  0xa2   :  { %4103 = vmatmul.mubr.bf16.vlgmr.msra.gmra.mxu0 %v1000_v0  ;;  %5764 = vmatprep.subr.bf16.mxu1 %v6328_v7  ;;  %v6378_v0 = vld [vmem:[%s8126_s1 + $0x698] sm:$0xff]   ;;  %v6385_v7 = vld [vmem:[%s8126_s1 + $0x6c8] sm:$0xff]  }
  0xa3   :  { %5743 = vmatpush3.bf16.msra.mxu0 %v6327_v6  ;;  %4182 = vmatprep.mubr.bf16.mxu0 %v1025_v43  ;;  %v6384_v6 = vld [vmem:[%s8126_s1 + $0x608] sm:$0xff]  }
  0xa4   :  { %4143 = vmatmul.mubr.bf16.vlgmr.msra.gmra.mxu1 %v1007_v5  ;;  %5744 = vmatprep.subr.bf16.mxu0 %v6330_v10  ;;  %v6383_v5 = vld [vmem:[%s8126_s1 + $0x648] sm:$0xff]   ;;  %v6388_v10 = vld [vmem:[%s8126_s1 + $0x600] sm:$0xff]  }
  0xa5   :  { %5765 = vmatpush3.bf16.msra.mxu1 %v6329_v9  ;;  %4222 = vmatprep.mubr.bf16.mxu1 %v1026_v47  ;;  %v6387_v9 = vld [vmem:[%s8126_s1 + $0x640] sm:$0xff]  }
  0xa6   :  { %5766 = vmatprep.subr.bf16.mxu1 %v6332_v12  ;;  %v48_v12 = vld [vmem:[%s8127_s0 + $0x30] sm:$0xff]  ;;  %v6406_v47 = vld [vmem:[%s8126_s1 + $0x7e0] sm:$0xff]  }
  0xa7   :  { %5745 = vmatpush3.bf16.msra.mxu0 %v6331_v11  ;;  %v6389_v11 = vld [vmem:[%s8126_s1 + $0x6c0] sm:$0xff]  }
  0xa8   :  { %5746 = vmatprep.subr.bf16.mxu0 %v6334_v14  ;;  %v6390_v14 = vld [vmem:[%s8126_s1 + $0x680] sm:$0xff]  }
  0xa9   :  { %5767 = vmatpush3.bf16.msra.mxu1 %v6333_v13  ;;  %v1034_v13 = vrot.slane %v48_v12, %v6771_v34 }
  0xaa   :  { %5768 = vmatprep.subr.bf16.mxu1 %v6336_v16  ;;  %v6391_v16 = vld [vmem:[%s8126_s1 + $0x778] sm:$0xff]  }
  0xab   :  { %5747 = vmatpush3.bf16.msra.mxu0 %v6335_v15  ;;  %v1027_v15 = vcombine.high %v48_v12, %v48_v12 }
  0xac   :  { %5748 = vmatprep.subr.bf16.mxu0 %v6338_v18 }
  0xad   :  { %5769 = vmatpush3.bf16.msra.mxu1 %v6337_v17  ;;  %v1042_v17 = vcombine.high %v1034_v13, %v1034_v13  ;;  %v1041_v18 = vrot.slane %v1027_v15, %v6771_v34 }
  0xae   :  { %5770 = vmatprep.subr.bf16.mxu1 %v6340_v20 }
  0xaf   :  { %5749 = vmatpush3.bf16.msra.mxu0 %v6339_v19  ;;  %v6393_v19 = vld [vmem:[%s8126_s1 + $0x738] sm:$0xff]  }
  0xb0   :  { %5750 = vmatprep.subr.bf16.mxu0 %v6342_v22  ;;  %v6394_v22 = vld [vmem:[%s8126_s1 + $0x7f8] sm:$0xff]  }
  0xb1   :  { %5771 = vmatpush3.bf16.msra.mxu1 %v6341_v21  ;;  %v5090_v21 = vld [vmem:[%s8128_s2] ss:$0 sm:$0xff] }
  0xb2   :  { %5772 = vmatprep.subr.bf16.mxu1 %v6344_v24  ;;  %v6395_v24 = vld [vmem:[%s8126_s1 + $0x7b8] sm:$0xff]  }
  0xb3   :  { %5751 = vmatpush3.bf16.msra.mxu0 %v6343_v23  ;;  %v1043_v23 = vcombine.high %v1041_v18, %v1041_v18 }
  0xb4   :  { %5752 = vmatprep.subr.bf16.mxu0 %v6346_v26 }
  0xb5   :  { %5773 = vmatpush3.bf16.msra.mxu1 %v6345_v25 }
  0xb6   :  { %5774 = vmatprep.subr.bf16.mxu1 %v6348_v28 }
  0xb7   :  { %5753 = vmatpush3.bf16.msra.mxu0 %v6347_v27  ;;  %v6396_v27 = vld [vmem:[%s8126_s1 + $0x770] sm:$0xff]  }
  0xb8   :  { %5754 = vmatprep.subr.bf16.mxu0 %v6350_v30 }
  0xb9   :  { %5775 = vmatpush3.bf16.msra.mxu1 %v6349_v29  ;;  %v6397_v29 = vld [vmem:[%s8126_s1 + $0x730] sm:$0xff]  }
  0xba   :  { %5776 = vmatprep.subr.bf16.mxu1 %v6352_v32  ;;  %v6398_v32 = vld [vmem:[%s8126_s1 + $0x7f0] sm:$0xff]  }
  0xbb   :  { %5755 = vmatpush3.bf16.msra.mxu0 %v6351_v31 }
  0xbc   :  { %5756 = vmatprep.subr.bf16.mxu0 %v6354_v35 }
  0xbd   :  { %5777 = vmatpush3.bf16.msra.mxu1 %v6353_v33 }
  0xbe   :  { %5778 = vmatprep.subr.bf16.mxu1 %v6356_v37 }
  0xbf   :  { %5757 = vmatpush3.bf16.msra.mxu0 %v6355_v36  ;;  %v6399_v36 = vld [vmem:[%s8126_s1 + $0x7b0] sm:$0xff]  }
  0xc0   :  { %5786 = vmatprep.subr.bf16.mxu0 %v6358_v42  ;;  %v6402_v42 = vld [vmem:[%s8126_s1 + $0x7e8] sm:$0xff]  }
  0xc1   :  { %5779 = vmatpush3.bf16.msra.mxu1 %v6357_v40 }
  0xc2   :  { %4183 = vmatmul.mubr.bf16.vlgmr.msra.gmra.mxu0 %v1017_v39  ;;  %5808 = vmatprep.subr.bf16.mxu1 %v6361_v46  ;;  %v6405_v46 = vld [vmem:[%s8126_s1 + $0x720] sm:$0xff]  }
  0xc3   :  { %5787 = vmatpush3.bf16.msra.mxu0 %v6360_v45  ;;  %4262 = vmatprep.mubr.bf16.mxu0 %v1042_v17  ;;  %v6404_v45 = vld [vmem:[%s8126_s1 + $0x760] sm:$0xff]  }
  0xc4   :  { %4223 = vmatmul.mubr.bf16.vlgmr.msra.gmra.mxu1 %v1024_v44  ;;  %5788 = vmatprep.subr.bf16.mxu0 %v6363_v49  ;;  %v6403_v44 = vld [vmem:[%s8126_s1 + $0x7a8] sm:$0xff]   ;;  %v6408_v49 = vld [vmem:[%s8126_s1 + $0x758] sm:$0xff]  }
  0xc5   :  { %5809 = vmatpush3.bf16.msra.mxu1 %v6362_v48  ;;  %4302 = vmatprep.mubr.bf16.mxu1 %v1043_v23  ;;  %v6407_v48 = vld [vmem:[%s8126_s1 + $0x7a0] sm:$0xff]  }
  0xc6   :  { %5810 = vmatprep.subr.bf16.mxu1 %v6365_v51  ;;  %v6410_v51 = vld [vmem:[%s8126_s1 + $0x7d8] sm:$0xff]  }
  0xc7   :  { %5789 = vmatpush3.bf16.msra.mxu0 %v6364_v50  ;;  %v6409_v50 = vld [vmem:[%s8126_s1 + $0x718] sm:$0xff]  }
  0xc8   :  { %5790 = vmatprep.subr.bf16.mxu0 %v6367_v53  ;;  %v6412_v53 = vld [vmem:[%s8126_s1 + $0x750] sm:$0xff]  }
  0xc9   :  { %5811 = vmatpush3.bf16.msra.mxu1 %v6366_v52  ;;  %v6411_v52 = vld [vmem:[%s8126_s1 + $0x798] sm:$0xff]  }
  0xca   :  { %5812 = vmatprep.subr.bf16.mxu1 %v6369_v55  ;;  %v6414_v55 = vld [vmem:[%s8126_s1 + $0x7d0] sm:$0xff]  }
  0xcb   :  { %5791 = vmatpush3.bf16.msra.mxu0 %v6368_v54  ;;  %v6413_v54 = vld [vmem:[%s8126_s1 + $0x710] sm:$0xff]  }
  0xcc   :  { %5792 = vmatprep.subr.bf16.mxu0 %v6371_v57  ;;  %v6416_v57 = vld [vmem:[%s8126_s1 + $0x748] sm:$0xff]  }
  0xcd   :  { %5813 = vmatpush3.bf16.msra.mxu1 %v6370_v56  ;;  %v6415_v56 = vld [vmem:[%s8126_s1 + $0x790] sm:$0xff]  }
  0xce   :  { %5814 = vmatprep.subr.bf16.mxu1 %v6373_v59  ;;  %v6418_v59 = vld [vmem:[%s8126_s1 + $0x7c8] sm:$0xff]  }
  0xcf   :  { %5793 = vmatpush3.bf16.msra.mxu0 %v6372_v58  ;;  %v6417_v58 = vld [vmem:[%s8126_s1 + $0x708] sm:$0xff]  }
  0xd0   :  { %5794 = vmatprep.subr.bf16.mxu0 %v6375_v61  ;;  %v6420_v61 = vld [vmem:[%s8126_s1 + $0x740] sm:$0xff]  }
  0xd1   :  { %5815 = vmatpush3.bf16.msra.mxu1 %v6374_v60  ;;  %v6419_v60 = vld [vmem:[%s8126_s1 + $0x788] sm:$0xff]  }
  0xd2   :  { %5816 = vmatprep.subr.bf16.mxu1 %v6377_v63  ;;  %v6422_v63 = vld [vmem:[%s8126_s1 + $0x7c0] sm:$0xff]  }
  0xd3   :  { %5795 = vmatpush3.bf16.msra.mxu0 %v6376_v62  ;;  %v6421_v62 = vld [vmem:[%s8126_s1 + $0x700] sm:$0xff]  }
  0xd4   :  { %5796 = vmatprep.subr.bf16.mxu0 %v6379_v1 }
  0xd5   :  { %5817 = vmatpush3.bf16.msra.mxu1 %v6378_v0  ;;  %v49_v0 = vld [vmem:[%s8127_s0 + $0x38] sm:$0xff] }
  0xd6   :  { %5818 = vmatprep.subr.bf16.mxu1 %v6381_v3  ;;  %v1051_v1 = vrot.slane %v49_v0, %v6771_v34  ;;  %v1044_v3 = vcombine.high %v49_v0, %v49_v0  ;;  %v6461_v0 = vld [vmem:[%s8126_s1 + $0x9b8] sm:$0xff]  }
  0xd7   :  { %5797 = vmatpush3.bf16.msra.mxu0 %v6380_v2  ;;  %v6423_v2 = vld [vmem:[%s8126_s1 + $0x780] sm:$0xff]  }
  0xd8   :  { %5798 = vmatprep.subr.bf16.mxu0 %v6383_v5  ;;  %v1059_v5 = vcombine.high %v1051_v1, %v1051_v1 }
  0xd9   :  { %5819 = vmatpush3.bf16.msra.mxu1 %v6382_v4  ;;  %v6424_v4 = vld [vmem:[%s8126_s1 + $0x878] sm:$0xff]  }
  0xda   :  { %5820 = vmatprep.subr.bf16.mxu1 %v6385_v7  ;;  %v6426_v7 = vld [vmem:[%s8126_s1 + $0x838] sm:$0xff]  }
  0xdb   :  { %5799 = vmatpush3.bf16.msra.mxu0 %v6384_v6  ;;  %v1058_v6 = vrot.slane %v1044_v3, %v6771_v34 }
  0xdc   :  { %5800 = vmatprep.subr.bf16.mxu0 %v6387_v9  ;;  %v6427_v9 = vld [vmem:[%s8126_s1 + $0x8f8] sm:$0xff]  }
  0xdd   :  { %5821 = vmatpush3.bf16.msra.mxu1 %v6386_v8 }
  0xde   :  { %5822 = vmatprep.subr.bf16.mxu1 %v6389_v11  ;;  %v6428_v11 = vld [vmem:[%s8126_s1 + $0x8b8] sm:$0xff]  }
  0xdf   :  { %5801 = vmatpush3.bf16.msra.mxu0 %v6388_v10  ;;  %v1060_v10 = vcombine.high %v1058_v6, %v1058_v6 }
  0xe0   :  { %5830 = vmatprep.subr.bf16.mxu0 %v6391_v16  ;;  %v6430_v16 = vld [vmem:[%s8126_s1 + $0x830] sm:$0xff]  }
  0xe1   :  { %5823 = vmatpush3.bf16.msra.mxu1 %v6390_v14  ;;  %v6429_v14 = vld [vmem:[%s8126_s1 + $0x870] sm:$0xff]  }
  0xe2   :  { %v5538_v20 = vpop.f32.mrf.mxu0  ;;  %4263 = vmatmul.mubr.bf16.vlgmr.msra.gmra.mxu0 %v1034_v13  ;;  %5852 = vmatprep.subr.bf16.mxu1 %v6394_v22  ;;  %v6432_v22 = vld [vmem:[%s8126_s1 + $0x8b0] sm:$0xff]  }
  0xe3   :  { %5831 = vmatpush3.bf16.msra.mxu0 %v6393_v19  ;;  %4342 = vmatprep.mubr.bf16.mxu0 %v1059_v5  ;;  %v6431_v19 = vld [vmem:[%s8126_s1 + $0x8f0] sm:$0xff]  }
  0xe4   :  { %v5539_v25 = vpop.f32.mrf.mxu0  ;;  %v5560_v26 = vpop.f32.mrf.mxu1  ;;  %4303 = vmatmul.mubr.bf16.vlgmr.msra.gmra.mxu1 %v1041_v18  ;;  %5832 = vmatprep.subr.bf16.mxu0 %v6396_v27  ;;  %v6434_v27 = vld [vmem:[%s8126_s1 + $0x828] sm:$0xff]   ;;  %v6463_v5 = vld [vmem:[%s8126_s1 + $0x930] sm:$0xff]  }
  0xe5   :  { %v5540_v28 = vadd.f32 %v5539_v25, %v5538_v20  ;;  %5853 = vmatpush3.bf16.msra.mxu1 %v6395_v24  ;;  %4382 = vmatprep.mubr.bf16.mxu1 %v1060_v10  ;;  %v6433_v24 = vld [vmem:[%s8126_s1 + $0x868] sm:$0xff]   ;;  %v6465_v10 = vld [vmem:[%s8126_s1 + $0x9b0] sm:$0xff]  }
  0xe6   :  { %v5541_v30 = vpop.f32.mrf.mxu0  ;;  %v5561_v31 = vpop.f32.mrf.mxu1  ;;  %5854 = vmatprep.subr.bf16.mxu1 %v6398_v32  ;;  %v6438_v32 = vld [vmem:[%s8126_s1 + $0x820] sm:$0xff]  }
  0xe7   :  { %v3785_v33 = vadd.f32 %v5540_v28, %v5090_v21  ;;  %v5562_v35 = vadd.f32 %v5561_v31, %v5560_v26  ;;  %5833 = vmatpush3.bf16.msra.mxu0 %v6397_v29  ;;  %v6435_v28 = vld [vmem:[%s8126_s1 + $0x8e8] sm:$0xff]   ;;  %v6437_v31 = vld [vmem:[%s8126_s1 + $0x860] sm:$0xff]  }
  0xe8   :  { %v5542_v37 = vpop.f32.mrf.mxu0  ;;  %v5563_v39 = vpop.f32.mrf.mxu1  ;;  %5834 = vmatprep.subr.bf16.mxu0 %v6400_v38  ;;  %v6436_v30 = vld [vmem:[%s8126_s1 + $0x8a8] sm:$0xff]   ;;  %v6443_v38 = vld [vmem:[%s8126_s1 + $0x8d8] sm:$0xff]  }
  0xe9   :  { %v7423_v40 = vadd.f32 %v5562_v35, %v3785_v33  ;;  %5855 = vmatpush3.bf16.msra.mxu1 %v6399_v36  ;;  %v6439_v33 = vld [vmem:[%s8126_s1 + $0x8e0] sm:$0xff]   ;;  %v6441_v36 = vld [vmem:[%s8126_s1 + $0x858] sm:$0xff]  }
  0xea   :  { %v5564_v43 = vpop.f32.mrf.mxu1  ;;  %5856 = vmatprep.subr.bf16.mxu1 %v6402_v42  ;;  %v6440_v35 = vld [vmem:[%s8126_s1 + $0x8a0] sm:$0xff]   ;;  %v6442_v37 = vld [vmem:[%s8126_s1 + $0x818] sm:$0xff]   ;;  %v6447_v42 = vld [vmem:[%s8126_s1 + $0x8d0] sm:$0xff]  }
  0xeb   :  { %5835 = vmatpush3.bf16.msra.mxu0 %v6401_v41  ;;  %v6444_v39 = vld [vmem:[%s8126_s1 + $0x898] sm:$0xff]   ;;  %v6446_v41 = vld [vmem:[%s8126_s1 + $0x810] sm:$0xff]  }
  0xec   :  { %5836 = vmatprep.subr.bf16.mxu0 %v6404_v45  ;;  %v6448_v43 = vld [vmem:[%s8126_s1 + $0x890] sm:$0xff]   ;;  %v6450_v45 = vld [vmem:[%s8126_s1 + $0x808] sm:$0xff]  }
  0xed   :  { %5857 = vmatpush3.bf16.msra.mxu1 %v6403_v44  ;;  %v6449_v44 = vld [vmem:[%s8126_s1 + $0x848] sm:$0xff]  }
  0xee   :  { %5858 = vmatprep.subr.bf16.mxu1 %v6406_v47  ;;  %v6452_v47 = vld [vmem:[%s8126_s1 + $0x888] sm:$0xff]  }
  0xef   :  { %5837 = vmatpush3.bf16.msra.mxu0 %v6405_v46  ;;  %v6451_v46 = vld [vmem:[%s8126_s1 + $0x8c8] sm:$0xff]  }
  0xf0   :  { %5838 = vmatprep.subr.bf16.mxu0 %v6408_v49  ;;  %v6454_v49 = vld [vmem:[%s8126_s1 + $0x800] sm:$0xff]  }
  0xf1   :  { %5859 = vmatpush3.bf16.msra.mxu1 %v6407_v48  ;;  %v6453_v48 = vld [vmem:[%s8126_s1 + $0x840] sm:$0xff]  }
  0xf2   :  { %5860 = vmatprep.subr.bf16.mxu1 %v6410_v51  ;;  %v50_v51 = vld [vmem:[%s8127_s0 + $0x40] sm:$0xff] }
  0xf3   :  { %5839 = vmatpush3.bf16.msra.mxu0 %v6409_v50  ;;  %v6455_v50 = vld [vmem:[%s8126_s1 + $0x8c0] sm:$0xff]  }
  0xf4   :  { %5840 = vmatprep.subr.bf16.mxu0 %v6412_v53  ;;  %v6456_v53 = vld [vmem:[%s8126_s1 + $0x880] sm:$0xff]  }
  0xf5   :  { %5861 = vmatpush3.bf16.msra.mxu1 %v6411_v52  ;;  %v1068_v52 = vrot.slane %v50_v51, %v6771_v34 }
  0xf6   :  { %5862 = vmatprep.subr.bf16.mxu1 %v6414_v55  ;;  %v6457_v55 = vld [vmem:[%s8126_s1 + $0x978] sm:$0xff]  }
  0xf7   :  { %5841 = vmatpush3.bf16.msra.mxu0 %v6413_v54  ;;  %v1061_v54 = vcombine.high %v50_v51, %v50_v51 }
  0xf8   :  { %5842 = vmatprep.subr.bf16.mxu0 %v6416_v57 }
  0xf9   :  { %5863 = vmatpush3.bf16.msra.mxu1 %v6415_v56  ;;  %v1076_v56 = vcombine.high %v1068_v52, %v1068_v52 }
  0xfa   :  { %5864 = vmatprep.subr.bf16.mxu1 %v6418_v59  ;;  %v6459_v59 = vld [vmem:[%s8126_s1 + $0x938] sm:$0xff]  }
  0xfb   :  { %5843 = vmatpush3.bf16.msra.mxu0 %v6417_v58  ;;  %v1075_v58 = vrot.slane %v1061_v54, %v6771_v34  ;;  %v6496_v54 = vld [vmem:[%s8126_s1 + $0xa30] sm:$0xff]  }
  0xfc   :  { %5844 = vmatprep.subr.bf16.mxu0 %v6420_v61 }
  0xfd   :  { %5865 = vmatpush3.bf16.msra.mxu1 %v6419_v60  ;;  %v6460_v60 = vld [vmem:[%s8126_s1 + $0x9f8] sm:$0xff]   ;;  %v1077_v61 = vcombine.high %v1075_v58, %v1075_v58 }
  0xfe   :  { %5866 = vmatprep.subr.bf16.mxu1 %v6422_v63 }
  0xff   :  { %5845 = vmatpush3.bf16.msra.mxu0 %v6421_v62 }
 0x100   :  { %5874 = vmatprep.subr.bf16.mxu0 %v6424_v4 }
 0x101   :  { %5867 = vmatpush3.bf16.msra.mxu1 %v6423_v2  ;;  %v6462_v2 = vld [vmem:[%s8126_s1 + $0x970] sm:$0xff]  }
 0x102   :  { %v5582_v8 = vpop.f32.mrf.mxu0  ;;  %4343 = vmatmul.mubr.bf16.vlgmr.msra.gmra.mxu0 %v1051_v1  ;;  %5896 = vmatprep.subr.bf16.mxu1 %v6427_v9 }
 0x103   :  { %5875 = vmatpush3.bf16.msra.mxu0 %v6426_v7  ;;  %4422 = vmatprep.mubr.bf16.mxu0 %v1076_v56 }
 0x104   :  { %v5583_v12 = vpop.f32.mrf.mxu0  ;;  %v5604_v13 = vpop.f32.mrf.mxu1  ;;  %4383 = vmatmul.mubr.bf16.vlgmr.msra.gmra.mxu1 %v1058_v6  ;;  %5876 = vmatprep.subr.bf16.mxu0 %v6429_v14  ;;  %v6467_v14 = vld [vmem:[%s8126_s1 + $0x928] sm:$0xff]  }
 0x105   :  { %v5584_v15 = vadd.f32 %v5583_v12, %v5582_v8  ;;  %5897 = vmatpush3.bf16.msra.mxu1 %v6428_v11  ;;  %4462 = vmatprep.mubr.bf16.mxu1 %v1077_v61  ;;  %v6464_v8 = vld [vmem:[%s8126_s1 + $0x9f0] sm:$0xff]  }
 0x106   :  { %v5585_v17 = vpop.f32.mrf.mxu0  ;;  %v5605_v18 = vpop.f32.mrf.mxu1  ;;  %5898 = vmatprep.subr.bf16.mxu1 %v6431_v19  ;;  %v6471_v19 = vld [vmem:[%s8126_s1 + $0x920] sm:$0xff]  }
 0x107   :  { %v3865_v20 = vadd.f32 %v5584_v15, %v7423_v40  ;;  %v5606_v21 = vadd.f32 %v5605_v18, %v5604_v13  ;;  %5877 = vmatpush3.bf16.msra.mxu0 %v6430_v16  ;;  %v6445_v40 = vld [vmem:[%s8126_s1 + $0x850] sm:$0xff]   ;;  %v6466_v13 = vld [vmem:[%s8126_s1 + $0x968] sm:$0xff]   ;;  %v6470_v18 = vld [vmem:[%s8126_s1 + $0x960] sm:$0xff]  }
 0x108   :  { %v5586_v23 = vpop.f32.mrf.mxu0  ;;  %v5607_v25 = vpop.f32.mrf.mxu1  ;;  %5878 = vmatprep.subr.bf16.mxu0 %v6433_v24  ;;  %v6468_v16 = vld [vmem:[%s8126_s1 + $0x9e8] sm:$0xff]   ;;  %v6476_v24 = vld [vmem:[%s8126_s1 + $0x9d8] sm:$0xff]  }
 0x109   :  { %v7527_v26 = vadd.f32 %v5606_v21, %v3865_v20  ;;  %5899 = vmatpush3.bf16.msra.mxu1 %v6432_v22  ;;  %v6469_v17 = vld [vmem:[%s8126_s1 + $0x9a8] sm:$0xff]   ;;  %v6472_v20 = vld [vmem:[%s8126_s1 + $0x9e0] sm:$0xff]   ;;  %v6474_v22 = vld [vmem:[%s8126_s1 + $0x958] sm:$0xff]  }
 0x10a   :  { %v5608_v29 = vpop.f32.mrf.mxu1  ;;  %5900 = vmatprep.subr.bf16.mxu1 %v6435_v28  ;;  %v6473_v21 = vld [vmem:[%s8126_s1 + $0x9a0] sm:$0xff]   ;;  %v6475_v23 = vld [vmem:[%s8126_s1 + $0x918] sm:$0xff]   ;;  %v6480_v28 = vld [vmem:[%s8126_s1 + $0x9d0] sm:$0xff]  }
 0x10b   :  { %5879 = vmatpush3.bf16.msra.mxu0 %v6434_v27  ;;  %v6477_v25 = vld [vmem:[%s8126_s1 + $0x998] sm:$0xff]   ;;  %v6479_v27 = vld [vmem:[%s8126_s1 + $0x910] sm:$0xff]  }
 0x10c   :  { %5880 = vmatprep.subr.bf16.mxu0 %v6437_v31  ;;  %v6481_v29 = vld [vmem:[%s8126_s1 + $0x990] sm:$0xff]   ;;  %v6483_v31 = vld [vmem:[%s8126_s1 + $0x908] sm:$0xff]  }
 0x10d   :  { %5901 = vmatpush3.bf16.msra.mxu1 %v6436_v30  ;;  %v6482_v30 = vld [vmem:[%s8126_s1 + $0x948] sm:$0xff]  }
 0x10e   :  { %5902 = vmatprep.subr.bf16.mxu1 %v6439_v33  ;;  %v6485_v33 = vld [vmem:[%s8126_s1 + $0x988] sm:$0xff]  }
 0x10f   :  { %5881 = vmatpush3.bf16.msra.mxu0 %v6438_v32  ;;  %v6484_v32 = vld [vmem:[%s8126_s1 + $0x9c8] sm:$0xff]  }
 0x110   :  { %5882 = vmatprep.subr.bf16.mxu0 %v6441_v36  ;;  %v6487_v36 = vld [vmem:[%s8126_s1 + $0x900] sm:$0xff]  }
 0x111   :  { %5903 = vmatpush3.bf16.msra.mxu1 %v6440_v35  ;;  %v6486_v35 = vld [vmem:[%s8126_s1 + $0x940] sm:$0xff]  }
 0x112   :  { %5904 = vmatprep.subr.bf16.mxu1 %v6443_v38  ;;  %v51_v38 = vld [vmem:[%s8127_s0 + $0x48] sm:$0xff] }
 0x113   :  { %5883 = vmatpush3.bf16.msra.mxu0 %v6442_v37  ;;  %v6488_v37 = vld [vmem:[%s8126_s1 + $0x9c0] sm:$0xff]  }
 0x114   :  { %5884 = vmatprep.subr.bf16.mxu0 %v6445_v40  ;;  %v6489_v40 = vld [vmem:[%s8126_s1 + $0x980] sm:$0xff]  }
 0x115   :  { %5905 = vmatpush3.bf16.msra.mxu1 %v6444_v39  ;;  %v1085_v39 = vrot.slane %v51_v38, %v6771_v34 }
 0x116   :  { %5906 = vmatprep.subr.bf16.mxu1 %v6447_v42  ;;  %v6490_v42 = vld [vmem:[%s8126_s1 + $0xa78] sm:$0xff]  }
 0x117   :  { %5885 = vmatpush3.bf16.msra.mxu0 %v6446_v41  ;;  %v1078_v41 = vcombine.high %v51_v38, %v51_v38 }
 0x118   :  { %5886 = vmatprep.subr.bf16.mxu0 %v6449_v44 }
 0x119   :  { %5907 = vmatpush3.bf16.msra.mxu1 %v6448_v43  ;;  %v1093_v43 = vcombine.high %v1085_v39, %v1085_v39  ;;  %v1092_v44 = vrot.slane %v1078_v41, %v6771_v34  ;;  %v6529_v41 = vld [vmem:[%s8126_s1 + $0xb30] sm:$0xff]  }
 0x11a   :  { %5908 = vmatprep.subr.bf16.mxu1 %v6451_v46 }
 0x11b   :  { %5887 = vmatpush3.bf16.msra.mxu0 %v6450_v45  ;;  %v6492_v45 = vld [vmem:[%s8126_s1 + $0xa38] sm:$0xff]  }
 0x11c   :  { %5888 = vmatprep.subr.bf16.mxu0 %v6453_v48  ;;  %v1094_v48 = vcombine.high %v1092_v44, %v1092_v44 }
 0x11d   :  { %5909 = vmatpush3.bf16.msra.mxu1 %v6452_v47  ;;  %v6493_v47 = vld [vmem:[%s8126_s1 + $0xaf8] sm:$0xff]  }
 0x11e   :  { %5910 = vmatprep.subr.bf16.mxu1 %v6455_v50 }
 0x11f   :  { %5889 = vmatpush3.bf16.msra.mxu0 %v6454_v49  ;;  %v6494_v49 = vld [vmem:[%s8126_s1 + $0xab8] sm:$0xff]  }
 0x120   :  { %5918 = vmatprep.subr.bf16.mxu0 %v6457_v55 }
 0x121   :  { %5911 = vmatpush3.bf16.msra.mxu1 %v6456_v53 }
 0x122   :  { %v5626_v57 = vpop.f32.mrf.mxu0  ;;  %4423 = vmatmul.mubr.bf16.vlgmr.msra.gmra.mxu0 %v1068_v52  ;;  %5940 = vmatprep.subr.bf16.mxu1 %v6460_v60  ;;  %v6495_v52 = vld [vmem:[%s8126_s1 + $0xa70] sm:$0xff]  }
 0x123   :  { %5919 = vmatpush3.bf16.msra.mxu0 %v6459_v59  ;;  %4502 = vmatprep.mubr.bf16.mxu0 %v1093_v43  ;;  %v6498_v60 = vld [vmem:[%s8126_s1 + $0xab0] sm:$0xff]  }
 0x124   :  { %v5627_v62 = vpop.f32.mrf.mxu0  ;;  %v5648_v63 = vpop.f32.mrf.mxu1  ;;  %4463 = vmatmul.mubr.bf16.vlgmr.msra.gmra.mxu1 %v1075_v58  ;;  %5920 = vmatprep.subr.bf16.mxu0 %v6462_v2  ;;  %v6501_v2 = vld [vmem:[%s8126_s1 + $0xae8] sm:$0xff]  }
 0x125   :  { %v5628_v1 = vadd.f32 %v5627_v62, %v5626_v57  ;;  %5941 = vmatpush3.bf16.msra.mxu1 %v6461_v0  ;;  %4542 = vmatprep.mubr.bf16.mxu1 %v1094_v48  ;;  %v6497_v57 = vld [vmem:[%s8126_s1 + $0xaf0] sm:$0xff]   ;;  %v6499_v62 = vld [vmem:[%s8126_s1 + $0xa68] sm:$0xff]  }
 0x126   :  { %v5629_v3 = vpop.f32.mrf.mxu0  ;;  %v5649_v4 = vpop.f32.mrf.mxu1  ;;  %5942 = vmatprep.subr.bf16.mxu1 %v6464_v8  ;;  %v6506_v8 = vld [vmem:[%s8126_s1 + $0xaa0] sm:$0xff]  }
 0x127   :  { %v3945_v6 = vadd.f32 %v5628_v1, %v7527_v26  ;;  %v5650_v7 = vadd.f32 %v5649_v4, %v5648_v63  ;;  %5921 = vmatpush3.bf16.msra.mxu0 %v6463_v5  ;;  %v6478_v26 = vld [vmem:[%s8126_s1 + $0x950] sm:$0xff]   ;;  %v6500_v1 = vld [vmem:[%s8126_s1 + $0xa28] sm:$0xff]   ;;  %v6503_v5 = vld [vmem:[%s8126_s1 + $0xa60] sm:$0xff]  }
 0x128   :  { %v5630_v9 = vpop.f32.mrf.mxu0  ;;  %v5651_v11 = vpop.f32.mrf.mxu1  ;;  %5922 = vmatprep.subr.bf16.mxu0 %v6466_v13  ;;  %v6502_v4 = vld [vmem:[%s8126_s1 + $0xaa8] sm:$0xff]   ;;  %v6511_v13 = vld [vmem:[%s8126_s1 + $0xa50] sm:$0xff]  }
 0x129   :  { %v7628_v12 = vadd.f32 %v5650_v7, %v3945_v6  ;;  %5943 = vmatpush3.bf16.msra.mxu1 %v6465_v10  ;;  %v6504_v6 = vld [vmem:[%s8126_s1 + $0xa20] sm:$0xff]   ;;  %v6507_v9 = vld [vmem:[%s8126_s1 + $0xa58] sm:$0xff]  }
 0x12a   :  { %v5652_v15 = vpop.f32.mrf.mxu1  ;;  %5944 = vmatprep.subr.bf16.mxu1 %v6468_v16  ;;  %v6505_v7 = vld [vmem:[%s8126_s1 + $0xae0] sm:$0xff]   ;;  %v6508_v10 = vld [vmem:[%s8126_s1 + $0xa18] sm:$0xff]   ;;  %v6514_v16 = vld [vmem:[%s8126_s1 + $0xa90] sm:$0xff]  }
 0x12b   :  { %5923 = vmatpush3.bf16.msra.mxu0 %v6467_v14  ;;  %v6509_v11 = vld [vmem:[%s8126_s1 + $0xad8] sm:$0xff]   ;;  %v6512_v14 = vld [vmem:[%s8126_s1 + $0xa10] sm:$0xff]  }
 0x12c   :  { %5924 = vmatprep.subr.bf16.mxu0 %v6470_v18  ;;  %v6513_v15 = vld [vmem:[%s8126_s1 + $0xad0] sm:$0xff]   ;;  %v6516_v18 = vld [vmem:[%s8126_s1 + $0xa08] sm:$0xff]  }
 0x12d   :  { %5945 = vmatpush3.bf16.msra.mxu1 %v6469_v17  ;;  %v6515_v17 = vld [vmem:[%s8126_s1 + $0xa48] sm:$0xff]  }
 0x12e   :  { %5946 = vmatprep.subr.bf16.mxu1 %v6472_v20  ;;  %v6518_v20 = vld [vmem:[%s8126_s1 + $0xa88] sm:$0xff]  }
 0x12f   :  { %5925 = vmatpush3.bf16.msra.mxu0 %v6471_v19  ;;  %v6517_v19 = vld [vmem:[%s8126_s1 + $0xac8] sm:$0xff]  }
 0x130   :  { %5926 = vmatprep.subr.bf16.mxu0 %v6474_v22  ;;  %v6520_v22 = vld [vmem:[%s8126_s1 + $0xa00] sm:$0xff]  }
 0x131   :  { %5947 = vmatpush3.bf16.msra.mxu1 %v6473_v21  ;;  %v6519_v21 = vld [vmem:[%s8126_s1 + $0xa40] sm:$0xff]  }
 0x132   :  { %5948 = vmatprep.subr.bf16.mxu1 %v6476_v24  ;;  %v52_v24 = vld [vmem:[%s8127_s0 + $0x50] sm:$0xff] }
 0x133   :  { %5927 = vmatpush3.bf16.msra.mxu0 %v6475_v23  ;;  %v6521_v23 = vld [vmem:[%s8126_s1 + $0xac0] sm:$0xff]  }
 0x134   :  { %5928 = vmatprep.subr.bf16.mxu0 %v6478_v26  ;;  %v6522_v26 = vld [vmem:[%s8126_s1 + $0xa80] sm:$0xff]  }
 0x135   :  { %5949 = vmatpush3.bf16.msra.mxu1 %v6477_v25  ;;  %v1102_v25 = vrot.slane %v52_v24, %v6771_v34 }
 0x136   :  { %5950 = vmatprep.subr.bf16.mxu1 %v6480_v28  ;;  %v6523_v28 = vld [vmem:[%s8126_s1 + $0xb78] sm:$0xff]  }
 0x137   :  { %5929 = vmatpush3.bf16.msra.mxu0 %v6479_v27  ;;  %v1095_v27 = vcombine.high %v52_v24, %v52_v24  ;;  %v6560_v24 = vld [vmem:[%s8126_s1 + $0xcb8] sm:$0xff]  }
 0x138   :  { %5930 = vmatprep.subr.bf16.mxu0 %v6482_v30 }
 0x139   :  { %5951 = vmatpush3.bf16.msra.mxu1 %v6481_v29  ;;  %v1110_v29 = vcombine.high %v1102_v25, %v1102_v25  ;;  %v1109_v30 = vrot.slane %v1095_v27, %v6771_v34 }
 0x13a   :  { %5952 = vmatprep.subr.bf16.mxu1 %v6484_v32 }
 0x13b   :  { %5931 = vmatpush3.bf16.msra.mxu0 %v6483_v31  ;;  %v6525_v31 = vld [vmem:[%s8126_s1 + $0xb38] sm:$0xff]  }
 0x13c   :  { %5932 = vmatprep.subr.bf16.mxu0 %v6486_v35  ;;  %v1111_v35 = vcombine.high %v1109_v30, %v1109_v30 }
 0x13d   :  { %5953 = vmatpush3.bf16.msra.mxu1 %v6485_v33  ;;  %v6526_v33 = vld [vmem:[%s8126_s1 + $0xbf8] sm:$0xff]  }
 0x13e   :  { %5954 = vmatprep.subr.bf16.mxu1 %v6488_v37 }
 0x13f   :  { %5933 = vmatpush3.bf16.msra.mxu0 %v6487_v36  ;;  %v6527_v36 = vld [vmem:[%s8126_s1 + $0xbb8] sm:$0xff]  }
 0x140   :  { %5962 = vmatprep.subr.bf16.mxu0 %v6490_v42 }
 0x141   :  { %5955 = vmatpush3.bf16.msra.mxu1 %v6489_v40 }
 0x142   :  { %v5670_v46 = vpop.f32.mrf.mxu0  ;;  %4503 = vmatmul.mubr.bf16.vlgmr.msra.gmra.mxu0 %v1085_v39  ;;  %5984 = vmatprep.subr.bf16.mxu1 %v6493_v47  ;;  %v6528_v39 = vld [vmem:[%s8126_s1 + $0xb70] sm:$0xff]  }
 0x143   :  { %5963 = vmatpush3.bf16.msra.mxu0 %v6492_v45  ;;  %4582 = vmatprep.mubr.bf16.mxu0 %v1110_v29  ;;  %v6531_v47 = vld [vmem:[%s8126_s1 + $0xbb0] sm:$0xff]  }
 0x144   :  { %v5671_v50 = vpop.f32.mrf.mxu0  ;;  %v5692_v51 = vpop.f32.mrf.mxu1  ;;  %4543 = vmatmul.mubr.bf16.vlgmr.msra.gmra.mxu1 %v1092_v44  ;;  %5964 = vmatprep.subr.bf16.mxu0 %v6495_v52  ;;  %v6530_v44 = vld [vmem:[%s8126_s1 + $0xbf0] sm:$0xff]   ;;  %v6533_v52 = vld [vmem:[%s8126_s1 + $0xb28] sm:$0xff]  }
 0x145   :  { %v5672_v53 = vadd.f32 %v5671_v50, %v5670_v46  ;;  %5985 = vmatpush3.bf16.msra.mxu1 %v6494_v49  ;;  %4622 = vmatprep.mubr.bf16.mxu1 %v1111_v35  ;;  %v6532_v49 = vld [vmem:[%s8126_s1 + $0xb68] sm:$0xff]   ;;  %v6562_v29 = vld [vmem:[%s8126_s1 + $0xc30] sm:$0xff]  }
 0x146   :  { %v5673_v55 = vpop.f32.mrf.mxu0  ;;  %v5693_v56 = vpop.f32.mrf.mxu1  ;;  %5986 = vmatprep.subr.bf16.mxu1 %v6497_v57  ;;  %v6537_v57 = vld [vmem:[%s8126_s1 + $0xb20] sm:$0xff]   ;;  %v6564_v35 = vld [vmem:[%s8126_s1 + $0xcb0] sm:$0xff]  }
 0x147   :  { %v4025_v58 = vadd.f32 %v5672_v53, %v7628_v12  ;;  %v5694_v59 = vadd.f32 %v5693_v56, %v5692_v51  ;;  %5965 = vmatpush3.bf16.msra.mxu0 %v6496_v54  ;;  %v6510_v12 = vld [vmem:[%s8126_s1 + $0xa98] sm:$0xff]   ;;  %v6534_v53 = vld [vmem:[%s8126_s1 + $0xbe8] sm:$0xff]   ;;  %v6536_v56 = vld [vmem:[%s8126_s1 + $0xb60] sm:$0xff]  }
 0x148   :  { %v5674_v61 = vpop.f32.mrf.mxu0  ;;  %v5695_v63 = vpop.f32.mrf.mxu1  ;;  %5966 = vmatprep.subr.bf16.mxu0 %v6499_v62  ;;  %v6535_v55 = vld [vmem:[%s8126_s1 + $0xba8] sm:$0xff]   ;;  %v6542_v62 = vld [vmem:[%s8126_s1 + $0xbd8] sm:$0xff]  }
 0x149   :  { %v7735_v0 = vadd.f32 %v5694_v59, %v4025_v58  ;;  %5987 = vmatpush3.bf16.msra.mxu1 %v6498_v60  ;;  %v6538_v58 = vld [vmem:[%s8126_s1 + $0xbe0] sm:$0xff]   ;;  %v6540_v60 = vld [vmem:[%s8126_s1 + $0xb58] sm:$0xff]  }
 0x14a   :  { %v5696_v3 = vpop.f32.mrf.mxu1  ;;  %5988 = vmatprep.subr.bf16.mxu1 %v6501_v2  ;;  %v6539_v59 = vld [vmem:[%s8126_s1 + $0xba0] sm:$0xff]   ;;  %v6541_v61 = vld [vmem:[%s8126_s1 + $0xb18] sm:$0xff]   ;;  %v6546_v2 = vld [vmem:[%s8126_s1 + $0xbd0] sm:$0xff]  }
 0x14b   :  { %5967 = vmatpush3.bf16.msra.mxu0 %v6500_v1  ;;  %v6543_v63 = vld [vmem:[%s8126_s1 + $0xb98] sm:$0xff]   ;;  %v6545_v1 = vld [vmem:[%s8126_s1 + $0xb10] sm:$0xff]  }
 0x14c   :  { %5968 = vmatprep.subr.bf16.mxu0 %v6503_v5  ;;  %v6547_v3 = vld [vmem:[%s8126_s1 + $0xb90] sm:$0xff]   ;;  %v6549_v5 = vld [vmem:[%s8126_s1 + $0xb08] sm:$0xff]  }
 0x14d   :  { %5989 = vmatpush3.bf16.msra.mxu1 %v6502_v4  ;;  %v6548_v4 = vld [vmem:[%s8126_s1 + $0xb48] sm:$0xff]  }
 0x14e   :  { %5990 = vmatprep.subr.bf16.mxu1 %v6505_v7  ;;  %v6551_v7 = vld [vmem:[%s8126_s1 + $0xb88] sm:$0xff]  }
 0x14f   :  { %5969 = vmatpush3.bf16.msra.mxu0 %v6504_v6  ;;  %v6550_v6 = vld [vmem:[%s8126_s1 + $0xbc8] sm:$0xff]  }
 0x150   :  { %5970 = vmatprep.subr.bf16.mxu0 %v6507_v9  ;;  %v6553_v9 = vld [vmem:[%s8126_s1 + $0xb00] sm:$0xff]  }
 0x151   :  { %5991 = vmatpush3.bf16.msra.mxu1 %v6506_v8  ;;  %v6552_v8 = vld [vmem:[%s8126_s1 + $0xb40] sm:$0xff]  }
 0x152   :  { %5992 = vmatprep.subr.bf16.mxu1 %v6509_v11  ;;  %v53_v11 = vld [vmem:[%s8127_s0 + $0x58] sm:$0xff] }
 0x153   :  { %5971 = vmatpush3.bf16.msra.mxu0 %v6508_v10  ;;  %v6554_v10 = vld [vmem:[%s8126_s1 + $0xbc0] sm:$0xff]  }
 0x154   :  { %5972 = vmatprep.subr.bf16.mxu0 %v6511_v13  ;;  %v6555_v13 = vld [vmem:[%s8126_s1 + $0xb80] sm:$0xff]  }
 0x155   :  { %5993 = vmatpush3.bf16.msra.mxu1 %v6510_v12  ;;  %v1119_v12 = vrot.slane %v53_v11, %v6771_v34 }
 0x156   :  { %5994 = vmatprep.subr.bf16.mxu1 %v6513_v15  ;;  %v6556_v15 = vld [vmem:[%s8126_s1 + $0xc78] sm:$0xff]  }
 0x157   :  { %5973 = vmatpush3.bf16.msra.mxu0 %v6512_v14  ;;  %v1112_v14 = vcombine.high %v53_v11, %v53_v11 }
 0x158   :  { %5974 = vmatprep.subr.bf16.mxu0 %v6515_v17 }
 0x159   :  { %5995 = vmatpush3.bf16.msra.mxu1 %v6514_v16  ;;  %v1127_v16 = vcombine.high %v1119_v12, %v1119_v12 }
 0x15a   :  { %5996 = vmatprep.subr.bf16.mxu1 %v6517_v19  ;;  %v6558_v19 = vld [vmem:[%s8126_s1 + $0xc38] sm:$0xff]  }
 0x15b   :  { %5975 = vmatpush3.bf16.msra.mxu0 %v6516_v18  ;;  %v1126_v18 = vrot.slane %v1112_v14, %v6771_v34 }
 0x15c   :  { %5976 = vmatprep.subr.bf16.mxu0 %v6519_v21 }
 0x15d   :  { %5997 = vmatpush3.bf16.msra.mxu1 %v6518_v20  ;;  %v6559_v20 = vld [vmem:[%s8126_s1 + $0xcf8] sm:$0xff]   ;;  %v1128_v21 = vcombine.high %v1126_v18, %v1126_v18 }
 0x15e   :  { %5998 = vmatprep.subr.bf16.mxu1 %v6521_v23 }
 0x15f   :  { %5977 = vmatpush3.bf16.msra.mxu0 %v6520_v22 }
 0x160   :  { %6006 = vmatprep.subr.bf16.mxu0 %v6523_v28 }
 0x161   :  { %5999 = vmatpush3.bf16.msra.mxu1 %v6522_v26  ;;  %v6561_v26 = vld [vmem:[%s8126_s1 + $0xc70] sm:$0xff]  }
 0x162   :  { %v5714_v32 = vpop.f32.mrf.mxu0  ;;  %4583 = vmatmul.mubr.bf16.vlgmr.msra.gmra.mxu0 %v1102_v25  ;;  %6028 = vmatprep.subr.bf16.mxu1 %v6526_v33 }
 0x163   :  { %6007 = vmatpush3.bf16.msra.mxu0 %v6525_v31  ;;  %4662 = vmatprep.mubr.bf16.mxu0 %v1127_v16 }
 0x164   :  { %v5715_v37 = vpop.f32.mrf.mxu0  ;;  %v5736_v38 = vpop.f32.mrf.mxu1  ;;  %4623 = vmatmul.mubr.bf16.vlgmr.msra.gmra.mxu1 %v1109_v30  ;;  %6008 = vmatprep.subr.bf16.mxu0 %v6528_v39  ;;  %v6566_v39 = vld [vmem:[%s8126_s1 + $0xc28] sm:$0xff]  }
 0x165   :  { %v5716_v40 = vadd.f32 %v5715_v37, %v5714_v32  ;;  %6029 = vmatpush3.bf16.msra.mxu1 %v6527_v36  ;;  %4702 = vmatprep.mubr.bf16.mxu1 %v1128_v21  ;;  %v6563_v32 = vld [vmem:[%s8126_s1 + $0xcf0] sm:$0xff]   ;;  %v6594_v21 = vld [vmem:[%s8126_s1 + $0xd18] sm:$0xff]  }
 0x166   :  { %v5717_v42 = vpop.f32.mrf.mxu0  ;;  %v5737_v43 = vpop.f32.mrf.mxu1  ;;  %6030 = vmatprep.subr.bf16.mxu1 %v6530_v44  ;;  %v6570_v44 = vld [vmem:[%s8126_s1 + $0xc20] sm:$0xff]  }
 0x167   :  { %v4105_v45 = vadd.f32 %v5716_v40, %v7735_v0  ;;  %v5738_v46 = vadd.f32 %v5737_v43, %v5736_v38  ;;  %6009 = vmatpush3.bf16.msra.mxu0 %v6529_v41  ;;  %v6544_v0 = vld [vmem:[%s8126_s1 + $0xb50] sm:$0xff]   ;;  %v6565_v38 = vld [vmem:[%s8126_s1 + $0xc68] sm:$0xff]   ;;  %v6569_v43 = vld [vmem:[%s8126_s1 + $0xc60] sm:$0xff]  }
 0x168   :  { %v5718_v48 = vpop.f32.mrf.mxu0  ;;  %v5739_v50 = vpop.f32.mrf.mxu1  ;;  %6010 = vmatprep.subr.bf16.mxu0 %v6532_v49  ;;  %v6567_v41 = vld [vmem:[%s8126_s1 + $0xce8] sm:$0xff]   ;;  %v6575_v49 = vld [vmem:[%s8126_s1 + $0xcd8] sm:$0xff]  }
 0x169   :  { %v7839_v51 = vadd.f32 %v5738_v46, %v4105_v45  ;;  %6031 = vmatpush3.bf16.msra.mxu1 %v6531_v47  ;;  %v6568_v42 = vld [vmem:[%s8126_s1 + $0xca8] sm:$0xff]   ;;  %v6571_v45 = vld [vmem:[%s8126_s1 + $0xce0] sm:$0xff]   ;;  %v6573_v47 = vld [vmem:[%s8126_s1 + $0xc58] sm:$0xff]  }
 0x16a   :  { %v5740_v54 = vpop.f32.mrf.mxu1  ;;  %6032 = vmatprep.subr.bf16.mxu1 %v6534_v53  ;;  %v6572_v46 = vld [vmem:[%s8126_s1 + $0xca0] sm:$0xff]   ;;  %v6574_v48 = vld [vmem:[%s8126_s1 + $0xc18] sm:$0xff]   ;;  %v6579_v53 = vld [vmem:[%s8126_s1 + $0xcd0] sm:$0xff]  }
 0x16b   :  { %6011 = vmatpush3.bf16.msra.mxu0 %v6533_v52  ;;  %v6576_v50 = vld [vmem:[%s8126_s1 + $0xc98] sm:$0xff]   ;;  %v6578_v52 = vld [vmem:[%s8126_s1 + $0xc10] sm:$0xff]  }
 0x16c   :  { %6012 = vmatprep.subr.bf16.mxu0 %v6536_v56  ;;  %v6580_v54 = vld [vmem:[%s8126_s1 + $0xc90] sm:$0xff]   ;;  %v6582_v56 = vld [vmem:[%s8126_s1 + $0xc08] sm:$0xff]  }
 0x16d   :  { %6033 = vmatpush3.bf16.msra.mxu1 %v6535_v55  ;;  %v6581_v55 = vld [vmem:[%s8126_s1 + $0xc48] sm:$0xff]  }
 0x16e   :  { %6034 = vmatprep.subr.bf16.mxu1 %v6538_v58  ;;  %v6584_v58 = vld [vmem:[%s8126_s1 + $0xc88] sm:$0xff]  }
 0x16f   :  { %6013 = vmatpush3.bf16.msra.mxu0 %v6537_v57  ;;  %v6583_v57 = vld [vmem:[%s8126_s1 + $0xcc8] sm:$0xff]  }
 0x170   :  { %6014 = vmatprep.subr.bf16.mxu0 %v6540_v60  ;;  %v6586_v60 = vld [vmem:[%s8126_s1 + $0xc00] sm:$0xff]  }
 0x171   :  { %6035 = vmatpush3.bf16.msra.mxu1 %v6539_v59  ;;  %v6585_v59 = vld [vmem:[%s8126_s1 + $0xc40] sm:$0xff]  }
 0x172   :  { %6036 = vmatprep.subr.bf16.mxu1 %v6542_v62  ;;  %v54_v62 = vld [vmem:[%s8127_s0 + $0x60] sm:$0xff] }
 0x173   :  { %6015 = vmatpush3.bf16.msra.mxu0 %v6541_v61  ;;  %v6587_v61 = vld [vmem:[%s8126_s1 + $0xcc0] sm:$0xff]  }
 0x174   :  { %6016 = vmatprep.subr.bf16.mxu0 %v6544_v0  ;;  %v6588_v0 = vld [vmem:[%s8126_s1 + $0xc80] sm:$0xff]  }
 0x175   :  { %6037 = vmatpush3.bf16.msra.mxu1 %v6543_v63  ;;  %v1136_v63 = vrot.slane %v54_v62, %v6771_v34 }
 0x176   :  { %6038 = vmatprep.subr.bf16.mxu1 %v6546_v2 }
 0x177   :  { %6017 = vmatpush3.bf16.msra.mxu0 %v6545_v1  ;;  %v1129_v1 = vcombine.high %v54_v62, %v54_v62  ;;  %v1144_v2 = vcombine.high %v1136_v63, %v1136_v63 }
 0x178   :  { %6018 = vmatprep.subr.bf16.mxu0 %v6548_v4  ;;  %v6590_v4 = vld [vmem:[%s8126_s1 + $0xd38] sm:$0xff]  }
 0x179   :  { %6039 = vmatpush3.bf16.msra.mxu1 %v6547_v3  ;;  %v1143_v3 = vrot.slane %v1129_v1, %v6771_v34  ;;  %v6591_v34 = vld [vmem:[%s8126_s1 + $0xd30] sm:$0xff]  }
 0x17a   :  { %6040 = vmatprep.subr.bf16.mxu1 %v6550_v6  ;;  %v6611_v6 = vmov 0.0  }
 0x17b   :  { %6019 = vmatpush3.bf16.msra.mxu0 %v6549_v5 }
 0x17c   :  { %6020 = vmatprep.subr.bf16.mxu0 %v6552_v8 }
 0x17d   :  { %6041 = vmatpush3.bf16.msra.mxu1 %v6551_v7  ;;  %v1145_v7 = vcombine.high %v1143_v3, %v1143_v3 }
 0x17e   :  { %6042 = vmatprep.subr.bf16.mxu1 %v6554_v10 }
 0x17f   :  { %6021 = vmatpush3.bf16.msra.mxu0 %v6553_v9 }
 0x180   :  { %6050 = vmatprep.subr.bf16.mxu0 %v6556_v15 }
 0x181   :  { %6043 = vmatpush3.bf16.msra.mxu1 %v6555_v13 }
 0x182   :  { %v5758_v17 = vpop.f32.mrf.mxu0  ;;  %4663 = vmatmul.mubr.bf16.vlgmr.msra.gmra.mxu0 %v1119_v12  ;;  %6072 = vmatprep.subr.bf16.mxu1 %v6559_v20  ;;  %v6593_v20 = vld [vmem:[%s8126_s1 + $0xd20] sm:$0xff]  }
 0x183   :  { %6051 = vmatpush3.bf16.msra.mxu0 %v6558_v19  ;;  %4742 = vmatprep.mubr.bf16.mxu0 %v1144_v2 }
 0x184   :  { %v5759_v22 = vpop.f32.mrf.mxu0  ;;  %v5780_v23 = vpop.f32.mrf.mxu1  ;;  %4703 = vmatmul.mubr.bf16.vlgmr.msra.gmra.mxu1 %v1126_v18  ;;  %6052 = vmatprep.subr.bf16.mxu0 %v6561_v26  ;;  %v6592_v18 = vld [vmem:[%s8126_s1 + $0xd28] sm:$0xff]  }
 0x185   :  { %v5760_v25 = vadd.f32 %v5759_v22, %v5758_v17  ;;  %6073 = vmatpush3.bf16.msra.mxu1 %v6560_v24  ;;  %4782 = vmatprep.mubr.bf16.mxu1 %v1145_v7  ;;  %v6595_v22 = vld [vmem:[%s8126_s1 + $0xd10] sm:$0xff]   ;;  %v6597_v24 = vld [vmem:[%s8126_s1 + $0xd00] sm:$0xff]  }
 0x186   :  { %v5761_v27 = vpop.f32.mrf.mxu0  ;;  %v5781_v28 = vpop.f32.mrf.mxu1  ;;  %6074 = vmatprep.subr.bf16.mxu1 %v6563_v32 }
 0x187   :  { %v4185_v30 = vadd.f32 %v5760_v25, %v7839_v51  ;;  %v5782_v31 = vadd.f32 %v5781_v28, %v5780_v23  ;;  %6053 = vmatpush3.bf16.msra.mxu0 %v6562_v29  ;;  %v6577_v51 = vld [vmem:[%s8126_s1 + $0xc50] sm:$0xff]   ;;  %v6596_v23 = vld [vmem:[%s8126_s1 + $0xd08] sm:$0xff]  }
 0x188   :  { %v5762_v33 = vpop.f32.mrf.mxu0  ;;  %v5783_v36 = vpop.f32.mrf.mxu1  ;;  %6054 = vmatprep.subr.bf16.mxu0 %v6565_v38  ;;  %v5091_v25 = vld.sshfl [vmem:[%s8127_s0 + $0x68] sm:$0x3 pattern:$0x76325410] }
 0x189   :  { %v7940_v37 = vadd.f32 %v5782_v31, %v4185_v30  ;;  %6075 = vmatpush3.bf16.msra.mxu1 %v6564_v35 }
 0x18a   :  { %v5784_v40 = vpop.f32.mrf.mxu1  ;;  %6076 = vmatprep.subr.bf16.mxu1 %v6567_v41 }
 0x18b   :  { %6055 = vmatpush3.bf16.msra.mxu0 %v6566_v39 }
 0x18c   :  { %6056 = vmatprep.subr.bf16.mxu0 %v6569_v43 }
 0x18d   :  { %6077 = vmatpush3.bf16.msra.mxu1 %v6568_v42 }
 0x18e   :  { %6078 = vmatprep.subr.bf16.mxu1 %v6571_v45 }
 0x18f   :  { %6057 = vmatpush3.bf16.msra.mxu0 %v6570_v44 }
 0x190   :  { %6058 = vmatprep.subr.bf16.mxu0 %v6573_v47 }
 0x191   :  { %6079 = vmatpush3.bf16.msra.mxu1 %v6572_v46 }
 0x192   :  { %6080 = vmatprep.subr.bf16.mxu1 %v6575_v49 }
 0x193   :  { %6059 = vmatpush3.bf16.msra.mxu0 %v6574_v48 }
 0x194   :  { %6060 = vmatprep.subr.bf16.mxu0 %v6577_v51 }
 0x195   :  { %6081 = vmatpush3.bf16.msra.mxu1 %v6576_v50 }
 0x196   :  { %6082 = vmatprep.subr.bf16.mxu1 %v6579_v53 }
 0x197   :  { %6061 = vmatpush3.bf16.msra.mxu0 %v6578_v52 }
 0x198   :  { %6062 = vmatprep.subr.bf16.mxu0 %v6581_v55 }
 0x199   :  { %6083 = vmatpush3.bf16.msra.mxu1 %v6580_v54 }
 0x19a   :  { %6084 = vmatprep.subr.bf16.mxu1 %v6583_v57 }
 0x19b   :  { %6063 = vmatpush3.bf16.msra.mxu0 %v6582_v56 }
 0x19c   :  { %6064 = vmatprep.subr.bf16.mxu0 %v6585_v59 }
 0x19d   :  { %6085 = vmatpush3.bf16.msra.mxu1 %v6584_v58 }
 0x19e   :  { %6086 = vmatprep.subr.bf16.mxu1 %v6587_v61 }
 0x19f   :  { %6065 = vmatpush3.bf16.msra.mxu0 %v6586_v60 }
 0x1a0   :  { %6113 = vmatprep.subr.bf16.mxu0 %v6611_v6 }
 0x1a1   :  { %6087 = vmatpush3.bf16.msra.mxu1 %v6588_v0 }
 0x1a2   :  { %v5802_v5 = vpop.f32.mrf.mxu0  ;;  %4743 = vmatmul.mubr.bf16.vlgmr.msra.gmra.mxu0 %v1136_v63  ;;  %6133 = vmatprep.subr.mxu1 %v6611_v6 }
 0x1a3   :  { %6114 = vmatpush3.bf16.msra.mxu0 %v6590_v4  ;;  %6129 = vmatprep.mubr.msk.bf16.mxu0 %vm6612_vm0, %v6611_v6 }
 0x1a4   :  { %v5803_v8 = vpop.f32.mrf.mxu0  ;;  %v5824_v9 = vpop.f32.mrf.mxu1  ;;  %4783 = vmatmul.mubr.bf16.vlgmr.msra.gmra.mxu1 %v1143_v3  ;;  %6115 = vmatprep.subr.bf16.mxu0 %v6611_v6 }
 0x1a5   :  { %v5804_v10 = vadd.f32 %v5803_v8, %v5802_v5  ;;  %6141 = vmatprep.mubr.msk.f32.mxu1 %vm6612_vm0, %v6611_v6 }
 0x1a6   :  { %v5805_v11 = vpop.f32.mrf.mxu0  ;;  %v5825_v12 = vpop.f32.mrf.mxu1 }
 0x1a7   :  { %v4265_v13 = vadd.f32 %v5804_v10, %v7940_v37  ;;  %v5826_v14 = vadd.f32 %v5825_v12, %v5824_v9  ;;  %6116 = vmatpush3.bf16.msra.mxu0 %v6591_v34 }
 0x1a8   :  { %v5806_v15 = vpop.f32.mrf.mxu0  ;;  %v5827_v16 = vpop.f32.mrf.mxu1  ;;  %6117 = vmatprep.subr.bf16.mxu0 %v6611_v6 }
 0x1a9   :  { %v4305_v17 = vadd.f32 %v5826_v14, %v4265_v13 }
 0x1aa   :  { %v5828_v19 = vpop.f32.mrf.mxu1 }
 0x1ab   :  { %6118 = vmatpush3.bf16.msra.mxu0 %v6592_v18 }
 0x1ac   :  { %6119 = vmatprep.subr.bf16.mxu0 %v6611_v6 }
 0x1af   :  { %6120 = vmatpush3.bf16.msra.mxu0 %v6593_v20 }
 0x1b0   :  { %6121 = vmatprep.subr.bf16.mxu0 %v6611_v6 }
 0x1b3   :  { %6122 = vmatpush3.bf16.msra.mxu0 %v6594_v21 }
 0x1b4   :  { %6123 = vmatprep.subr.bf16.mxu0 %v6611_v6 }
 0x1b7   :  { %6124 = vmatpush3.bf16.msra.mxu0 %v6595_v22 }
 0x1b8   :  { %6125 = vmatprep.subr.bf16.mxu0 %v6611_v6 }
 0x1bb   :  { %6126 = vmatpush3.bf16.msra.mxu0 %v6596_v23 }
 0x1bc   :  { %6127 = vmatprep.subr.bf16.mxu0 %v6611_v6 }
 0x1bf   :  { %6128 = vmatpush3.bf16.msra.mxu0 %v6597_v24 }
 0x1c2   :  { %v5846_v26 = vpop.f32.mrf.mxu0  ;;  %6130 = vmatmul.mubr.bf16.vlgmr.msra.gmra.mxu0 %v5091_v25 }
 0x1c4   :  { %v5847_v27 = vpop.f32.mrf.mxu0  ;;  %v5868_v28 = vpop.f32.mrf.mxu1 }
 0x1c5   :  { %v5848_v29 = vadd.f32 %v5847_v27, %v5846_v26 }
 0x1c6   :  { %v5849_v30 = vpop.f32.mrf.mxu0  ;;  %v5869_v31 = vpop.f32.mrf.mxu1 }
 0x1c7   :  { %v4345_v32 = vadd.f32 %v5848_v29, %v4305_v17  ;;  %v5870_v33 = vadd.f32 %v5869_v31, %v5868_v28 }
 0x1c8   :  { %v5850_v35 = vpop.f32.mrf.mxu0  ;;  %v5871_v36 = vpop.f32.mrf.mxu1 }
 0x1c9   :  { %v4385_v37 = vadd.f32 %v5870_v33, %v4345_v32 }
 0x1ca   :  { %v5872_v38 = vpop.f32.mrf.mxu1 }
 0x1e2   :  { %v5890_v39 = vpop.f32.mrf.mxu0 }
 0x1e4   :  { %v5891_v40 = vpop.f32.mrf.mxu0  ;;  %v5912_v41 = vpop.f32.mrf.mxu1 }
 0x1e5   :  { %v5892_v42 = vadd.f32 %v5891_v40, %v5890_v39 }
 0x1e6   :  { %v5893_v43 = vpop.f32.mrf.mxu0  ;;  %v5913_v44 = vpop.f32.mrf.mxu1 }
 0x1e7   :  { %v4425_v45 = vadd.f32 %v5892_v42, %v4385_v37  ;;  %v5914_v46 = vadd.f32 %v5913_v44, %v5912_v41 }
 0x1e8   :  { %v5894_v47 = vpop.f32.mrf.mxu0  ;;  %v5915_v48 = vpop.f32.mrf.mxu1 }
 0x1e9   :  { %v4465_v49 = vadd.f32 %v5914_v46, %v4425_v45  ;;  %v4864_v47 = vld [vmem:[%s8129_s5 + $0x18] sm:$0xff]  ;;  %v4863_v48 = vld [vmem:[%s8129_s5 + $0x10] sm:$0xff] }
 0x1ea   :  { %v5916_v50 = vpop.f32.mrf.mxu1  ;;  %6134 = vmatpush3.msra.mxu1 %v4864_v47 }
 0x1eb   :  { %6135 = vmatprep.subr.mxu1 %v6611_v6  ;;  %v4861_v50 = vld [vmem:[%s8129_s5] sm:$0xff] }
 0x1ec   :  { %6136 = vmatpush3.msra.mxu1 %v4863_v48 }
 0x1ed   :  { %6137 = vmatprep.subr.mxu1 %v6611_v6 }
 0x202   :  { %v5934_v51 = vpop.f32.mrf.mxu0 }
 0x204   :  { %v5935_v52 = vpop.f32.mrf.mxu0  ;;  %v5956_v53 = vpop.f32.mrf.mxu1 }
 0x205   :  { %v5936_v54 = vadd.f32 %v5935_v52, %v5934_v51  ;;  %v6613_v51 = vmov 0   ;;  %v19_v52 = vstv %s8130_s9 }
 0x206   :  { %v5937_v55 = vpop.f32.mrf.mxu0  ;;  %v5957_v56 = vpop.f32.mrf.mxu1  ;;  %6159 = vset.pattern.permute.xlu1 %v6613_v51  ;;  %6160 = vset.pattern.permute.xlu0 %v6613_v51  ;;  %20 = vst [vmem:[#allocation2] sm:$0x1] %v19_v52 }
 0x207   :  { %v4505_v57 = vadd.f32 %v5936_v54, %v4465_v49  ;;  %v5958_v58 = vadd.f32 %v5957_v56, %v5956_v53  ;;  %v4862_v49 = vld [vmem:[%s8129_s5 + $0x8] sm:$0xff]  ;;  %v5014_v54 = vld [vmem:[%s8131_s7] sm:$0x7] }
 0x208   :  { %v5938_v59 = vpop.f32.mrf.mxu0  ;;  %v5959_v60 = vpop.f32.mrf.mxu1  ;;  %6138 = vmatpush3.msra.mxu1 %v4862_v49 }
 0x209   :  { %v4545_v61 = vadd.f32 %v5958_v58, %v4505_v57  ;;  %6139 = vmatprep.subr.mxu1 %v6611_v6  ;;  %v5516_v58 = vld [vmem:[%s8132_s3] ss:$0 sm:$0xff] }
 0x20a   :  { %v5960_v62 = vpop.f32.mrf.mxu1  ;;  %6140 = vmatpush3.msra.mxu1 %v4861_v50 }
 0x20b   :  { %6144 = vmatprep.subr.mxu1 %v6611_v6 }
 0x20d   :  { %v5520_v53 = vld [vmem:[#allocation2] ss:$0 sm:$0xff] }
 0x20e   :  { %5038 = vperm.xlu1 %6159, %v5520_v53  }
 0x212   :  { %5017 = vperm.xlu1 %6159, %v5014_v54  }
 0x222   :  { %v5978_v63 = vpop.f32.mrf.mxu0 }
 0x224   :  { %v5979_v0 = vpop.f32.mrf.mxu0  ;;  %v6000_v1 = vpop.f32.mrf.mxu1 }
 0x225   :  { %v5980_v2 = vadd.f32 %v5979_v0, %v5978_v63  ;;  %v4943_v0 = vld [vmem:[%s8134_s6 + $0x18] sm:$0xff] }
 0x226   :  { %v5981_v3 = vpop.f32.mrf.mxu0  ;;  %v6001_v4 = vpop.f32.mrf.mxu1 }
 0x227   :  { %v4585_v5 = vadd.f32 %v5980_v2, %v4545_v61  ;;  %v6002_v7 = vadd.f32 %v6001_v4, %v6000_v1  ;;  %v5517_v61 = vld [vmem:[%s8133_s4] ss:$0 sm:$0xff]  ;;  %v4942_v1 = vld [vmem:[%s8134_s6 + $0x10] sm:$0xff]  ;;  %v4941_v2 = vld [vmem:[%s8134_s6 + $0x8] sm:$0xff] }
 0x228   :  { %v5982_v8 = vpop.f32.mrf.mxu0  ;;  %v6003_v9 = vpop.f32.mrf.mxu1  ;;  %v4940_v3 = vld [vmem:[%s8134_s6] sm:$0xff] }
 0x229   :  { %v4625_v10 = vadd.f32 %v6002_v7, %v4585_v5 }
 0x22a   :  { %v6004_v34 = vpop.f32.mrf.mxu1 }
 0x242   :  { %v6022_v11 = vpop.f32.mrf.mxu0 }
 0x244   :  { %v6023_v12 = vpop.f32.mrf.mxu0  ;;  %v6044_v13 = vpop.f32.mrf.mxu1 }
 0x245   :  { %v6024_v27 = vadd.f32 %v6023_v12, %v6022_v11 }
 0x246   :  { %v6025_v14 = vpop.f32.mrf.mxu0  ;;  %v6045_v15 = vpop.f32.mrf.mxu1 }
 0x247   :  { %v4665_v28 = vadd.f32 %v6024_v27, %v4625_v10  ;;  %v6046_v29 = vadd.f32 %v6045_v15, %v6044_v13  ;;  %v5030_v10 = vld [vmem:[%s8136_s8] sm:$0x7] }
 0x248   :  { %v6026_v16 = vpop.f32.mrf.mxu0  ;;  %v6047_v17 = vpop.f32.mrf.mxu1 }
 0x249   :  { %v4705_v31 = vadd.f32 %v6046_v29, %v4665_v28 }
 0x24a   :  { %v6048_v18 = vpop.f32.mrf.mxu1 }
 0x262   :  { %v6066_v19 = vpop.f32.mrf.mxu0 }
 0x264   :  { %v6067_v20 = vpop.f32.mrf.mxu0  ;;  %v6088_v21 = vpop.f32.mrf.mxu1 }
 0x265   :  { %v6068_v30 = vadd.f32 %v6067_v20, %v6066_v19 }
 0x266   :  { %v6069_v22 = vpop.f32.mrf.mxu0  ;;  %v6089_v23 = vpop.f32.mrf.mxu1 }
 0x267   :  { %v4745_v32 = vadd.f32 %v6068_v30, %v4705_v31  ;;  %v6090_v33 = vadd.f32 %v6089_v23, %v6088_v21 }
 0x268   :  { %v6070_v24 = vpop.f32.mrf.mxu0  ;;  %v6091_v25 = vpop.f32.mrf.mxu1 }
 0x269   :  { %v4785_v35 = vadd.f32 %v6090_v33, %v4745_v32 }
 0x26a   :  { %v6092_v26 = vpop.f32.mrf.mxu1 }
 0x282   :  { %v4824_v36 = vpop.f32.mrf.mxu0 }
 0x283   :  { %v4825_v37 = vadd.f32 %v4824_v36, %v4785_v35 }
 0x284   :  { %v6131_v38 = vpop.f32.mrf.mxu0 }
 0x285   :  { %v4831_v39 = vsel %vm4830_vm1, %v4825_v37, 0.0 }
 0x286   :  { %v4827_v40 = vpop.f32.mrf.mxu0  ;;  %4832 = vadd.xlane.f32.xlu0 %v4831_v39 }
 0x288   :  { %v6132_v41 = vpop.f32.mrf.mxu0 }
 0x289   :  { %v5039_v4 = vpop.permute.xlu1 %5038 }
 0x28d   :  { %v5018_v18 = vpop.permute.xlu1 %5017 }
 0x30f   :  { %v4833_v42 = vpop.xlane.xlu0 %4832 }
 0x310   :  { %v4835_v43 = vmul.f32 0.03125, %v4833_v42 }
 0x312   :  { %v4836_v44 = vsub.f32 %v4825_v37, %v4835_v43 }
 0x314   :  { %v4837_v45 = vmul.f32 %v4836_v44, %v4836_v44  ;;  %v4849_v59 = vmul.f32 %v5516_v58, %v4836_v44 }
 0x316   :  { %v4838_v46 = vsel %vm4830_vm1, %v4837_v45, 0.0 }
 0x317   :  { %4839 = vadd.xlane.f32.xlu0 %v4838_v46 }
 0x3a0   :  { %v4840_v55 = vpop.xlane.xlu0 %4839 }
 0x3a1   :  { %v4841_v56 = vmul.f32 0.03125, %v4840_v55 }
 0x3a3   :  { %v4850_v57 = vadd.f32 1e-05, %v4841_v56 }
 0x3a5   :  { %6598 = vrsqrt.f32 %v4850_v57 }
 0x3a6   :  { %6600 = vtanh.f32 %v5039_v4 }
 0x3b2   :  { %v6599_v60 = vpop.eup %6598 }
 0x3b3   :  { %v4852_v62 = vmul.f32 %v6599_v60, %v4849_v59  ;;  %v6601_v5 = vpop.eup %6600 }
 0x3b4   :  { %v5043_v7 = vadd.f32 1.0, %v6601_v5 }
 0x3b5   :  { %v4860_v63 = vadd.f32 %v5517_v61, %v4852_v62 }
 0x3b6   :  { %v5044_v8 = vmul.f32 6.0, %v5043_v7 }
 0x3b7   :  { %6142 = vmatmul.mubr.msk.f32.vlgmr.msra.gmra.mxu1 %vm4865_vm2, %v4860_v63 }
 0x3b8   :  { %6145 = vmatpush3.msra.mxu1 %v4943_v0  ;;  %6152 = vmatprep.mubr.msk.f32.mxu1 %vm6612_vm0, %v6611_v6  ;;  %v5045_v9 = vadd.f32 -10.0, %v5044_v8 }
 0x3b9   :  { %6146 = vmatprep.subr.mxu1 %v6611_v6 }
 0x3ba   :  { %6147 = vmatpush3.msra.mxu1 %v4942_v1  ;;  %5073 = vst.msk [vmem:[%s8135_s13] sm:$0x7] %vm5021_vm3, %v5045_v9  ;;  %v5046_v34 = vmul.f32 1.442695, %v5045_v9 }
 0x3bb   :  { %6148 = vmatprep.subr.mxu1 %v6611_v6 }
 0x3bc   :  { %6149 = vmatpush3.msra.mxu1 %v4941_v2  ;;  %6602 = vpow2.f32 %v5046_v34 }
 0x3bd   :  { %6150 = vmatprep.subr.mxu1 %v6611_v6  ;;  %v5050_v6 = vmul.f32 -0.5, %v5030_v10 }
 0x3be   :  { %6151 = vmatpush3.msra.mxu1 %v4940_v3 }
 0x3bf   :  { %6153 = vmatmul.mubr.msk.f32.vlgmr.msra.gmra.mxu1 %vm4865_vm2, %v4860_v63  ;;  %v5051_v11 = vmul.f32 %v5050_v6, %v5030_v10 }
 0x3c1   :  { %v5052_v12 = vsub.f32 %v5051_v11, %v5045_v9 }
 0x3c3   :  { %v5053_v13 = vsel %vm5021_vm3, %v5052_v12, 0.0 }
 0x3c4   :  { %5054 = vadd.xlane.f32.xlu0 %v5053_v13 }
 0x3c9   :  { %v6603_v14 = vpop.eup %6602 }
 0x3ca   :  { %v5048_v15 = vmul.f32 %v6603_v14, %v5030_v10 }
 0x44d   :  { %v5055_v42 = vpop.xlane.xlu0 %5054 }
 0x44e   :  { %v5521_v43 = vadd.f32 -3.675754, %v5055_v42 }
 0x477   :  { %v4935_v16 = vpop.f32.mrf.mxu1 }
 0x478   :  { %v4939_v28 = vsub.f32 0.0, %v4935_v16 }
 0x479   :  { %v6143_v17 = vpop.f32.mrf.mxu1 }
 0x47f   :  { %v5010_v19 = vpop.f32.mrf.mxu1 }
 0x480   :  { %v5020_v20 = vmul.f32 %v5018_v18, %v5010_v19 }
 0x481   :  { %v6154_v21 = vpop.f32.mrf.mxu1 }
 0x482   :  { %v5022_v22 = vsel %vm5021_vm3, %v5020_v20, 0.0 }
 0x483   :  { %v5023_v23 = vrot.slane %v5022_v22, 4 }
 0x485   :  { %v5024_v24 = vadd.f32 %v5023_v23, %v5022_v22 }
 0x487   :  { %v5025_v25 = vrot.slane %v5024_v24, 2 }
 0x489   :  { %v5026_v26 = vadd.f32 %v5025_v25, %v5024_v24 }
 0x48b   :  { %v5027_v27 = vrot.slane %v5026_v26, 1 }
 0x48d   :  { %v5028_v29 = vadd.f32 %v5027_v27, %v5026_v26 }
 0x48f   :  { %v5029_v30 = vadd.f32 %v5028_v29, %v4939_v28 }
 0x491   :  { %6604 = vtanh.f32 %v5029_v30  ;;  %v5049_v31 = vadd.f32 %v5048_v15, %v5029_v30 }
 0x493   :  { %6606 = vtanh.f32 %v5049_v31 }
 0x49e   :  { %v6605_v32 = vpop.eup %6604 }
 0x49f   :  { %5069 = vst.msk [vmem:[%s8137_s10] sm:$0x7] %vm5021_vm3, %v6605_v32 }
 0x4a0   :  { %v6607_v33 = vpop.eup %6606 }
 0x4a1   :  { %5070 = vst.msk [vmem:[%s8138_s11] sm:$0x7] %vm5021_vm3, %v6607_v33  ;;  %v5059_v35 = vmul.f32 %v6607_v33, %v6607_v33 }
 0x4a3   :  { %v5060_v36 = vsub.f32 1.0, %v5059_v35 }
 0x4a5   :  { %v5061_v37 = vmax.f32 %v5060_v36, 0.0 }
 0x4a7   :  { %v5062_v38 = vadd.f32 1e-06, %v5061_v37 }
 0x4a9   :  { %6608 = vlog2.f32 %v5062_v38 }
 0x4b6   :  { %v6609_v39 = vpop.eup %6608 }
 0x4b7   :  { %v5064_v40 = vmul.f32 0.6931472, %v6609_v39 }
 0x4b9   :  { %v5065_v41 = vsel %vm5021_vm3, %v5064_v40, 0.0 }
 0x4ba   :  { %5066 = vadd.xlane.f32.xlu1 %v5065_v41 }
 0x543   :  { %v5067_v44 = vpop.xlane.xlu1 %5066 }
 0x544   :  { %v5068_v45 = vsub.f32 %v5521_v43, %v5067_v44 }
 0x546   :  { %5072 = vst.msk [vmem:[%s8139_s12] sm:$0x7] %vm5071_vm4, %v5068_v45 }

</bundles_post_ra>
